<compile_context>
chip_gen: v5e
topology: v5e:2x2
jax: 0.10.0
libtpu: 0.0.40
codegen_flags: <defaults>
</compile_context>

<pallas_src>
import functools

import jax
import jax.numpy as jnp
from jax.experimental import pallas as pl
from jax.experimental.pallas import tpu as pltpu

LANE = 128


def _round_up(v, m):
    return (v + m - 1) // m * m


# ---------------------------------------------------------------------------
# SNConv2d weight preprocessing: spectral norm, one power iteration
# (SNGAN-style max_singular_value).
# TODO(synk): tiny weight-side matvec; kept in plain JAX, not Pallas.
# ---------------------------------------------------------------------------
def _l2normalize(v, eps=1e-12):
    return v * jax.lax.rsqrt(jnp.sum(v * v) + eps)


def _sn_weight(w, u):
    cout = w.shape[0]
    wm = w.reshape(cout, -1)                      # (Cout, Cin*kh*kw)
    v = _l2normalize(jnp.matmul(u, wm))           # (1, K)
    u_ = _l2normalize(jnp.matmul(v, wm.T))        # (1, Cout)
    sigma = jnp.sum(jnp.matmul(u_, wm) * v)
    return w / sigma


# ---------------------------------------------------------------------------
# Fused ResBlock kernel: one (sample, row-strip) per grid step
# ---------------------------------------------------------------------------
def _resblock_kernel(xp_ref, w1_ref, b1_ref, w2_ref, wsc_ref, bo_ref, o_ref,
                     e1_ref, hpad_ref, e2_ref, acc1_ref, acc2_ref,
                     *, SH, W, Cp, Chp, Cop, n_strips):
    """
    xp_ref  : (SH+4, W+2, Cp)   bf16  raw x strip (2-row vertical halo,
                                      1-col horizontal zero pad, channel pad)
    w1_ref  : (3, 3*Cp, Chp)    bf16  conv1; row index = dj*Cp + cin
    b1_ref  : (1, Chp)          f32
    w2_ref  : (3, 3*Chp, Cop)   bf16  conv2; row index = dj*Chp + chid
    wsc_ref : (Cp, Cop)         bf16  1x1 shortcut conv
    bo_ref  : (1, Cop)          f32   b2 + bsc (folded in wrapper)
    o_ref   : (SH, W, Cop)      f32
    e1_ref  : (SH+4, W, 3*Cp)   bf16  scratch: column-shifted ReLU(x) replicas
    hpad_ref: (SH+2, W+2, Chp)  bf16  scratch: hidden act, 1-col zero border
    e2_ref  : (SH+2, W, 3*Chp)  bf16  scratch: column-shifted hidden replicas
    acc1_ref: ((SH+2)*W, Chp)   f32   scratch accumulator (conv1)
    acc2_ref: (SH*W, Cop)       f32   scratch accumulator (conv2 + shortcut)
    """
    s = pl.program_id(1)
    M1 = (SH + 2) * W          # conv1 output rows incl. 1-row halo for conv2
    M2 = SH * W
    K1 = 3 * Cp
    K2 = 3 * Chp

    # --- conv1 operand staging: 3 column-shifted bf16 replicas of ReLU(x) ----
    for dj in range(3):
        e1_ref[:, :, dj * Cp:(dj + 1) * Cp] = jnp.maximum(
            xp_ref[:, dj:dj + W, :], 0.0)

    # --- conv1: 3 MXU dots (K = 3*Cp), f32 accumulation in VMEM --------------
    for di in range(3):
        a = e1_ref[di:di + SH + 2].reshape(M1, K1)
        d = jnp.dot(a, w1_ref[di], preferred_element_type=jnp.float32)
        if di == 0:
            acc1_ref[...] = d
        else:
            acc1_ref[...] += d

    # Bias + ReLU, single bf16 cast, stage with horizontal zero border
    # (conv2's padding=1 columns).
    h = jnp.maximum(acc1_ref[...] + b1_ref[...], 0.0).astype(jnp.bfloat16)
    hpad_ref[:, 1:1 + W, :] = h.reshape(SH + 2, W, Chp)
    hpad_ref[:, 0:1, :] = jnp.zeros((SH + 2, 1, Chp), jnp.bfloat16)
    hpad_ref[:, W + 1:W + 2, :] = jnp.zeros((SH + 2, 1, Chp), jnp.bfloat16)

    # At the image top/bottom, conv2's vertical zero padding replaces the halo
    # rows of h (which would otherwise be conv1 of the zero-padded x).
    @pl.when(s == 0)
    def _():
        hpad_ref[0:1, :, :] = jnp.zeros((1, W + 2, Chp), jnp.bfloat16)

    @pl.when(s == n_strips - 1)
    def _():
        hpad_ref[SH + 1:SH + 2, :, :] = jnp.zeros((1, W + 2, Chp), jnp.bfloat16)

    # --- conv2 operand staging ------------------------------------------------
    for dj in range(3):
        e2_ref[:, :, dj * Chp:(dj + 1) * Chp] = hpad_ref[:, dj:dj + W, :]

    # --- conv2 (3 dots, K = 3*Chp) + 1x1 shortcut on one VMEM accumulator -----
    for di in range(3):
        a = e2_ref[di:di + SH].reshape(M2, K2)
        d = jnp.dot(a, w2_ref[di], preferred_element_type=jnp.float32)
        if di == 0:
            acc2_ref[...] = d
        else:
            acc2_ref[...] += d

    xs = xp_ref[2:2 + SH, 1:1 + W, :].reshape(M2, Cp)      # raw x (no ReLU)
    acc2_ref[...] += jnp.dot(xs, wsc_ref[...],
                             preferred_element_type=jnp.float32)

    o_ref[...] = (acc2_ref[...] + bo_ref[...]).reshape(SH, W, Cop)


# ---------------------------------------------------------------------------
# Forward pass
# ---------------------------------------------------------------------------
def _choose_strip(H):
    # >= 8 rows per strip (amortize per-step overhead); fall back to whole image.
    if H >= 32 and H % 16 == 0:
        return 16
    if H >= 16 and H % 8 == 0:
        return 8
    return H


def resblock_forward(params, x_nchw):
    """x: (N, Cin, H, W) f32 -> (N, Cout, H, W) f32 (downsample=False, use_BN=False)."""
    N, Cin, H, W = x_nchw.shape
    hidden = params["w1"].shape[0]        # module sets hidden_channels = in_channels
    Cout = params["w2"].shape[0]

    Cp = _round_up(Cin, LANE)             # lane-dense input channels
    Chp = _round_up(hidden, LANE)         # lane-dense hidden channels
    Cop = _round_up(Cout, LANE)           # lane-dense output channels

    SH = _choose_strip(H)
    n_strips = H // SH

    # Spectral-normalize the three SNConv2d weights (weight-side, plain JAX).
    w1 = _sn_weight(params["w1"], params["u1"])
    w2 = _sn_weight(params["w2"], params["u2"])
    wsc = _sn_weight(params["wsc"], params["usc"])

    # NCHW -> NHWC, 2-row vertical halo + 1-col horizontal pad + channel pad,
    # cast to bf16 (MXU operand dtype), then gather overlapping row strips.
    x = jnp.transpose(x_nchw, (0, 2, 3, 1)).astype(jnp.float32)
    x = jnp.pad(x, ((0, 0), (2, 2), (1, 1), (0, Cp - Cin))).astype(jnp.bfloat16)
    rows = jnp.arange(n_strips)[:, None] * SH + jnp.arange(SH + 4)[None, :]
    x_strips = x[:, rows]                           # (N, n_strips, SH+4, W+2, Cp)

    # Conv weights -> tap-row-stacked GEMM layout (contraction depth 3*C).
    w1t = jnp.transpose(w1, (2, 3, 1, 0))                          # (3,3,Cin,hid)
    w1t = jnp.pad(w1t, ((0, 0), (0, 0), (0, Cp - Cin), (0, Chp - hidden)))
    w1t = w1t.reshape(3, 3 * Cp, Chp).astype(jnp.bfloat16)

    w2t = jnp.transpose(w2, (2, 3, 1, 0))                          # (3,3,hid,Cout)
    w2t = jnp.pad(w2t, ((0, 0), (0, 0), (0, Chp - hidden), (0, Cop - Cout)))
    w2t = w2t.reshape(3, 3 * Chp, Cop).astype(jnp.bfloat16)

    wsct = jnp.pad(jnp.transpose(wsc[:, :, 0, 0], (1, 0)),
                   ((0, Cp - Cin), (0, Cop - Cout))).astype(jnp.bfloat16)

    b1 = jnp.pad(params["b1"], (0, Chp - hidden)).reshape(1, Chp).astype(jnp.float32)
    bo = jnp.pad(params["b2"] + params["bsc"],
                 (0, Cop - Cout)).reshape(1, Cop).astype(jnp.float32)

    kernel = functools.partial(_resblock_kernel, SH=SH, W=W, Cp=Cp, Chp=Chp,
                               Cop=Cop, n_strips=n_strips)

    out = pl.pallas_call(
        kernel,
        out_shape=jax.ShapeDtypeStruct((N, n_strips, SH, W, Cop), jnp.float32),
        grid=(N, n_strips),
        in_specs=[
            pl.BlockSpec((None, None, SH + 4, W + 2, Cp),
                         lambda n, s: (n, s, 0, 0, 0)),
            pl.BlockSpec((3, 3 * Cp, Chp), lambda n, s: (0, 0, 0)),
            pl.BlockSpec((1, Chp), lambda n, s: (0, 0)),
            pl.BlockSpec((3, 3 * Chp, Cop), lambda n, s: (0, 0, 0)),
            pl.BlockSpec((Cp, Cop), lambda n, s: (0, 0)),
            pl.BlockSpec((1, Cop), lambda n, s: (0, 0)),
        ],
        out_specs=pl.BlockSpec((None, None, SH, W, Cop),
                               lambda n, s: (n, s, 0, 0, 0)),
        scratch_shapes=[
            pltpu.VMEM((SH + 4, W, 3 * Cp), jnp.bfloat16),      # e1
            pltpu.VMEM((SH + 2, W + 2, Chp), jnp.bfloat16),     # hpad
            pltpu.VMEM((SH + 2, W, 3 * Chp), jnp.bfloat16),     # e2
            pltpu.VMEM(((SH + 2) * W, Chp), jnp.float32),       # acc1
            pltpu.VMEM((SH * W, Cop), jnp.float32),             # acc2
        ],
        compiler_params=pltpu.CompilerParams(
            dimension_semantics=("parallel", "parallel"),
            vmem_limit_bytes=48 * 1024 * 1024,     # usage here ~2 MiB; <=48 MiB for v7x
        ),
    )(x_strips, w1t, b1, w2t, wsct, bo)

    # TODO(synk): keeping the channel-padded NHWC (or bf16) output would avoid
    # this extra HBM pass if the consumer allowed it; kept f32 NCHW to match
    # the PyTorch module interface.
    out = out.reshape(N, H, W, Cop)[..., :Cout]
    return jnp.transpose(out, (0, 3, 1, 2)).astype(jnp.float32)


# ---------------------------------------------------------------------------
# Pure-JAX reference (XLA convs) for correctness checking
# ---------------------------------------------------------------------------
def resblock_reference(params, x):
    w1 = _sn_weight(params["w1"], params["u1"])
    w2 = _sn_weight(params["w2"], params["u2"])
    wsc = _sn_weight(params["wsc"], params["usc"])

    def conv(inp, w, b, pad):
        out = jax.lax.conv_general_dilated(
            inp, w, window_strides=(1, 1),
            padding=((pad, pad), (pad, pad)),
            dimension_numbers=("NCHW", "OIHW", "NCHW"))
        return out + b.reshape(1, -1, 1, 1)

    h = conv(jnp.maximum(x, 0.0), w1, params["b1"], 1)
    h = conv(jnp.maximum(h, 0.0), w2, params["b2"], 1)
    sc = conv(x, wsc, params["bsc"], 0)
    return h + sc


# ---------------------------------------------------------------------------
# Deterministic synthetic parameters
# ---------------------------------------------------------------------------
def init_params(key, in_channels, out_channels):
    hidden = in_channels                       # ResBlock: hidden_channels = in_channels
    ks = jax.random.split(key, 9)

    def w(k, cout, cin, ksz):
        return 0.05 * jax.random.normal(k, (cout, cin, ksz, ksz), jnp.float32)

    def b(k, c):
        return 0.02 * jax.random.normal(k, (c,), jnp.float32)

    def u(k, c):  # SNConv2d power-iteration buffer
        return jax.random.normal(k, (1, c), jnp.float32)

    return {
        "w1": w(ks[0], hidden, in_channels, 3), "b1": b(ks[1], hidden), "u1": u(ks[2], hidden),
        "w2": w(ks[3], out_channels, hidden, 3), "b2": b(ks[4], out_channels), "u2": u(ks[5], out_channels),
        "wsc": w(ks[6], out_channels, in_channels, 1), "bsc": b(ks[7], out_channels), "usc": u(ks[8], out_channels),
    }


# ---------------------------------------------------------------------------
if __name__ == "__main__":
    key = jax.random.PRNGKey(0)
    k_p, k_x = jax.random.split(key)

    N, Cin, Cout, H, W = 2, 16, 32, 16, 16
    x = jax.random.normal(k_x, (N, Cin, H, W), jnp.float32)
    params = init_params(k_p, Cin, Cout)

    out = jax.jit(resblock_forward)(params, x)
    out = jax.block_until_ready(out)

    assert out.shape == (N, Cout, H, W), out.shape
    assert bool(jnp.all(jnp.isfinite(out)))

    ref = resblock_reference(params, x)
    max_err = float(jnp.max(jnp.abs(out - ref)))
    # bf16 MXU operands vs f32 reference; tightened from 1e-1.
    assert max_err < 5e-2, f"max abs error vs reference: {max_err}"

    print("KERNEL_OK")
</pallas_src>

<mosaic_0001>
module attributes {stable_mosaic.version = 11 : i64} {
  func.func @_resblock_kernel(%arg0: i32, %arg1: i32, %arg2: memref<1x1x12x18x128xbf16, #tpu.memory_space<vmem>>, %arg3: memref<3x384x128xbf16, #tpu.memory_space<vmem>>, %arg4: memref<1x128xf32, #tpu.memory_space<vmem>>, %arg5: memref<3x384x128xbf16, #tpu.memory_space<vmem>>, %arg6: memref<128x128xbf16, #tpu.memory_space<vmem>>, %arg7: memref<1x128xf32, #tpu.memory_space<vmem>>, %arg8: memref<1x1x8x16x128xf32, #tpu.memory_space<vmem>>, %arg9: memref<12x16x384xbf16, #tpu.memory_space<vmem>>, %arg10: memref<10x18x128xbf16, #tpu.memory_space<vmem>>, %arg11: memref<10x16x384xbf16, #tpu.memory_space<vmem>>, %arg12: memref<160x128xf32, #tpu.memory_space<vmem>>, %arg13: memref<128x128xf32, #tpu.memory_space<vmem>>) attributes {dimension_semantics = [#tpu.dimension_semantics<parallel>, #tpu.dimension_semantics<parallel>], iteration_bounds = array<i64: 2, 2>, scalar_prefetch = 0 : i64, scratch_operands = 5 : i64, tpu.core_type = #tpu.core_type<tc>, window_params = [{transform_indices = @transform_0, window_bounds = array<i64: 1, 1, 12, 18, 128>}, {pipeline_mode = #tpu.pipeline_mode<synchronous>, transform_indices = @transform_1, window_bounds = array<i64: 3, 384, 128>}, {pipeline_mode = #tpu.pipeline_mode<synchronous>, transform_indices = @transform_2, window_bounds = array<i64: 1, 128>}, {pipeline_mode = #tpu.pipeline_mode<synchronous>, transform_indices = @transform_3, window_bounds = array<i64: 3, 384, 128>}, {pipeline_mode = #tpu.pipeline_mode<synchronous>, transform_indices = @transform_4, window_bounds = array<i64: 128, 128>}, {pipeline_mode = #tpu.pipeline_mode<synchronous>, transform_indices = @transform_5, window_bounds = array<i64: 1, 128>}, {transform_indices = @transform_6, window_bounds = array<i64: 1, 1, 8, 16, 128>}]} {
    %c0 = arith.constant 0 : index
    %c0_0 = arith.constant 0 : index
    %c0_1 = arith.constant 0 : index
    %c0_2 = arith.constant 0 : index
    %c0_3 = arith.constant 0 : index
    %0 = vector.load %arg2[%c0, %c0_0, %c0_1, %c0_2, %c0_3] : memref<1x1x12x18x128xbf16, #tpu.memory_space<vmem>>, vector<1x1x12x16x128xbf16>
    %1 = vector.shape_cast %0 : vector<1x1x12x16x128xbf16> to vector<12x16x128xbf16>
    %cst = arith.constant 0.000000e+00 : bf16
    %2 = vector.broadcast %cst : bf16 to vector<12x16x128xbf16>
    %3 = arith.maximumf %1, %2 : vector<12x16x128xbf16>
    %c0_4 = arith.constant 0 : index
    %c0_5 = arith.constant 0 : index
    %c0_6 = arith.constant 0 : index
    %4 = vector.load %arg9[%c0_4, %c0_5, %c0_6] : memref<12x16x384xbf16, #tpu.memory_space<vmem>>, vector<12x16x128xbf16>
    tpu.vector_store %arg9[%c0_4, %c0_5, %c0_6], %3 {strides = array<i32>} : memref<12x16x384xbf16, #tpu.memory_space<vmem>>, vector<12x16x128xbf16>,
    %c0_7 = arith.constant 0 : index
    %c0_8 = arith.constant 0 : index
    %c0_9 = arith.constant 0 : index
    %c1 = arith.constant 1 : index
    %c0_10 = arith.constant 0 : index
    %5 = vector.load %arg2[%c0_7, %c0_8, %c0_9, %c1, %c0_10] : memref<1x1x12x18x128xbf16, #tpu.memory_space<vmem>>, vector<1x1x12x16x128xbf16>
    %6 = vector.shape_cast %5 : vector<1x1x12x16x128xbf16> to vector<12x16x128xbf16>
    %cst_11 = arith.constant 0.000000e+00 : bf16
    %7 = vector.broadcast %cst_11 : bf16 to vector<12x16x128xbf16>
    %8 = arith.maximumf %6, %7 : vector<12x16x128xbf16>
    %c0_12 = arith.constant 0 : index
    %c0_13 = arith.constant 0 : index
    %c128 = arith.constant 128 : index
    %9 = vector.load %arg9[%c0_12, %c0_13, %c128] : memref<12x16x384xbf16, #tpu.memory_space<vmem>>, vector<12x16x128xbf16>
    tpu.vector_store %arg9[%c0_12, %c0_13, %c128], %8 {strides = array<i32>} : memref<12x16x384xbf16, #tpu.memory_space<vmem>>, vector<12x16x128xbf16>,
    %c0_14 = arith.constant 0 : index
    %c0_15 = arith.constant 0 : index
    %c0_16 = arith.constant 0 : index
    %c2 = arith.constant 2 : index
    %c0_17 = arith.constant 0 : index
    %10 = vector.load %arg2[%c0_14, %c0_15, %c0_16, %c2, %c0_17] : memref<1x1x12x18x128xbf16, #tpu.memory_space<vmem>>, vector<1x1x12x16x128xbf16>
    %11 = vector.shape_cast %10 : vector<1x1x12x16x128xbf16> to vector<12x16x128xbf16>
    %cst_18 = arith.constant 0.000000e+00 : bf16
    %12 = vector.broadcast %cst_18 : bf16 to vector<12x16x128xbf16>
    %13 = arith.maximumf %11, %12 : vector<12x16x128xbf16>
    %c0_19 = arith.constant 0 : index
    %c0_20 = arith.constant 0 : index
    %c256 = arith.constant 256 : index
    %14 = vector.load %arg9[%c0_19, %c0_20, %c256] : memref<12x16x384xbf16, #tpu.memory_space<vmem>>, vector<12x16x128xbf16>
    tpu.vector_store %arg9[%c0_19, %c0_20, %c256], %13 {strides = array<i32>} : memref<12x16x384xbf16, #tpu.memory_space<vmem>>, vector<12x16x128xbf16>,
    %c0_21 = arith.constant 0 : index
    %c0_22 = arith.constant 0 : index
    %c0_23 = arith.constant 0 : index
    %15 = vector.load %arg9[%c0_21, %c0_22, %c0_23] : memref<12x16x384xbf16, #tpu.memory_space<vmem>>, vector<10x16x384xbf16>
    %16 = vector.shape_cast %15 : vector<10x16x384xbf16> to vector<160x384xbf16>
    %c0_24 = arith.constant 0 : index
    %c0_25 = arith.constant 0 : index
    %c0_26 = arith.constant 0 : index
    %17 = vector.load %arg3[%c0_24, %c0_25, %c0_26] : memref<3x384x128xbf16, #tpu.memory_space<vmem>>, vector<1x384x128xbf16>
    %18 = vector.shape_cast %17 : vector<1x384x128xbf16> to vector<384x128xbf16>
    %cst_27 = arith.constant dense<0.000000e+00> : vector<160x128xf32>
    %19 = tpu.matmul %16, %18, %cst_27 {dimension_numbers = #tpu.dot_dimension_numbers<[1], [0], [0], [1], [0, 0, 1, 1], [], []>} : vector<160x384xbf16>, vector<384x128xbf16>, vector<160x128xf32> -> vector<160x128xf32>
    %c0_28 = arith.constant 0 : index
    %c0_29 = arith.constant 0 : index
    %20 = vector.load %arg12[%c0_28, %c0_29] : memref<160x128xf32, #tpu.memory_space<vmem>>, vector<160x128xf32>
    tpu.vector_store %arg12[%c0_28, %c0_29], %19 {strides = array<i32>} : memref<160x128xf32, #tpu.memory_space<vmem>>, vector<160x128xf32>,
    %c1_30 = arith.constant 1 : index
    %c0_31 = arith.constant 0 : index
    %c0_32 = arith.constant 0 : index
    %21 = vector.load %arg9[%c1_30, %c0_31, %c0_32] : memref<12x16x384xbf16, #tpu.memory_space<vmem>>, vector<10x16x384xbf16>
    %22 = vector.shape_cast %21 : vector<10x16x384xbf16> to vector<160x384xbf16>
    %c1_33 = arith.constant 1 : index
    %c0_34 = arith.constant 0 : index
    %c0_35 = arith.constant 0 : index
    %23 = vector.load %arg3[%c1_33, %c0_34, %c0_35] : memref<3x384x128xbf16, #tpu.memory_space<vmem>>, vector<1x384x128xbf16>
    %24 = vector.shape_cast %23 : vector<1x384x128xbf16> to vector<384x128xbf16>
    %cst_36 = arith.constant dense<0.000000e+00> : vector<160x128xf32>
    %25 = tpu.matmul %22, %24, %cst_36 {dimension_numbers = #tpu.dot_dimension_numbers<[1], [0], [0], [1], [0, 0, 1, 1], [], []>} : vector<160x384xbf16>, vector<384x128xbf16>, vector<160x128xf32> -> vector<160x128xf32>
    %c0_37 = arith.constant 0 : index
    %c0_38 = arith.constant 0 : index
    %26 = vector.load %arg12[%c0_37, %c0_38] : memref<160x128xf32, #tpu.memory_space<vmem>>, vector<160x128xf32>
    %27 = arith.addf %26, %25 : vector<160x128xf32>
    %c0_39 = arith.constant 0 : index
    %c0_40 = arith.constant 0 : index
    %28 = vector.load %arg12[%c0_39, %c0_40] : memref<160x128xf32, #tpu.memory_space<vmem>>, vector<160x128xf32>
    tpu.vector_store %arg12[%c0_39, %c0_40], %27 {strides = array<i32>} : memref<160x128xf32, #tpu.memory_space<vmem>>, vector<160x128xf32>,
    %c2_41 = arith.constant 2 : index
    %c0_42 = arith.constant 0 : index
    %c0_43 = arith.constant 0 : index
    %29 = vector.load %arg9[%c2_41, %c0_42, %c0_43] : memref<12x16x384xbf16, #tpu.memory_space<vmem>>, vector<10x16x384xbf16>
    %30 = vector.shape_cast %29 : vector<10x16x384xbf16> to vector<160x384xbf16>
    %c2_44 = arith.constant 2 : index
    %c0_45 = arith.constant 0 : index
    %c0_46 = arith.constant 0 : index
    %31 = vector.load %arg3[%c2_44, %c0_45, %c0_46] : memref<3x384x128xbf16, #tpu.memory_space<vmem>>, vector<1x384x128xbf16>
    %32 = vector.shape_cast %31 : vector<1x384x128xbf16> to vector<384x128xbf16>
    %cst_47 = arith.constant dense<0.000000e+00> : vector<160x128xf32>
    %33 = tpu.matmul %30, %32, %cst_47 {dimension_numbers = #tpu.dot_dimension_numbers<[1], [0], [0], [1], [0, 0, 1, 1], [], []>} : vector<160x384xbf16>, vector<384x128xbf16>, vector<160x128xf32> -> vector<160x128xf32>
    %c0_48 = arith.constant 0 : index
    %c0_49 = arith.constant 0 : index
    %34 = vector.load %arg12[%c0_48, %c0_49] : memref<160x128xf32, #tpu.memory_space<vmem>>, vector<160x128xf32>
    %35 = arith.addf %34, %33 : vector<160x128xf32>
    %c0_50 = arith.constant 0 : index
    %c0_51 = arith.constant 0 : index
    %36 = vector.load %arg12[%c0_50, %c0_51] : memref<160x128xf32, #tpu.memory_space<vmem>>, vector<160x128xf32>
    tpu.vector_store %arg12[%c0_50, %c0_51], %35 {strides = array<i32>} : memref<160x128xf32, #tpu.memory_space<vmem>>, vector<160x128xf32>,
    %c0_52 = arith.constant 0 : index
    %c0_53 = arith.constant 0 : index
    %37 = vector.load %arg12[%c0_52, %c0_53] : memref<160x128xf32, #tpu.memory_space<vmem>>, vector<160x128xf32>
    %c0_54 = arith.constant 0 : index
    %c0_55 = arith.constant 0 : index
    %38 = vector.load %arg4[%c0_54, %c0_55] : memref<1x128xf32, #tpu.memory_space<vmem>>, vector<1x128xf32>
    %39 = vector.broadcast %38 : vector<1x128xf32> to vector<160x128xf32>
    %40 = arith.addf %37, %39 : vector<160x128xf32>
    %cst_56 = arith.constant 0.000000e+00 : f32
    %41 = vector.broadcast %cst_56 : f32 to vector<160x128xf32>
    %42 = arith.maximumf %40, %41 : vector<160x128xf32>
    %43 = arith.truncf %42 : vector<160x128xf32> to vector<160x128xbf16>
    %44 = vector.shape_cast %43 : vector<160x128xbf16> to vector<10x16x128xbf16>
    %c0_57 = arith.constant 0 : index
    %c1_58 = arith.constant 1 : index
    %c0_59 = arith.constant 0 : index
    %45 = vector.load %arg10[%c0_57, %c1_58, %c0_59] : memref<10x18x128xbf16, #tpu.memory_space<vmem>>, vector<10x16x128xbf16>
    tpu.vector_store %arg10[%c0_57, %c1_58, %c0_59], %44 {strides = array<i32>} : memref<10x18x128xbf16, #tpu.memory_space<vmem>>, vector<10x16x128xbf16>,
    %cst_60 = arith.constant 0.000000e+00 : bf16
    %46 = vector.broadcast %cst_60 : bf16 to vector<10x1x128xbf16>
    %c0_61 = arith.constant 0 : index
    %c0_62 = arith.constant 0 : index
    %c0_63 = arith.constant 0 : index
    %47 = vector.load %arg10[%c0_61, %c0_62, %c0_63] : memref<10x18x128xbf16, #tpu.memory_space<vmem>>, vector<10x1x128xbf16>
    tpu.vector_store %arg10[%c0_61, %c0_62, %c0_63], %46 {strides = array<i32>} : memref<10x18x128xbf16, #tpu.memory_space<vmem>>, vector<10x1x128xbf16>,
    %cst_64 = arith.constant 0.000000e+00 : bf16
    %48 = vector.broadcast %cst_64 : bf16 to vector<10x1x128xbf16>
    %c0_65 = arith.constant 0 : index
    %c17 = arith.constant 17 : index
    %c0_66 = arith.constant 0 : index
    %49 = vector.load %arg10[%c0_65, %c17, %c0_66] : memref<10x18x128xbf16, #tpu.memory_space<vmem>>, vector<10x1x128xbf16>
    tpu.vector_store %arg10[%c0_65, %c17, %c0_66], %48 {strides = array<i32>} : memref<10x18x128xbf16, #tpu.memory_space<vmem>>, vector<10x1x128xbf16>,
    %c0_i32 = arith.constant 0 : i32
    %50 = arith.cmpi eq, %arg1, %c0_i32 : i32
    %51 = arith.extui %50 : i1 to i32
    %c0_i32_67 = arith.constant 0 : i32
    %52 = arith.cmpi ne, %51, %c0_i32_67 : i32
    scf.if %52 {
      %cst_139 = arith.constant 0.000000e+00 : bf16
      %100 = vector.broadcast %cst_139 : bf16 to vector<1x18x128xbf16>
      %c0_140 = arith.constant 0 : index
      %c0_141 = arith.constant 0 : index
      %c0_142 = arith.constant 0 : index
      %101 = vector.load %arg10[%c0_140, %c0_141, %c0_142] : memref<10x18x128xbf16, #tpu.memory_space<vmem>>, vector<1x18x128xbf16>
      tpu.vector_store %arg10[%c0_140, %c0_141, %c0_142], %100 {strides = array<i32>} : memref<10x18x128xbf16, #tpu.memory_space<vmem>>, vector<1x18x128xbf16>,
    } else {
    }
    %c1_i32 = arith.constant 1 : i32
    %53 = arith.cmpi eq, %arg1, %c1_i32 : i32
    %54 = arith.extui %53 : i1 to i32
    %c0_i32_68 = arith.constant 0 : i32
    %55 = arith.cmpi ne, %54, %c0_i32_68 : i32
    scf.if %55 {
      %cst_139 = arith.constant 0.000000e+00 : bf16
      %100 = vector.broadcast %cst_139 : bf16 to vector<1x18x128xbf16>
      %c9 = arith.constant 9 : index
      %c0_140 = arith.constant 0 : index
      %c0_141 = arith.constant 0 : index
      %101 = vector.load %arg10[%c9, %c0_140, %c0_141] : memref<10x18x128xbf16, #tpu.memory_space<vmem>>, vector<1x18x128xbf16>
      tpu.vector_store %arg10[%c9, %c0_140, %c0_141], %100 {strides = array<i32>} : memref<10x18x128xbf16, #tpu.memory_space<vmem>>, vector<1x18x128xbf16>,
    } else {
    }
    %c0_69 = arith.constant 0 : index
    %c0_70 = arith.constant 0 : index
    %c0_71 = arith.constant 0 : index
    %56 = vector.load %arg10[%c0_69, %c0_70, %c0_71] : memref<10x18x128xbf16, #tpu.memory_space<vmem>>, vector<10x16x128xbf16>
    %c0_72 = arith.constant 0 : index
    %c0_73 = arith.constant 0 : index
    %c0_74 = arith.constant 0 : index
    %57 = vector.load %arg11[%c0_72, %c0_73, %c0_74] : memref<10x16x384xbf16, #tpu.memory_space<vmem>>, vector<10x16x128xbf16>
    tpu.vector_store %arg11[%c0_72, %c0_73, %c0_74], %56 {strides = array<i32>} : memref<10x16x384xbf16, #tpu.memory_space<vmem>>, vector<10x16x128xbf16>,
    %c0_75 = arith.constant 0 : index
    %c1_76 = arith.constant 1 : index
    %c0_77 = arith.constant 0 : index
    %58 = vector.load %arg10[%c0_75, %c1_76, %c0_77] : memref<10x18x128xbf16, #tpu.memory_space<vmem>>, vector<10x16x128xbf16>
    %c0_78 = arith.constant 0 : index
    %c0_79 = arith.constant 0 : index
    %c128_80 = arith.constant 128 : index
    %59 = vector.load %arg11[%c0_78, %c0_79, %c128_80] : memref<10x16x384xbf16, #tpu.memory_space<vmem>>, vector<10x16x128xbf16>
    tpu.vector_store %arg11[%c0_78, %c0_79, %c128_80], %58 {strides = array<i32>} : memref<10x16x384xbf16, #tpu.memory_space<vmem>>, vector<10x16x128xbf16>,
    %c0_81 = arith.constant 0 : index
    %c2_82 = arith.constant 2 : index
    %c0_83 = arith.constant 0 : index
    %60 = vector.load %arg10[%c0_81, %c2_82, %c0_83] : memref<10x18x128xbf16, #tpu.memory_space<vmem>>, vector<10x16x128xbf16>
    %c0_84 = arith.constant 0 : index
    %c0_85 = arith.constant 0 : index
    %c256_86 = arith.constant 256 : index
    %61 = vector.load %arg11[%c0_84, %c0_85, %c256_86] : memref<10x16x384xbf16, #tpu.memory_space<vmem>>, vector<10x16x128xbf16>
    tpu.vector_store %arg11[%c0_84, %c0_85, %c256_86], %60 {strides = array<i32>} : memref<10x16x384xbf16, #tpu.memory_space<vmem>>, vector<10x16x128xbf16>,
    %c0_87 = arith.constant 0 : index
    %c0_88 = arith.constant 0 : index
    %c0_89 = arith.constant 0 : index
    %62 = vector.load %arg11[%c0_87, %c0_88, %c0_89] : memref<10x16x384xbf16, #tpu.memory_space<vmem>>, vector<8x16x384xbf16>
    %63 = vector.shape_cast %62 : vector<8x16x384xbf16> to vector<128x384xbf16>
    %c0_90 = arith.constant 0 : index
    %c0_91 = arith.constant 0 : index
    %c0_92 = arith.constant 0 : index
    %64 = vector.load %arg5[%c0_90, %c0_91, %c0_92] : memref<3x384x128xbf16, #tpu.memory_space<vmem>>, vector<1x384x128xbf16>
    %65 = vector.shape_cast %64 : vector<1x384x128xbf16> to vector<384x128xbf16>
    %cst_93 = arith.constant dense<0.000000e+00> : vector<128x128xf32>
    %66 = tpu.matmul %63, %65, %cst_93 {dimension_numbers = #tpu.dot_dimension_numbers<[1], [0], [0], [1], [0, 0, 1, 1], [], []>} : vector<128x384xbf16>, vector<384x128xbf16>, vector<128x128xf32> -> vector<128x128xf32>
    %c0_94 = arith.constant 0 : index
    %c0_95 = arith.constant 0 : index
    %67 = vector.load %arg13[%c0_94, %c0_95] : memref<128x128xf32, #tpu.memory_space<vmem>>, vector<128x128xf32>
    tpu.vector_store %arg13[%c0_94, %c0_95], %66 {strides = array<i32>} : memref<128x128xf32, #tpu.memory_space<vmem>>, vector<128x128xf32>,
    %c1_96 = arith.constant 1 : index
    %c0_97 = arith.constant 0 : index
    %c0_98 = arith.constant 0 : index
    %68 = vector.load %arg11[%c1_96, %c0_97, %c0_98] : memref<10x16x384xbf16, #tpu.memory_space<vmem>>, vector<8x16x384xbf16>
    %69 = vector.shape_cast %68 : vector<8x16x384xbf16> to vector<128x384xbf16>
    %c1_99 = arith.constant 1 : index
    %c0_100 = arith.constant 0 : index
    %c0_101 = arith.constant 0 : index
    %70 = vector.load %arg5[%c1_99, %c0_100, %c0_101] : memref<3x384x128xbf16, #tpu.memory_space<vmem>>, vector<1x384x128xbf16>
    %71 = vector.shape_cast %70 : vector<1x384x128xbf16> to vector<384x128xbf16>
    %cst_102 = arith.constant dense<0.000000e+00> : vector<128x128xf32>
    %72 = tpu.matmul %69, %71, %cst_102 {dimension_numbers = #tpu.dot_dimension_numbers<[1], [0], [0], [1], [0, 0, 1, 1], [], []>} : vector<128x384xbf16>, vector<384x128xbf16>, vector<128x128xf32> -> vector<128x128xf32>
    %c0_103 = arith.constant 0 : index
    %c0_104 = arith.constant 0 : index
    %73 = vector.load %arg13[%c0_103, %c0_104] : memref<128x128xf32, #tpu.memory_space<vmem>>, vector<128x128xf32>
    %74 = arith.addf %73, %72 : vector<128x128xf32>
    %c0_105 = arith.constant 0 : index
    %c0_106 = arith.constant 0 : index
    %75 = vector.load %arg13[%c0_105, %c0_106] : memref<128x128xf32, #tpu.memory_space<vmem>>, vector<128x128xf32>
    tpu.vector_store %arg13[%c0_105, %c0_106], %74 {strides = array<i32>} : memref<128x128xf32, #tpu.memory_space<vmem>>, vector<128x128xf32>,
    %c2_107 = arith.constant 2 : index
    %c0_108 = arith.constant 0 : index
    %c0_109 = arith.constant 0 : index
    %76 = vector.load %arg11[%c2_107, %c0_108, %c0_109] : memref<10x16x384xbf16, #tpu.memory_space<vmem>>, vector<8x16x384xbf16>
    %77 = vector.shape_cast %76 : vector<8x16x384xbf16> to vector<128x384xbf16>
    %c2_110 = arith.constant 2 : index
    %c0_111 = arith.constant 0 : index
    %c0_112 = arith.constant 0 : index
    %78 = vector.load %arg5[%c2_110, %c0_111, %c0_112] : memref<3x384x128xbf16, #tpu.memory_space<vmem>>, vector<1x384x128xbf16>
    %79 = vector.shape_cast %78 : vector<1x384x128xbf16> to vector<384x128xbf16>
    %cst_113 = arith.constant dense<0.000000e+00> : vector<128x128xf32>
    %80 = tpu.matmul %77, %79, %cst_113 {dimension_numbers = #tpu.dot_dimension_numbers<[1], [0], [0], [1], [0, 0, 1, 1], [], []>} : vector<128x384xbf16>, vector<384x128xbf16>, vector<128x128xf32> -> vector<128x128xf32>
    %c0_114 = arith.constant 0 : index
    %c0_115 = arith.constant 0 : index
    %81 = vector.load %arg13[%c0_114, %c0_115] : memref<128x128xf32, #tpu.memory_space<vmem>>, vector<128x128xf32>
    %82 = arith.addf %81, %80 : vector<128x128xf32>
    %c0_116 = arith.constant 0 : index
    %c0_117 = arith.constant 0 : index
    %83 = vector.load %arg13[%c0_116, %c0_117] : memref<128x128xf32, #tpu.memory_space<vmem>>, vector<128x128xf32>
    tpu.vector_store %arg13[%c0_116, %c0_117], %82 {strides = array<i32>} : memref<128x128xf32, #tpu.memory_space<vmem>>, vector<128x128xf32>,
    %c0_118 = arith.constant 0 : index
    %c0_119 = arith.constant 0 : index
    %c2_120 = arith.constant 2 : index
    %c1_121 = arith.constant 1 : index
    %c0_122 = arith.constant 0 : index
    %84 = vector.load %arg2[%c0_118, %c0_119, %c2_120, %c1_121, %c0_122] : memref<1x1x12x18x128xbf16, #tpu.memory_space<vmem>>, vector<1x1x8x16x128xbf16>
    %85 = vector.shape_cast %84 : vector<1x1x8x16x128xbf16> to vector<8x16x128xbf16>
    %86 = vector.shape_cast %85 : vector<8x16x128xbf16> to vector<128x128xbf16>
    %c0_123 = arith.constant 0 : index
    %c0_124 = arith.constant 0 : index
    %87 = vector.load %arg13[%c0_123, %c0_124] : memref<128x128xf32, #tpu.memory_space<vmem>>, vector<128x128xf32>
    %c0_125 = arith.constant 0 : index
    %c0_126 = arith.constant 0 : index
    %88 = vector.load %arg6[%c0_125, %c0_126] : memref<128x128xbf16, #tpu.memory_space<vmem>>, vector<128x128xbf16>
    %cst_127 = arith.constant dense<0.000000e+00> : vector<128x128xf32>
    %89 = tpu.matmul %86, %88, %cst_127 {dimension_numbers = #tpu.dot_dimension_numbers<[1], [0], [0], [1], [0, 0, 1, 1], [], []>} : vector<128x128xbf16>, vector<128x128xbf16>, vector<128x128xf32> -> vector<128x128xf32>
    %90 = arith.addf %87, %89 : vector<128x128xf32>
    %c0_128 = arith.constant 0 : index
    %c0_129 = arith.constant 0 : index
    %91 = vector.load %arg13[%c0_128, %c0_129] : memref<128x128xf32, #tpu.memory_space<vmem>>, vector<128x128xf32>
    tpu.vector_store %arg13[%c0_128, %c0_129], %90 {strides = array<i32>} : memref<128x128xf32, #tpu.memory_space<vmem>>, vector<128x128xf32>,
    %c0_130 = arith.constant 0 : index
    %c0_131 = arith.constant 0 : index
    %92 = vector.load %arg13[%c0_130, %c0_131] : memref<128x128xf32, #tpu.memory_space<vmem>>, vector<128x128xf32>
    %c0_132 = arith.constant 0 : index
    %c0_133 = arith.constant 0 : index
    %93 = vector.load %arg7[%c0_132, %c0_133] : memref<1x128xf32, #tpu.memory_space<vmem>>, vector<1x128xf32>
    %94 = vector.broadcast %93 : vector<1x128xf32> to vector<128x128xf32>
    %95 = arith.addf %92, %94 : vector<128x128xf32>
    %96 = vector.shape_cast %95 : vector<128x128xf32> to vector<8x16x128xf32>
    %c0_134 = arith.constant 0 : index
    %c0_135 = arith.constant 0 : index
    %c0_136 = arith.constant 0 : index
    %c0_137 = arith.constant 0 : index
    %c0_138 = arith.constant 0 : index
    %97 = vector.load %arg8[%c0_134, %c0_135, %c0_136, %c0_137, %c0_138] : memref<1x1x8x16x128xf32, #tpu.memory_space<vmem>>, vector<1x1x8x16x128xf32>
    %98 = vector.shape_cast %97 : vector<1x1x8x16x128xf32> to vector<8x16x128xf32>
    %99 = vector.shape_cast %96 : vector<8x16x128xf32> to vector<1x1x8x16x128xf32>
    tpu.vector_store %arg8[%c0_134, %c0_135, %c0_136, %c0_137, %c0_138], %99 {strides = array<i32>} : memref<1x1x8x16x128xf32, #tpu.memory_space<vmem>>, vector<1x1x8x16x128xf32>,
    return
  }
  func.func @transform_0(%arg0: i32, %arg1: i32) -> (i32, i32, i32, i32, i32) {
    %c0_i32 = arith.constant 0 : i32
    %c0_i32_0 = arith.constant 0 : i32
    %c0_i32_1 = arith.constant 0 : i32
    %c0_i32_2 = arith.constant 0 : i32
    return %arg0, %arg1, %c0_i32, %c0_i32_0, %c0_i32_1 : i32, i32, i32, i32, i32
  }
  func.func @transform_1(%arg0: i32, %arg1: i32) -> (i32, i32, i32) {
    %c0_i32 = arith.constant 0 : i32
    %c0_i32_0 = arith.constant 0 : i32
    %c0_i32_1 = arith.constant 0 : i32
    %c0_i32_2 = arith.constant 0 : i32
    return %c0_i32, %c0_i32_0, %c0_i32_1 : i32, i32, i32
  }
  func.func @transform_2(%arg0: i32, %arg1: i32) -> (i32, i32) {
    %c0_i32 = arith.constant 0 : i32
    %c0_i32_0 = arith.constant 0 : i32
    %c0_i32_1 = arith.constant 0 : i32
    return %c0_i32, %c0_i32_0 : i32, i32
  }
  func.func @transform_3(%arg0: i32, %arg1: i32) -> (i32, i32, i32) {
    %c0_i32 = arith.constant 0 : i32
    %c0_i32_0 = arith.constant 0 : i32
    %c0_i32_1 = arith.constant 0 : i32
    %c0_i32_2 = arith.constant 0 : i32
    return %c0_i32, %c0_i32_0, %c0_i32_1 : i32, i32, i32
  }
  func.func @transform_4(%arg0: i32, %arg1: i32) -> (i32, i32) {
    %c0_i32 = arith.constant 0 : i32
    %c0_i32_0 = arith.constant 0 : i32
    %c0_i32_1 = arith.constant 0 : i32
    return %c0_i32, %c0_i32_0 : i32, i32
  }
  func.func @transform_5(%arg0: i32, %arg1: i32) -> (i32, i32) {
    %c0_i32 = arith.constant 0 : i32
    %c0_i32_0 = arith.constant 0 : i32
    %c0_i32_1 = arith.constant 0 : i32
    return %c0_i32, %c0_i32_0 : i32, i32
  }
  func.func @transform_6(%arg0: i32, %arg1: i32) -> (i32, i32, i32, i32, i32) {
    %c0_i32 = arith.constant 0 : i32
    %c0_i32_0 = arith.constant 0 : i32
    %c0_i32_1 = arith.constant 0 : i32
    %c0_i32_2 = arith.constant 0 : i32
    return %arg0, %arg1, %c0_i32, %c0_i32_0, %c0_i32_1 : i32, i32, i32, i32, i32
  }
}

</mosaic_0001>

<bundles_post_ra>
// kernel: resblock_forward.1
= control target key start
LH: loop header
LB: loop body
LE: loop exit
PB: predicated region body
PF: predicated region fallthrough
CT: control target
= control target key end

     0   :  { %s8212_s21 = smov 0   ;;  %s8214_s22 = smov 0   ;;  %s9699_s0 = inlined_call_operand.vmem [shape: bf16[2,2,12,18,128], index: 0, kind: input, shape index: {}]   ;;  %s9700_s1 = inlined_call_operand.vmem [shape: bf16[3,384,128], index: 1, kind: input, shape index: {}]   ;;  %s9701_s2 = inlined_call_operand.vmem [shape: f32[1,128], index: 2, kind: input, shape index: {}]   ;;  %s9702_s3 = inlined_call_operand.vmem [shape: bf16[3,384,128], index: 3, kind: input, shape index: {}]   ;;  %s9703_s4 = inlined_call_operand.vmem [shape: bf16[128,128], index: 4, kind: input, shape index: {}]   ;;  %s9704_s5 = inlined_call_operand.vmem [shape: f32[1,128], index: 5, kind: input, shape index: {}]   ;;  %s9705_s6 = inlined_call_operand.vmem [shape: f32[2,2,8,16,128], index: 6, kind: output, shape index: {}]  }
   0x1   :  { %s8216_s23 = smov 0   ;;  %s8218_s24 = smov 0  }
   0x2   :  { %s8220_s25 = smov 0  }
   0x3 LB: > { %s25_s26 = sadd.s32 1, %s8165_s23  ;;  %s28_s27 = sadd.s32 1, %s8169_s24  ;;  %s8173_s25 = sphi %s8220_s25, %s16_s25   ;;  %s8169_s24 = sphi %s8218_s24, %s9731_s24   ;;  %s8165_s23 = sphi %s8216_s23, %s9730_s23   ;;  %s8161_s22 = sphi %s8214_s22, %s9729_s22   ;;  %s8157_s21 = sphi %s8212_s21, %s9728_s21  }
   0x4   : > { %p26_p0 = scmp.ge.s32.totalorder %s25_s26, 2  ;;  %p6190_p1 = scmp.ge.s32.totalorder %s8173_s25, 1 }
   0x5   : > { %p232_p2 = scmp.lt.s32.totalorder %s8173_s25, 5 }
   0x6   : > { %s9733_s26 = smov (%p26_p0, %s25_s26), 0  ;;  %s9735_s27 = smov (!%p26_p0, %s28_s27), %s8169_s24 }
   0x7   : > { %p233_p3 = pnand %p6190_p1, %p232_p2  ;;  %p30_p4 = scmp.ge.s32.totalorder %s9735_s27, 2 }
   0x9   : > { %s9737_s27 = smov (%p30_p4, %s9735_s27), 0  ;;  %236 = sbr.rel (%p233_p3) target bundleno = 1222 (0x4c6), region = 44 }
   0xe   : > { %v7730_v0 = vld [vmem:[%s9700_s1 + $0x38] sm:$0xff]  ;;  %p270_p5 = scmp.lt.s32.totalorder %s8161_s22, 1  ;;  %p272_p6 = scmp.lt.s32.totalorder %s8157_s21, 1  ;;  %v7729_v3 = vld [vmem:[%s9700_s1 + $0x30] sm:$0xff]  ;;  %v7728_v6 = vld [vmem:[%s9700_s1 + $0x28] sm:$0xff]  ;;  %vm1072_vm0 = vcmask 1042432  }
   0xf   : > { %v7746_v1 = vld [vmem:[%s9700_s1 + $0xb8] sm:$0xff]  ;;  %1599 = vmatpush.bf16.msra.mxu0 %v7730_v0  ;;  %v7745_v4 = vld [vmem:[%s9700_s1 + $0xb0] sm:$0xff]  ;;  %v7744_v7 = vld [vmem:[%s9700_s1 + $0xa8] sm:$0xff]  ;;  %vm1073_vm1 = vcmask 1046532   ;;  %vm553_vm2 = vsmask.f32 3328 }
  0x10   : > { %v7738_v2 = vld [vmem:[%s9700_s1 + $0x78] sm:$0xff]  ;;  %1717 = vmatpush.bf16.msra.mxu2 %v7746_v1  ;;  %s9739_s22 = smov (!%p270_p5, %s8161_s22), 1  ;;  %v7737_v5 = vld [vmem:[%s9700_s1 + $0x70] sm:$0xff]  ;;  %v7736_v8 = vld [vmem:[%s9700_s1 + $0x68] sm:$0xff]  ;;  %vm554_vm3 = vsmask.f32 7440 }
  0x11   : > { %1658 = vmatpush.bf16.msra.mxu1 %v7738_v2  ;;  %s273_s16 = scalar_select %p272_p6, %s8157_s21, 1  ;;  %v7727_v9 = vld [vmem:[%s9700_s1 + $0x20] sm:$0xff]  ;;  %v7726_v30 = vld [vmem:[%s9700_s1 + $0x18] sm:$0xff]  ;;  %v7725_v41 = vld [vmem:[%s9700_s1 + $0x10] sm:$0xff]  ;;  %vm3345_vm6 = vcmask 1043456   ;;  %vm3352_vm10 = vcmask 1040384  }
  0x12   : > { %s8090_s17 = smul.u32 72, %s9739_s22  ;;  %s6193_s18 = sshll.u32 %s9739_s22, 5  ;;  %v7743_v10 = vld [vmem:[%s9700_s1 + $0xa0] sm:$0xff]  ;;  %v7742_v31 = vld [vmem:[%s9700_s1 + $0x98] sm:$0xff]  ;;  %v7741_v42 = vld [vmem:[%s9700_s1 + $0x90] sm:$0xff] }
  0x13   : > { %s8089_s19 = smul.u32 36, %s273_s16  ;;  %s6192_s20 = sshll.u32 %s273_s16, 4  ;;  %1600 = vmatpush.bf16.msra.mxu0 %v7729_v3  ;;  %v7735_v11 = vld [vmem:[%s9700_s1 + $0x60] sm:$0xff]  ;;  %v7734_v36 = vld [vmem:[%s9700_s1 + $0x58] sm:$0xff]  ;;  %vm8315_vm4 = vmor %vm1072_vm0, %vm1073_vm1  ;;  %vm3346_vm7 = vsmask.f32 7938 }
  0x14   : > { %1718 = vmatpush.bf16.msra.mxu2 %v7745_v4  ;;  %s285_s8 = sadd.s32 %s6193_s18, %s6192_s20  ;;  %v7733_v50 = vld [vmem:[%s9700_s1 + $0x50] sm:$0xff]  ;;  %vm8339_vm5 = vmor %vm553_vm2, %vm554_vm3  ;;  %vm3142_vm9 = vsmask.f32 256  ;;  %vm3143_vm11 = vsmask.f32 4368  ;;  %p6951_p7 = scmp.ne.s32.totalorder %s8157_s21, 0 }
  0x15   : > { %1659 = vmatpush.bf16.msra.mxu1 %v7737_v5  ;;  %s276_s11 = sadd.s32 %s8090_s17, %s8089_s19  ;;  %s6194_s22 = sshll.u32 %s285_s8, 3  ;;  %vm8879_vm8 = vmand %vm3345_vm6, %vm3346_vm7 }
  0x16   : > { %s6191_s12 = sshll.u32 %s276_s11, 2  ;;  %s8276_s15 = scalar_lea.vmem %s9705_s6, %s6194_s22  ;;  %vm8891_vm12 = vmand %vm3352_vm10, %vm3142_vm9 }
  0x17   : > { %s8290_s7 = scalar_lea.vmem %s9699_s0, %s6191_s12  ;;  %1601 = vmatpush.bf16.msra.mxu0 %v7728_v6  ;;  %vm8896_vm13 = vmor %vm3142_vm9, %vm3143_vm11 }
  0x18   : > { %1719 = vmatpush.bf16.msra.mxu2 %v7744_v7  ;;  %v8008_v12 = vld [vmem:[%s8290_s7] sm:$0xff]   ;;  %v894_v17 = vld [vmem:[%s8290_s7 + $0x8] sm:$0x1]  ;;  %v291_v21 = vld [vmem:[%s8290_s7 + $0xc] sm:$0xff]  }
  0x19   : > { %v892_v13 = vld [vmem:[%s8290_s7] sm:$0xe]  ;;  %v893_v14 = vld [vmem:[%s8290_s7 + $0x4] sm:$0xf]  ;;  %1660 = vmatpush.bf16.msra.mxu1 %v7736_v8  ;;  %v8009_v15 = vunpack.c.l.bf16 %v8008_v12  ;;  %v8010_v16 = vunpack.c.h.bf16 %v8008_v12  ;;  %v411_v20 = vld [vmem:[%s8290_s7 + $0x8] sm:$0x1]  ;;  %v930_v22 = vunpack.c.l.bf16 %v894_v17  ;;  %v315_v24 = vunpack.c.l.bf16 %v291_v21 }
  0x1a   : > { %v928_v18 = vunpack.c.l.bf16 %v892_v13  ;;  %v929_v19 = vunpack.c.l.bf16 %v893_v14  ;;  %v447_v23 = vunpack.c.l.bf16 %v411_v20  ;;  %v316_v25 = vunpack.c.h.bf16 %v291_v21  ;;  %v895_v48 = vld [vmem:[%s8290_s7 + $0xc] sm:$0xe]  ;;  %v897_v49 = vld [vmem:[%s8290_s7 + $0x14] sm:$0x1]  ;;  %v413_v55 = vld [vmem:[%s8290_s7 + $0x10] sm:$0xf] }
  0x1b   : > { %v337_v26 = vmax.f32 %v8009_v15, 0.0  ;;  %v338_v27 = vmax.f32 %v8010_v16, 0.0  ;;  %1602 = vmatpush.bf16.msra.mxu0 %v7727_v9  ;;  %v966_v32 = vmax.f32 %v930_v22, 0.0  ;;  %v339_v34 = vmax.f32 %v315_v24, 0.0  ;;  %v414_v60 = vld [vmem:[%s8290_s7 + $0x14] sm:$0x1]  ;;  %vm8918_vm14 = vmand %vm3352_vm10, %vm3346_vm7 }
  0x1c   : > { %v964_v28 = vmax.f32 %v928_v18, 0.0  ;;  %v965_v29 = vmax.f32 %v929_v19, 0.0  ;;  %1720 = vmatpush.bf16.msra.mxu2 %v7743_v10  ;;  %v483_v33 = vmax.f32 %v447_v23, 0.0  ;;  %v340_v35 = vmax.f32 %v316_v25, 0.0  ;;  %v896_v1 = vld [vmem:[%s8290_s7 + $0xc] sm:$0xff]   ;;  %v8055_v22 = vld [vmem:[%s8290_s7 + $0x18] sm:$0xff]  }
  0x1d   : > { %1661 = vmatpush.bf16.msra.mxu1 %v7735_v11  ;;  %v361_v37 = vpack.c.bf16 %v337_v26, %v337_v26  ;;  %v362_v38 = vpack.c.bf16 %v338_v27, %v338_v27  ;;  %v1002_v43 = vpack.c.bf16 %v966_v32, %v966_v32  ;;  %v363_v46 = vpack.c.bf16 %v339_v34, %v339_v34  ;;  %v7724_v10 = vld [vmem:[%s9700_s1 + $0x8] sm:$0xff]  ;;  %v7723_v23 = vld [vmem:[%s9700_s1] sm:$0xff] }
  0x1e   : > { %v1000_v39 = vpack.c.bf16 %v964_v28, %v964_v28  ;;  %v1001_v40 = vpack.c.bf16 %v965_v29, %v965_v29  ;;  %v519_v45 = vpack.c.bf16 %v483_v33, %v483_v33  ;;  %v364_v47 = vpack.c.bf16 %v340_v35, %v340_v35  ;;  %v7740_v11 = vld [vmem:[%s9700_s1 + $0x88] sm:$0xff]  ;;  %v7739_v24 = vld [vmem:[%s9700_s1 + $0x80] sm:$0xff] }
  0x1f   : > { %385 = vst [vmem:[#allocation2] sm:$0xf] %v361_v37  ;;  %v557_v53 = vshrl.u32 %v361_v37, 16  ;;  %v560_v54 = vshll.u32 %v361_v37, 16  ;;  %1603 = vmatpush.bf16.msra.mxu0 %v7726_v30  ;;  %v1080_v56 = vrot.slane %v1002_v43, 5  ;;  %v566_v57 = vshll.u32 %v362_v38, 16 }
  0x20   : > { %v6195_v51 = vrot.slane %v1000_v39, 9  ;;  %v1077_v52 = vrot.slane %v1001_v40, 5  ;;  %1721 = vmatpush.bf16.msra.mxu2 %v7742_v31  ;;  %386 = vst [vmem:[#allocation2 + $0xc] sm:$0xf] %v362_v38  ;;  %v570_v58 = vshrl.u32 %v362_v38, 16  ;;  %v576_v59 = vshll.u32 %v519_v45, 16 }
  0x21   : > { %1662 = vmatpush.bf16.msra.mxu1 %v7734_v36  ;;  %v559_v63 = vrot.slane %v557_v53, 4  ;;  %v562_v0 = vrot.slane %v560_v54, 5  ;;  %387 = vst [vmem:[#allocation2 + $0x18] sm:$0xf] %v363_v46  ;;  %v568_v2 = vrot.slane %v566_v57, 5  ;;  %v931_v5 = vunpack.c.l.bf16 %v895_v48  ;;  %v7732_v17 = vld [vmem:[%s9700_s1 + $0x48] sm:$0xff] }
  0x22   : > { %v1078_v61 = vsel %vm8315_vm4, %v6195_v51, %v1077_v52  ;;  %v1079_v62 = vrot.slane %v1077_v52, 4  ;;  %v572_v3 = vrot.slane %v570_v58, 4  ;;  %v578_v4 = vrot.slane %v576_v59, 5  ;;  %388 = vst [vmem:[#allocation2 + $0x24] sm:$0xf] %v364_v47  ;;  %v7731_v29 = vld [vmem:[%s9700_s1 + $0x40] sm:$0xff] }
  0x23   : > { %1183 = vst [vmem:[#allocation2 + $0x8] sm:$0xf] %v1078_v61  ;;  %v563_v7 = vor.u32 %v562_v0, %v559_v63  ;;  %v932_v8 = vunpack.c.h.bf16 %v896_v1  ;;  %v933_v9 = vunpack.c.l.bf16 %v897_v49  ;;  %1604 = vmatpush.bf16.msra.mxu0 %v7725_v41  ;;  %v967_v14 = vmax.f32 %v931_v5, 0.0  ;;  %v7792_v36 = vld [vmem:[%s9700_s1 + $0x138] sm:$0xff] }
  0x24   : > { %v1081_v6 = vsel %vm8315_vm4, %v1079_v62, %v1080_v56  ;;  %1722 = vmatpush.bf16.msra.mxu2 %v7741_v42  ;;  %v573_v13 = vor.u32 %v572_v3, %v568_v2  ;;  %v448_v15 = vunpack.c.l.bf16 %v896_v1  ;;  %v449_v16 = vunpack.c.l.bf16 %v413_v55  ;;  %v898_v40 = vld [vmem:[%s8290_s7 + $0x18] sm:$0xe]  ;;  %v899_v51 = vld [vmem:[%s8290_s7 + $0x1c] sm:$0xf]  ;;  %v900_v56 = vld [vmem:[%s8290_s7 + $0x20] sm:$0x1] }
  0x25   : > { %1184 = vst [vmem:[#allocation2 + $0x14] sm:$0xf] %v1081_v6  ;;  %1663 = vmatpush.bf16.msra.mxu1 %v7733_v50  ;;  %v564_v18 = vrot.slane %v563_v7, 4  ;;  %v968_v19 = vmax.f32 %v932_v8, 0.0  ;;  %v969_v20 = vmax.f32 %v933_v9, 0.0  ;;  %v450_v21 = vunpack.c.l.bf16 %v414_v60  ;;  %v7791_v1 = vld [vmem:[%s9700_s1 + $0x130] sm:$0xff] }
  0x26   : > { %v574_v25 = vrot.slane %v573_v13, 4  ;;  %v1003_v26 = vpack.c.bf16 %v967_v14, %v967_v14  ;;  %v484_v27 = vmax.f32 %v448_v15, 0.0  ;;  %v485_v28 = vmax.f32 %v449_v16, 0.0  ;;  %v6209_v30 = vld [vmem:[#allocation2] sm:$0xf] }
  0x27   : > { %v7694_v31 = vld [vmem:[#allocation2 + $0x8] sm:$0xf0]  ;;  %v569_v32 = vsel %vm8339_vm5, %v564_v18, %v568_v2  ;;  %v1004_v33 = vpack.c.bf16 %v968_v19, %v968_v19  ;;  %v1005_v34 = vpack.c.bf16 %v969_v20, %v969_v20  ;;  %v486_v35 = vmax.f32 %v450_v21, 0.0  ;;  %1605 = vmatpush.bf16.msra.mxu0 %v7724_v10  ;;  %v417_v3 = vld [vmem:[%s8290_s7 + $0x20] sm:$0x1] }
  0x28   : > { %1723 = vmatpush.bf16.msra.mxu2 %v7740_v11  ;;  %v579_v37 = vsel %vm8339_vm5, %v574_v25, %v578_v4  ;;  %868 = vst [vmem:[#allocation2 + $0x4] sm:$0xf] %v569_v32  ;;  %v6196_v38 = vrot.slane %v1003_v26, 9  ;;  %v8013_v39 = vunpack.c.l.bf16 %v8055_v22  ;;  %v520_v45 = vpack.c.bf16 %v484_v27, %v484_v27 }
  0x29   : > { %1664 = vmatpush.bf16.msra.mxu1 %v7732_v17  ;;  %869 = vst [vmem:[#allocation2 + $0x10] sm:$0xf] %v579_v37  ;;  %v1084_v42 = vrot.slane %v1004_v33, 5  ;;  %v1087_v43 = vrot.slane %v1005_v34, 5  ;;  %v521_v46 = vpack.c.bf16 %v485_v28, %v485_v28  ;;  %v6210_v47 = vor.u32 %v7694_v31, %v6209_v30  ;;  %v295_v28 = vld [vmem:[%s8290_s7 + $0x24] sm:$0xff]  }
  0x2a   : > { %v6217_v41 = vld [vmem:[#allocation2 + $0x8] sm:$0xf]  ;;  %v522_v48 = vpack.c.bf16 %v486_v35, %v486_v35  ;;  %v8014_v49 = vunpack.c.h.bf16 %v8055_v22  ;;  %v341_v50 = vmax.f32 %v8013_v39, 0.0  ;;  %v581_v55 = vshrl.u32 %v520_v45, 16 }
  0x2b   : > { %v1085_v53 = vsel %vm8315_vm4, %v6196_v38, %v1084_v42  ;;  %v1086_v54 = vrot.slane %v1084_v42, 4  ;;  %v934_v57 = vunpack.c.l.bf16 %v898_v40  ;;  %1606 = vmatpush.bf16.msra.mxu0 %v7723_v23  ;;  %v584_v59 = vshll.u32 %v520_v45, 16  ;;  %v8374_v23 = vld [vmem:[#allocation2 + $0x18] sm:$0xf]  ;;  %v7790_v34 = vld [vmem:[%s9700_s1 + $0x128] sm:$0xff] }
  0x2c   : > { %v7695_v52 = vld [vmem:[#allocation2 + $0x10] sm:$0xf0]  ;;  %1724 = vmatpush.bf16.msra.mxu2 %v7739_v24  ;;  %1185 = vst [vmem:[#allocation2 + $0x20] sm:$0xf] %v1085_v53  ;;  %v590_v60 = vshll.u32 %v521_v46, 16  ;;  %v594_v61 = vshrl.u32 %v521_v46, 16  ;;  %v365_v7 = vpack.c.bf16 %v341_v50, %v341_v50  ;;  %v935_v11 = vunpack.c.l.bf16 %v899_v51 }
  0x2d   : > { %v6218_v58 = vor.u32 %v7695_v52, %v6217_v41  ;;  %1665 = vmatpush.bf16.msra.mxu1 %v7731_v29  ;;  %v1088_v62 = vsel %vm8315_vm4, %v1086_v54, %v1087_v43  ;;  %v583_v63 = vrot.slane %v581_v55, 4  ;;  %v600_v0 = vshll.u32 %v522_v48, 16  ;;  %v8377_v29 = vld [vmem:[#allocation2 + $0x20] sm:$0xf0] }
  0x2e   : > { %v342_v2 = vmax.f32 %v8014_v49, 0.0  ;;  %1186 = vst [vmem:[#allocation2 + $0x2c] sm:$0xf] %v1088_v62  ;;  %v586_v4 = vrot.slane %v584_v59, 5  ;;  %v592_v5 = vrot.slane %v590_v60, 5  ;;  %v596_v6 = vrot.slane %v594_v61, 4  ;;  %1607 = vmatmul.bf16.vlgmr.msra.gmra.mxu0 %v6210_v47 }
  0x2f   : > { %2249 = vmatpush.bf16.msrb.mxu0 %v7792_v36  ;;  %1725 = vmatmul.bf16.vlgmr.msra.gmra.mxu2 %v6218_v58  ;;  %v7693_v8 = vld [vmem:[#allocation2 + $0x4] sm:$0xf]  ;;  %v602_v9 = vrot.slane %v600_v0, 5  ;;  %v936_v13 = vunpack.c.l.bf16 %v900_v56  ;;  %389 = vst [vmem:[#allocation2 + $0x30] sm:$0xf] %v365_v7  ;;  %v970_v17 = vmax.f32 %v934_v57, 0.0  ;;  %v453_v18 = vunpack.c.l.bf16 %v417_v3 }
  0x30   : > { %v366_v10 = vpack.c.bf16 %v342_v2, %v342_v2  ;;  %v6211_v14 = vld [vmem:[#allocation2 + $0xc] sm:$0xf0]  ;;  %v587_v15 = vor.u32 %v586_v4, %v583_v63  ;;  %v597_v16 = vor.u32 %v596_v6, %v592_v5  ;;  %v971_v20 = vmax.f32 %v935_v11, 0.0  ;;  %v901_v40 = vld [vmem:[%s8290_s7 + $0x24] sm:$0xe] }
  0x31   : > { %v6214_v19 = vor.u32 %v7693_v8, %v6211_v14  ;;  %v972_v21 = vmax.f32 %v936_v13, 0.0  ;;  %v605_v22 = vshrl.u32 %v365_v7, 16  ;;  %v1006_v26 = vpack.c.bf16 %v970_v17, %v970_v17  ;;  %v902_v55 = vld [vmem:[%s8290_s7 + $0x24] sm:$0xff]   ;;  %v903_v59 = vld [vmem:[%s8290_s7 + $0x2c] sm:$0x1]  ;;  %v8056_v11 = vld [vmem:[%s8290_s7 + $0x30] sm:$0xff]  }
  0x32   : > { %390 = vst [vmem:[#allocation2 + $0x3c] sm:$0xf] %v366_v10  ;;  %v588_v24 = vrot.slane %v587_v15, 4  ;;  %v598_v25 = vrot.slane %v597_v16, 4  ;;  %v489_v27 = vmax.f32 %v453_v18, 0.0  ;;  %v1007_v30 = vpack.c.bf16 %v971_v20, %v971_v20 }
  0x33   : > { %2250 = vmatpush.bf16.msrb.mxu0 %v7791_v1  ;;  %1666 = vmatmul.bf16.vlgmr.msra.gmra.mxu1 %v6214_v19  ;;  %v1008_v31 = vpack.c.bf16 %v972_v21, %v972_v21  ;;  %v607_v32 = vrot.slane %v605_v22, 4  ;;  %v608_v33 = vshll.u32 %v365_v7, 16  ;;  %v8382_v35 = vld [vmem:[#allocation2 + $0x20] sm:$0xf]  ;;  %v6197_v38 = vrot.slane %v1006_v26, 9 }
  0x34   : > { %v593_v36 = vsel %vm8339_vm5, %v588_v24, %v592_v5  ;;  %v603_v37 = vsel %vm8339_vm5, %v598_v25, %v602_v9  ;;  %v525_v39 = vpack.c.bf16 %v489_v27, %v489_v27  ;;  %v1091_v42 = vrot.slane %v1007_v30, 5  ;;  %v419_v1 = vld [vmem:[%s8290_s7 + $0x28] sm:$0xf]  ;;  %v420_v6 = vld [vmem:[%s8290_s7 + $0x2c] sm:$0x1] }
  0x35   : > { %v7698_v41 = vld [vmem:[#allocation2 + $0x28] sm:$0xf0]  ;;  %870 = vst [vmem:[#allocation2 + $0x1c] sm:$0xf] %v593_v36  ;;  %v1094_v43 = vrot.slane %v1008_v31, 5  ;;  %v319_v45 = vunpack.c.l.bf16 %v295_v28  ;;  %v320_v46 = vunpack.c.h.bf16 %v295_v28  ;;  %v6222_v47 = vor.u32 %v8377_v29, %v8374_v23 }
  0x36   : > { %871 = vst [vmem:[#allocation2 + $0x28] sm:$0xf] %v603_v37  ;;  %v610_v48 = vrot.slane %v608_v33, 5  ;;  %v614_v49 = vshll.u32 %v366_v10, 16  ;;  %v618_v50 = vshrl.u32 %v366_v10, 16  ;;  %v1092_v51 = vsel %vm8315_vm4, %v6197_v38, %v1091_v42 }
  0x37   : > { %2251 = vmatpush.bf16.msrb.mxu0 %v7790_v34  ;;  %v1093_v52 = vrot.slane %v1091_v42, 4  ;;  %v624_v53 = vshll.u32 %v525_v39, 16  ;;  %v343_v54 = vmax.f32 %v319_v45, 0.0  ;;  %1187 = vst [vmem:[#allocation2 + $0x38] sm:$0xf] %v1092_v51  ;;  %v937_v60 = vunpack.c.l.bf16 %v901_v40 }
  0x38   : > { %v611_v56 = vor.u32 %v610_v48, %v607_v32  ;;  %v616_v57 = vrot.slane %v614_v49, 5  ;;  %v620_v58 = vrot.slane %v618_v50, 4  ;;  %v6230_v61 = vor.u32 %v7698_v41, %v8382_v35  ;;  %v904_v35 = vld [vmem:[%s8290_s7 + $0x30] sm:$0xe]  ;;  %v905_v36 = vld [vmem:[%s8290_s7 + $0x34] sm:$0xf] }
  0x39   : > { %v1095_v62 = vsel %vm8315_vm4, %v1093_v52, %v1094_v43  ;;  %v626_v63 = vrot.slane %v624_v53, 5  ;;  %v344_v0 = vmax.f32 %v320_v46, 0.0  ;;  %v367_v4 = vpack.c.bf16 %v343_v54, %v343_v54  ;;  %v8407_v37 = vld [vmem:[#allocation2 + $0x30] sm:$0xf]  ;;  %v8409_v38 = vld [vmem:[#allocation2 + $0x38] sm:$0xf0] }
  0x3a   : > { %1188 = vst [vmem:[#allocation2 + $0x44] sm:$0xf] %v1095_v62  ;;  %v612_v2 = vrot.slane %v611_v56, 4  ;;  %v621_v3 = vor.u32 %v620_v58, %v616_v57  ;;  %v938_v5 = vunpack.c.h.bf16 %v902_v55  ;;  %v939_v8 = vunpack.c.l.bf16 %v903_v59  ;;  %v906_v48 = vld [vmem:[%s8290_s7 + $0x38] sm:$0x1]  ;;  %v7789_v58 = vld [vmem:[%s9700_s1 + $0x120] sm:$0xff] }
  0x3b   : > { %v368_v7 = vpack.c.bf16 %v344_v0, %v344_v0  ;;  %v973_v9 = vmax.f32 %v937_v60, 0.0  ;;  %v454_v10 = vunpack.c.l.bf16 %v902_v55  ;;  %391 = vst [vmem:[#allocation2 + $0x48] sm:$0xf] %v367_v4  ;;  %v455_v17 = vunpack.c.l.bf16 %v419_v1  ;;  %2252 = vmatpush.bf16.msrb.mxu0 %v7789_v58 }
  0x3c   : > { %v7696_v13 = vld [vmem:[#allocation2 + $0x1c] sm:$0xf]  ;;  %v617_v14 = vsel %vm8339_vm5, %v612_v2, %v616_v57  ;;  %v622_v15 = vrot.slane %v621_v3, 4  ;;  %v974_v16 = vmax.f32 %v938_v5, 0.0  ;;  %v975_v19 = vmax.f32 %v939_v8, 0.0 }
  0x3d   : > { %v6223_v18 = vld [vmem:[#allocation2 + $0x24] sm:$0xf0]  ;;  %872 = vst [vmem:[#allocation2 + $0x34] sm:$0xf] %v617_v14  ;;  %v1009_v20 = vpack.c.bf16 %v973_v9, %v973_v9  ;;  %v456_v21 = vunpack.c.l.bf16 %v420_v6  ;;  %v490_v22 = vmax.f32 %v454_v10, 0.0  ;;  %v491_v26 = vmax.f32 %v455_v17, 0.0 }
  0x3e   : > { %v6226_v23 = vor.u32 %v7696_v13, %v6223_v18  ;;  %v627_v24 = vsel %vm8339_vm5, %v622_v15, %v626_v63  ;;  %392 = vst [vmem:[#allocation2 + $0x54] sm:$0xf] %v368_v7  ;;  %v1010_v25 = vpack.c.bf16 %v974_v16, %v974_v16  ;;  %1612 = vmatmul.bf16.gmra.mxu0 %v6222_v47  ;;  %v8017_v33 = vunpack.c.l.bf16 %v8056_v11  ;;  %v8411_v43 = vld [vmem:[#allocation2 + $0x38] sm:$0xf] }
  0x3f   : > { %1730 = vmatmul.bf16.gmra.mxu2 %v6230_v61  ;;  %873 = vst [vmem:[#allocation2 + $0x40] sm:$0xf] %v627_v24  ;;  %v1011_v27 = vpack.c.bf16 %v975_v19, %v975_v19  ;;  %v6198_v28 = vrot.slane %v1009_v20, 9  ;;  %v492_v29 = vmax.f32 %v456_v21, 0.0  ;;  %v526_v30 = vpack.c.bf16 %v490_v22, %v490_v22  ;;  %v423_v3 = vld [vmem:[%s8290_s7 + $0x38] sm:$0x1] }
  0x40   : > { %v1098_v31 = vrot.slane %v1010_v25, 5  ;;  %v527_v32 = vpack.c.bf16 %v491_v26, %v491_v26  ;;  %v8018_v34 = vunpack.c.h.bf16 %v8056_v11  ;;  %v940_v52 = vunpack.c.l.bf16 %v904_v35  ;;  %v907_v35 = vld [vmem:[%s8290_s7 + $0x3c] sm:$0xe] }
  0x41   : > { %v1101_v39 = vrot.slane %v1011_v27, 5  ;;  %v528_v40 = vpack.c.bf16 %v492_v29, %v492_v29  ;;  %v629_v41 = vshrl.u32 %v526_v30, 16  ;;  %v632_v42 = vshll.u32 %v526_v30, 16  ;;  %v8416_v49 = vld [vmem:[#allocation2 + $0x40] sm:$0xf0] }
  0x42   : > { %v1099_v45 = vsel %vm8315_vm4, %v6198_v28, %v1098_v31  ;;  %v1100_v46 = vrot.slane %v1098_v31, 4  ;;  %v638_v47 = vshll.u32 %v527_v32, 16  ;;  %v941_v53 = vunpack.c.l.bf16 %v905_v36  ;;  %v908_v36 = vld [vmem:[%s8290_s7 + $0x3c] sm:$0xff]  }
  0x43   : > { %1671 = vmatmul.bf16.gmra.mxu1 %v6226_v23  ;;  %1189 = vst [vmem:[#allocation2 + $0x50] sm:$0xf] %v1099_v45  ;;  %v631_v50 = vrot.slane %v629_v41, 4  ;;  %v634_v51 = vrot.slane %v632_v42, 5  ;;  %v642_v56 = vshrl.u32 %v527_v32, 16  ;;  %v648_v57 = vshll.u32 %v528_v40, 16 }
  0x44   : > { %v1102_v54 = vsel %vm8315_vm4, %v1100_v46, %v1101_v39  ;;  %v640_v55 = vrot.slane %v638_v47, 5  ;;  %v345_v60 = vmax.f32 %v8017_v33, 0.0  ;;  %v346_v61 = vmax.f32 %v8018_v34, 0.0  ;;  %v7699_v13 = vld [vmem:[#allocation2 + $0x34] sm:$0xf] }
  0x45   : > { %1190 = vst [vmem:[#allocation2 + $0x5c] sm:$0xf] %v1102_v54  ;;  %v635_v59 = vor.u32 %v634_v51, %v631_v50  ;;  %v942_v62 = vunpack.c.l.bf16 %v906_v48  ;;  %v6234_v63 = vor.u32 %v8409_v38, %v8407_v37  ;;  %v6242_v0 = vor.u32 %v8416_v49, %v8411_v43  ;;  %v909_v40 = vld [vmem:[%s8290_s7 + $0x44] sm:$0x1]  ;;  %v425_v47 = vld [vmem:[%s8290_s7 + $0x40] sm:$0xf] }
  0x46   : > { %v644_v1 = vrot.slane %v642_v56, 4  ;;  %v976_v2 = vmax.f32 %v940_v52, 0.0  ;;  %v650_v5 = vrot.slane %v648_v57, 5  ;;  %v369_v6 = vpack.c.bf16 %v345_v60, %v345_v60  ;;  %v6235_v18 = vld [vmem:[#allocation2 + $0x3c] sm:$0xf0] }
  0x47   : > { %v636_v4 = vrot.slane %v635_v59, 4  ;;  %v370_v7 = vpack.c.bf16 %v346_v61, %v346_v61  ;;  %v977_v9 = vmax.f32 %v941_v53, 0.0  ;;  %v978_v10 = vmax.f32 %v942_v62, 0.0  ;;  %v299_v50 = vld [vmem:[%s8290_s7 + $0x3c] sm:$0xff]   ;;  %v426_v57 = vld [vmem:[%s8290_s7 + $0x44] sm:$0x1] }
  0x48   : > { %v645_v8 = vor.u32 %v644_v1, %v640_v55  ;;  %v1012_v11 = vpack.c.bf16 %v976_v2, %v976_v2  ;;  %393 = vst [vmem:[#allocation2 + $0x60] sm:$0xf] %v369_v6  ;;  %v459_v15 = vunpack.c.l.bf16 %v423_v3  ;;  %v653_v16 = vshrl.u32 %v369_v6, 16  ;;  %v6245_v1 = vld [vmem:[#allocation2 + $0x48] sm:$0xf] }
  0x49   : > { %v641_v14 = vsel %vm8339_vm5, %v636_v4, %v640_v55  ;;  %v656_v17 = vshll.u32 %v369_v6, 16  ;;  %v1013_v20 = vpack.c.bf16 %v977_v9, %v977_v9  ;;  %v1014_v21 = vpack.c.bf16 %v978_v10, %v978_v10  ;;  %394 = vst [vmem:[#allocation2 + $0x6c] sm:$0xf] %v370_v7  ;;  %v7703_v6 = vld [vmem:[#allocation2 + $0x50] sm:$0xf0] }
  0x4a   : > { %v646_v19 = vrot.slane %v645_v8, 4  ;;  %874 = vst [vmem:[#allocation2 + $0x4c] sm:$0xf] %v641_v14  ;;  %v6199_v22 = vrot.slane %v1012_v11, 9  ;;  %v495_v23 = vmax.f32 %v459_v15, 0.0  ;;  %v655_v24 = vrot.slane %v653_v16, 4 }
  0x4b   : > { %v658_v25 = vrot.slane %v656_v17, 5  ;;  %v662_v26 = vshll.u32 %v370_v7, 16  ;;  %v1105_v28 = vrot.slane %v1013_v20, 5  ;;  %v1108_v29 = vrot.slane %v1014_v21, 5 }
  0x4c   : > { %v651_v27 = vsel %vm8339_vm5, %v646_v19, %v650_v5  ;;  %v666_v30 = vshrl.u32 %v370_v7, 16  ;;  %v6238_v31 = vor.u32 %v7699_v13, %v6235_v18  ;;  %v531_v32 = vpack.c.bf16 %v495_v23, %v495_v23  ;;  %v6253_v7 = vld [vmem:[#allocation2 + $0x50] sm:$0xf]  ;;  %v7704_v11 = vld [vmem:[#allocation2 + $0x58] sm:$0xf0] }
  0x4d   : > { %875 = vst [vmem:[#allocation2 + $0x58] sm:$0xf] %v651_v27  ;;  %v659_v33 = vor.u32 %v658_v25, %v655_v24  ;;  %v664_v34 = vrot.slane %v662_v26, 5  ;;  %v1106_v37 = vsel %vm8315_vm4, %v6199_v22, %v1105_v28  ;;  %v1107_v38 = vrot.slane %v1105_v28, 4  ;;  %v8057_v26 = vld [vmem:[%s8290_s7 + $0x48] sm:$0xff]  }
  0x4e   : > { %v668_v39 = vrot.slane %v666_v30, 4  ;;  %v943_v41 = vunpack.c.l.bf16 %v907_v35  ;;  %1617 = vmatmul.bf16.gmra.mxu0 %v6234_v63  ;;  %1191 = vst [vmem:[#allocation2 + $0x68] sm:$0xf] %v1106_v37  ;;  %v672_v43 = vshll.u32 %v531_v32, 16  ;;  %v944_v45 = vunpack.c.h.bf16 %v908_v36 }
  0x4f   : > { %1735 = vmatmul.bf16.gmra.mxu2 %v6242_v0  ;;  %v660_v42 = vrot.slane %v659_v33, 4  ;;  %v945_v46 = vunpack.c.l.bf16 %v909_v40  ;;  %v1109_v48 = vsel %vm8315_vm4, %v1107_v38, %v1108_v29  ;;  %v460_v52 = vunpack.c.l.bf16 %v908_v36  ;;  %v911_v36 = vld [vmem:[%s8290_s7 + $0x4c] sm:$0xf] }
  0x50   : > { %v669_v49 = vor.u32 %v668_v39, %v664_v34  ;;  %v979_v51 = vmax.f32 %v943_v41, 0.0  ;;  %1192 = vst [vmem:[#allocation2 + $0x74] sm:$0xf] %v1109_v48  ;;  %v674_v54 = vrot.slane %v672_v43, 5  ;;  %v323_v55 = vunpack.c.l.bf16 %v299_v50  ;;  %v912_v48 = vld [vmem:[%s8290_s7 + $0x50] sm:$0x1] }
  0x51   : > { %v665_v53 = vsel %vm8339_vm5, %v660_v42, %v664_v34  ;;  %v324_v56 = vunpack.c.h.bf16 %v299_v50  ;;  %v980_v59 = vmax.f32 %v944_v45, 0.0  ;;  %v461_v61 = vunpack.c.l.bf16 %v425_v47  ;;  %v7702_v24 = vld [vmem:[#allocation2 + $0x4c] sm:$0xf]  ;;  %v910_v45 = vld [vmem:[%s8290_s7 + $0x48] sm:$0xe] }
  0x52   : > { %v670_v58 = vrot.slane %v669_v49, 4  ;;  %876 = vst [vmem:[#allocation2 + $0x64] sm:$0xf] %v665_v53  ;;  %v1015_v60 = vpack.c.bf16 %v979_v51, %v979_v51  ;;  %v347_v62 = vmax.f32 %v323_v55, 0.0  ;;  %v981_v0 = vmax.f32 %v945_v46, 0.0  ;;  %v7788_v51 = vld [vmem:[%s9700_s1 + $0x118] sm:$0xff] }
  0x53   : > { %1676 = vmatmul.bf16.gmra.mxu1 %v6238_v31  ;;  %v348_v63 = vmax.f32 %v324_v56, 0.0  ;;  %v1016_v3 = vpack.c.bf16 %v980_v59, %v980_v59  ;;  %v462_v5 = vunpack.c.l.bf16 %v426_v57  ;;  %v496_v14 = vmax.f32 %v460_v52, 0.0  ;;  %v429_v56 = vld [vmem:[%s8290_s7 + $0x50] sm:$0x1]  ;;  %2253 = vmatpush.bf16.msrb.mxu0 %v7788_v51 }
  0x54   : > { %v675_v2 = vsel %vm8339_vm5, %v670_v58, %v674_v54  ;;  %v6200_v4 = vrot.slane %v1015_v60, 9  ;;  %v371_v8 = vpack.c.bf16 %v347_v62, %v347_v62  ;;  %v1017_v10 = vpack.c.bf16 %v981_v0, %v981_v0  ;;  %v6247_v27 = vld [vmem:[#allocation2 + $0x54] sm:$0xf0] }
  0x55   : > { %877 = vst [vmem:[#allocation2 + $0x70] sm:$0xf] %v675_v2  ;;  %v372_v9 = vpack.c.bf16 %v348_v63, %v348_v63  ;;  %v1112_v13 = vrot.slane %v1016_v3, 5  ;;  %v497_v15 = vmax.f32 %v461_v61, 0.0  ;;  %v498_v16 = vmax.f32 %v462_v5, 0.0 }
  0x56   : > { %395 = vst [vmem:[#allocation2 + $0x78] sm:$0xf] %v371_v8  ;;  %v1115_v17 = vrot.slane %v1017_v10, 5  ;;  %v532_v20 = vpack.c.bf16 %v496_v14, %v496_v14  ;;  %v6246_v22 = vor.u32 %v7703_v6, %v6245_v1  ;;  %v6254_v23 = vor.u32 %v7704_v11, %v6253_v7 }
  0x57   : > { %396 = vst [vmem:[#allocation2 + $0x84] sm:$0xf] %v372_v9  ;;  %v1113_v18 = vsel %vm8315_vm4, %v6200_v4, %v1112_v13  ;;  %v1114_v19 = vrot.slane %v1112_v13, 4  ;;  %v533_v21 = vpack.c.bf16 %v497_v15, %v497_v15  ;;  %v534_v25 = vpack.c.bf16 %v498_v16, %v498_v16  ;;  %v6257_v16 = vld [vmem:[#allocation2 + $0x60] sm:$0xf] }
  0x58   : > { %1193 = vst [vmem:[#allocation2 + $0x80] sm:$0xf] %v1113_v18  ;;  %v677_v29 = vshrl.u32 %v532_v20, 16  ;;  %v680_v30 = vshll.u32 %v532_v20, 16  ;;  %v8021_v34 = vunpack.c.l.bf16 %v8057_v26  ;;  %v8022_v35 = vunpack.c.h.bf16 %v8057_v26 }
  0x59   : > { %v1116_v28 = vsel %vm8315_vm4, %v1114_v19, %v1115_v17  ;;  %v686_v31 = vshll.u32 %v533_v21, 16  ;;  %v690_v32 = vshrl.u32 %v533_v21, 16  ;;  %v696_v33 = vshll.u32 %v534_v25, 16  ;;  %v7706_v17 = vld [vmem:[#allocation2 + $0x68] sm:$0xf0] }
  0x5a   : > { %1194 = vst [vmem:[#allocation2 + $0x8c] sm:$0xf] %v1116_v28  ;;  %v679_v37 = vrot.slane %v677_v29, 4  ;;  %v682_v38 = vrot.slane %v680_v30, 5  ;;  %v947_v40 = vunpack.c.l.bf16 %v911_v36  ;;  %v6250_v41 = vor.u32 %v7702_v24, %v6247_v27  ;;  %v6265_v21 = vld [vmem:[#allocation2 + $0x68] sm:$0xf] }
  0x5b   : > { %v688_v39 = vrot.slane %v686_v31, 5  ;;  %v692_v42 = vrot.slane %v690_v32, 4  ;;  %v349_v43 = vmax.f32 %v8021_v34, 0.0  ;;  %v350_v47 = vmax.f32 %v8022_v35, 0.0  ;;  %v7707_v25 = vld [vmem:[#allocation2 + $0x70] sm:$0xf0] }
  0x5c   : > { %v683_v46 = vor.u32 %v682_v38, %v679_v37  ;;  %v946_v49 = vunpack.c.l.bf16 %v910_v45  ;;  %v983_v50 = vmax.f32 %v947_v40, 0.0  ;;  %v698_v53 = vrot.slane %v696_v33, 5  ;;  %v914_v29 = vld [vmem:[%s8290_s7 + $0x54] sm:$0xff]   ;;  %v7705_v38 = vld [vmem:[#allocation2 + $0x64] sm:$0xf] }
  0x5d   : > { %v693_v52 = vor.u32 %v692_v42, %v688_v39  ;;  %v373_v54 = vpack.c.bf16 %v349_v43, %v349_v43  ;;  %v948_v55 = vunpack.c.l.bf16 %v912_v48  ;;  %v374_v58 = vpack.c.bf16 %v350_v47, %v350_v47  ;;  %v431_v30 = vld [vmem:[%s8290_s7 + $0x58] sm:$0xf]  ;;  %v913_v43 = vld [vmem:[%s8290_s7 + $0x54] sm:$0xe]  ;;  %v915_v45 = vld [vmem:[%s8290_s7 + $0x5c] sm:$0x1] }
  0x5e   : > { %1622 = vmatmul.bf16.gmra.mxu0 %v6246_v22  ;;  %v684_v57 = vrot.slane %v683_v46, 4  ;;  %v982_v59 = vmax.f32 %v946_v49, 0.0  ;;  %v1019_v62 = vpack.c.bf16 %v983_v50, %v983_v50  ;;  %v465_v63 = vunpack.c.l.bf16 %v429_v56  ;;  %v432_v46 = vld [vmem:[%s8290_s7 + $0x5c] sm:$0x1] }
  0x5f   : > { %1740 = vmatmul.bf16.gmra.mxu2 %v6254_v23  ;;  %v694_v60 = vrot.slane %v693_v52, 4  ;;  %397 = vst [vmem:[#allocation2 + $0x90] sm:$0xf] %v373_v54  ;;  %v984_v61 = vmax.f32 %v948_v55, 0.0  ;;  %v701_v2 = vshrl.u32 %v373_v54, 16  ;;  %v704_v3 = vshll.u32 %v373_v54, 16 }
  0x60   : > { %v689_v0 = vsel %vm8339_vm5, %v684_v57, %v688_v39  ;;  %398 = vst [vmem:[#allocation2 + $0x9c] sm:$0xf] %v374_v58  ;;  %v1018_v1 = vpack.c.bf16 %v982_v59, %v982_v59  ;;  %v1119_v6 = vrot.slane %v1019_v62, 5  ;;  %v501_v8 = vmax.f32 %v465_v63, 0.0  ;;  %v6259_v39 = vld [vmem:[#allocation2 + $0x6c] sm:$0xf0] }
  0x61   : > { %v699_v4 = vsel %vm8339_vm5, %v694_v60, %v698_v53  ;;  %878 = vst [vmem:[#allocation2 + $0x7c] sm:$0xf] %v689_v0  ;;  %v1020_v5 = vpack.c.bf16 %v984_v61, %v984_v61  ;;  %v703_v9 = vrot.slane %v701_v2, 4  ;;  %v706_v10 = vrot.slane %v704_v3, 5  ;;  %v303_v54 = vld [vmem:[%s8290_s7 + $0x54] sm:$0xff]  }
  0x62   : > { %879 = vst [vmem:[#allocation2 + $0x88] sm:$0xf] %v699_v4  ;;  %v6201_v7 = vrot.slane %v1018_v1, 9  ;;  %v1121_v11 = vrot.slane %v1119_v6, 4  ;;  %v710_v14 = vshll.u32 %v374_v58, 16  ;;  %v714_v15 = vshrl.u32 %v374_v58, 16 }
  0x63   : > { %1681 = vmatmul.bf16.gmra.mxu1 %v6250_v41  ;;  %v1122_v13 = vrot.slane %v1020_v5, 5  ;;  %v537_v19 = vpack.c.bf16 %v501_v8, %v501_v8  ;;  %v707_v20 = vor.u32 %v706_v10, %v703_v9  ;;  %v466_v33 = vunpack.c.l.bf16 %v914_v29  ;;  %v7787_v2 = vld [vmem:[%s9700_s1 + $0x110] sm:$0xff] }
  0x64   : > { %v1120_v18 = vsel %vm8315_vm4, %v6201_v7, %v1119_v6  ;;  %v712_v23 = vrot.slane %v710_v14, 5  ;;  %v716_v24 = vrot.slane %v714_v15, 4  ;;  %v6258_v34 = vor.u32 %v7706_v17, %v6257_v16  ;;  %2254 = vmatpush.bf16.msrb.mxu0 %v7787_v2  ;;  %v6269_v16 = vld [vmem:[#allocation2 + $0x78] sm:$0xf]  ;;  %v7709_v17 = vld [vmem:[#allocation2 + $0x80] sm:$0xf0] }
  0x65   : > { %v1123_v22 = vsel %vm8315_vm4, %v1121_v11, %v1122_v13  ;;  %1195 = vst [vmem:[#allocation2 + $0x98] sm:$0xf] %v1120_v18  ;;  %v708_v26 = vrot.slane %v707_v20, 4  ;;  %v720_v27 = vshll.u32 %v537_v19, 16  ;;  %v6266_v35 = vor.u32 %v7707_v25, %v6265_v21  ;;  %v6277_v20 = vld [vmem:[#allocation2 + $0x80] sm:$0xf] }
  0x66   : > { %1196 = vst [vmem:[#allocation2 + $0xa4] sm:$0xf] %v1123_v22  ;;  %v717_v28 = vor.u32 %v716_v24, %v712_v23  ;;  %v467_v37 = vunpack.c.l.bf16 %v431_v30  ;;  %v950_v40 = vunpack.c.h.bf16 %v914_v29  ;;  %v502_v41 = vmax.f32 %v466_v33, 0.0  ;;  %v7710_v25 = vld [vmem:[#allocation2 + $0x88] sm:$0xf0] }
  0x67   : > { %v713_v31 = vsel %vm8339_vm5, %v708_v26, %v712_v23  ;;  %v722_v32 = vrot.slane %v720_v27, 5  ;;  %v949_v47 = vunpack.c.l.bf16 %v913_v43  ;;  %v951_v48 = vunpack.c.l.bf16 %v915_v45  ;;  %v916_v43 = vld [vmem:[%s8290_s7 + $0x60] sm:$0xe]  ;;  %v918_v45 = vld [vmem:[%s8290_s7 + $0x68] sm:$0x1] }
  0x68   : > { %v718_v36 = vrot.slane %v717_v28, 4  ;;  %880 = vst [vmem:[#allocation2 + $0x94] sm:$0xf] %v713_v31  ;;  %v986_v49 = vmax.f32 %v950_v40, 0.0  ;;  %v468_v50 = vunpack.c.l.bf16 %v432_v46  ;;  %v6262_v51 = vor.u32 %v7705_v38, %v6259_v39  ;;  %v8058_v28 = vld [vmem:[%s8290_s7 + $0x60] sm:$0xff]  }
  0x69   : > { %v503_v52 = vmax.f32 %v467_v37, 0.0  ;;  %v538_v53 = vpack.c.bf16 %v502_v41, %v502_v41  ;;  %v985_v55 = vmax.f32 %v949_v47, 0.0  ;;  %v987_v56 = vmax.f32 %v951_v48, 0.0  ;;  %v917_v38 = vld [vmem:[%s8290_s7 + $0x64] sm:$0xf] }
  0x6a   : > { %v723_v42 = vsel %vm8339_vm5, %v718_v36, %v722_v32  ;;  %v1022_v57 = vpack.c.bf16 %v986_v49, %v986_v49  ;;  %v327_v58 = vunpack.c.l.bf16 %v303_v54  ;;  %v328_v59 = vunpack.c.h.bf16 %v303_v54  ;;  %v6271_v36 = vld [vmem:[#allocation2 + $0x84] sm:$0xf0] }
  0x6b   : > { %881 = vst [vmem:[#allocation2 + $0xa0] sm:$0xf] %v723_v42  ;;  %v504_v60 = vmax.f32 %v468_v50, 0.0  ;;  %v539_v61 = vpack.c.bf16 %v503_v52, %v503_v52  ;;  %v1021_v62 = vpack.c.bf16 %v985_v55, %v985_v55  ;;  %v1023_v63 = vpack.c.bf16 %v987_v56, %v987_v56  ;;  %v435_v46 = vld [vmem:[%s8290_s7 + $0x68] sm:$0x1]  ;;  %v7784_v55 = vld [vmem:[%s9700_s1 + $0xf8] sm:$0xff] }
  0x6c   : > { %v1126_v0 = vrot.slane %v1022_v57, 5  ;;  %v725_v1 = vshrl.u32 %v538_v53, 16  ;;  %v351_v3 = vmax.f32 %v327_v58, 0.0  ;;  %v352_v4 = vmax.f32 %v328_v59, 0.0  ;;  %2190 = vmatpush.bf16.msra.mxu3 %v7784_v55 }
  0x6d   : > { %v540_v5 = vpack.c.bf16 %v504_v60, %v504_v60  ;;  %v728_v6 = vshll.u32 %v538_v53, 16  ;;  %v6202_v7 = vrot.slane %v1021_v62, 9  ;;  %v1129_v9 = vrot.slane %v1023_v63, 5  ;;  %v7783_v63 = vld [vmem:[%s9700_s1 + $0xf0] sm:$0xff] }
  0x6e   : > { %1627 = vmatmul.bf16.gmra.mxu0 %v6258_v34  ;;  %v1128_v8 = vrot.slane %v1126_v0, 4  ;;  %v727_v10 = vrot.slane %v725_v1, 4  ;;  %v375_v11 = vpack.c.bf16 %v351_v3, %v351_v3  ;;  %v376_v13 = vpack.c.bf16 %v352_v4, %v352_v4 }
  0x6f   : > { %1745 = vmatmul.bf16.gmra.mxu2 %v6266_v35  ;;  %v730_v14 = vrot.slane %v728_v6, 5  ;;  %v734_v15 = vshll.u32 %v539_v61, 16  ;;  %v1127_v18 = vsel %vm8315_vm4, %v6202_v7, %v1126_v0  ;;  %v738_v19 = vshrl.u32 %v539_v61, 16  ;;  %v7708_v35 = vld [vmem:[#allocation2 + $0x7c] sm:$0xf]  ;;  %v7786_v0 = vld [vmem:[%s9700_s1 + $0x108] sm:$0xff] }
  0x70   : > { %399 = vst [vmem:[#allocation2 + $0xa8] sm:$0xf] %v375_v11  ;;  %v1130_v21 = vsel %vm8315_vm4, %v1128_v8, %v1129_v9  ;;  %v744_v24 = vshll.u32 %v540_v5, 16  ;;  %v8025_v31 = vunpack.c.l.bf16 %v8058_v28  ;;  %v8026_v32 = vunpack.c.h.bf16 %v8058_v28  ;;  %2255 = vmatpush.bf16.msrb.mxu0 %v7786_v0  ;;  %2191 = vmatpush.bf16.msra.mxu3 %v7783_v63 }
  0x71   : > { %v731_v22 = vor.u32 %v730_v14, %v727_v10  ;;  %v736_v23 = vrot.slane %v734_v15, 5  ;;  %400 = vst [vmem:[#allocation2 + $0xb4] sm:$0xf] %v376_v13  ;;  %v740_v26 = vrot.slane %v738_v19, 4  ;;  %v6270_v33 = vor.u32 %v7709_v17, %v6269_v16  ;;  %v6281_v14 = vld [vmem:[#allocation2 + $0x90] sm:$0xf] }
  0x72   : > { %1197 = vst [vmem:[#allocation2 + $0xb0] sm:$0xf] %v1127_v18  ;;  %v746_v30 = vrot.slane %v744_v24, 5  ;;  %v6278_v34 = vor.u32 %v7710_v25, %v6277_v20  ;;  %v353_v40 = vmax.f32 %v8025_v31, 0.0  ;;  %v354_v41 = vmax.f32 %v8026_v32, 0.0  ;;  %v7782_v15 = vld [vmem:[%s9700_s1 + $0xe8] sm:$0xff] }
  0x73   : > { %1686 = vmatmul.bf16.gmra.mxu1 %v6262_v51  ;;  %v732_v27 = vrot.slane %v731_v22, 4  ;;  %1198 = vst [vmem:[#allocation2 + $0xbc] sm:$0xf] %v1130_v21  ;;  %v741_v29 = vor.u32 %v740_v26, %v736_v23  ;;  %v953_v42 = vunpack.c.l.bf16 %v917_v38  ;;  %v6274_v47 = vor.u32 %v7708_v35, %v6271_v36  ;;  %v7712_v19 = vld [vmem:[#allocation2 + $0x98] sm:$0xf0]  ;;  %v920_v26 = vld [vmem:[%s8290_s7 + $0x6c] sm:$0xff]  }
  0x74   : > { %v377_v49 = vpack.c.bf16 %v353_v40, %v353_v40  ;;  %v952_v50 = vunpack.c.l.bf16 %v916_v43  ;;  %v378_v51 = vpack.c.bf16 %v354_v41, %v354_v41  ;;  %v954_v52 = vunpack.c.l.bf16 %v918_v45  ;;  %v6289_v20 = vld [vmem:[#allocation2 + $0x98] sm:$0xf]  ;;  %v7713_v22 = vld [vmem:[#allocation2 + $0xa0] sm:$0xf0]  ;;  %2192 = vmatpush.bf16.msra.mxu3 %v7782_v15  ;;  %v6283_v35 = vld [vmem:[#allocation2 + $0x9c] sm:$0xf0] }
  0x75   : > { %v737_v37 = vsel %vm8339_vm5, %v732_v27, %v736_v23  ;;  %v742_v39 = vrot.slane %v741_v29, 4  ;;  %v989_v53 = vmax.f32 %v953_v42, 0.0  ;;  %v471_v54 = vunpack.c.l.bf16 %v435_v46  ;;  %v437_v27 = vld [vmem:[%s8290_s7 + $0x70] sm:$0xf]  ;;  %v7781_v36 = vld [vmem:[%s9700_s1 + $0xe0] sm:$0xff] }
  0x76   : > { %882 = vst [vmem:[#allocation2 + $0xac] sm:$0xf] %v737_v37  ;;  %v988_v56 = vmax.f32 %v952_v50, 0.0  ;;  %v990_v57 = vmax.f32 %v954_v52, 0.0  ;;  %v749_v61 = vshrl.u32 %v377_v49, 16  ;;  %v752_v62 = vshll.u32 %v377_v49, 16 }
  0x77   : > { %v747_v48 = vsel %vm8339_vm5, %v742_v39, %v746_v30  ;;  %401 = vst [vmem:[#allocation2 + $0xc0] sm:$0xf] %v377_v49  ;;  %v1025_v58 = vpack.c.bf16 %v989_v53, %v989_v53  ;;  %v507_v59 = vmax.f32 %v471_v54, 0.0  ;;  %v758_v4 = vshll.u32 %v378_v51, 16  ;;  %v919_v41 = vld [vmem:[%s8290_s7 + $0x6c] sm:$0xe] }
  0x78   : > { %883 = vst [vmem:[#allocation2 + $0xb8] sm:$0xf] %v747_v48  ;;  %v1024_v60 = vpack.c.bf16 %v988_v56, %v988_v56  ;;  %v1026_v1 = vpack.c.bf16 %v990_v57, %v990_v57  ;;  %v751_v6 = vrot.slane %v749_v61, 4  ;;  %v754_v7 = vrot.slane %v752_v62, 5  ;;  %v921_v42 = vld [vmem:[%s8290_s7 + $0x74] sm:$0x1]  ;;  %2193 = vmatpush.bf16.msra.mxu3 %v7781_v36 }
  0x79   : > { %402 = vst [vmem:[#allocation2 + $0xcc] sm:$0xf] %v378_v51  ;;  %v1133_v2 = vrot.slane %v1025_v58, 5  ;;  %v543_v3 = vpack.c.bf16 %v507_v59, %v507_v59  ;;  %v762_v8 = vshrl.u32 %v378_v51, 16  ;;  %v760_v11 = vrot.slane %v758_v4, 5  ;;  %v7780_v50 = vld [vmem:[%s9700_s1 + $0xd8] sm:$0xff] }
  0x7a   : > { %v6203_v5 = vrot.slane %v1024_v60, 9  ;;  %v1136_v10 = vrot.slane %v1026_v1, 5  ;;  %v755_v17 = vor.u32 %v754_v7, %v751_v6  ;;  %v472_v30 = vunpack.c.l.bf16 %v920_v26  ;;  %v438_v49 = vld [vmem:[%s8290_s7 + $0x74] sm:$0x1]  ;;  %v307_v51 = vld [vmem:[%s8290_s7 + $0x6c] sm:$0xff]   ;;  %v7800_v60 = vld [vmem:[%s9700_s1 + $0x178] sm:$0xff] }
  0x7b   : > { %v1135_v9 = vrot.slane %v1133_v2, 4  ;;  %v768_v13 = vshll.u32 %v543_v3, 16  ;;  %v764_v18 = vrot.slane %v762_v8, 4  ;;  %v473_v31 = vunpack.c.l.bf16 %v437_v27  ;;  %2308 = vmatpush.bf16.msrb.mxu1 %v7800_v60  ;;  %v7715_v15 = vld [vmem:[#allocation2 + $0xb0] sm:$0xf0] }
  0x7c   : > { %v1134_v16 = vsel %vm8315_vm4, %v6203_v5, %v1133_v2  ;;  %v756_v23 = vrot.slane %v755_v17, 4  ;;  %v6282_v32 = vor.u32 %v7712_v19, %v6281_v14  ;;  %v956_v38 = vunpack.c.h.bf16 %v920_v26  ;;  %2194 = vmatpush.bf16.msra.mxu3 %v7780_v50  ;;  %v7779_v5 = vld [vmem:[%s9700_s1 + $0xd0] sm:$0xff]  ;;  %v6293_v14 = vld [vmem:[#allocation2 + $0xa8] sm:$0xf] }
  0x7d   : > { %v1137_v21 = vsel %vm8315_vm4, %v1135_v9, %v1136_v10  ;;  %1199 = vst [vmem:[#allocation2 + $0xc8] sm:$0xf] %v1134_v16  ;;  %v765_v24 = vor.u32 %v764_v18, %v760_v11  ;;  %v770_v25 = vrot.slane %v768_v13, 5  ;;  %v508_v39 = vmax.f32 %v472_v30, 0.0  ;;  %v6301_v16 = vld [vmem:[#allocation2 + $0xb0] sm:$0xf] }
  0x7e   : > { %1632 = vmatmul.bf16.gmra.mxu0 %v6270_v33  ;;  %1200 = vst [vmem:[#allocation2 + $0xd4] sm:$0xf] %v1137_v21  ;;  %v761_v28 = vsel %vm8339_vm5, %v756_v23, %v760_v11  ;;  %v6290_v33 = vor.u32 %v7713_v22, %v6289_v20  ;;  %v509_v40 = vmax.f32 %v473_v31, 0.0  ;;  %v955_v43 = vunpack.c.l.bf16 %v919_v41  ;;  %v7799_v17 = vld [vmem:[%s9700_s1 + $0x170] sm:$0xff]  ;;  %v7716_v22 = vld [vmem:[#allocation2 + $0xb8] sm:$0xf0] }
  0x7f   : > { %1750 = vmatmul.bf16.gmra.mxu2 %v6278_v34  ;;  %v766_v29 = vrot.slane %v765_v24, 4  ;;  %v7711_v34 = vld [vmem:[#allocation2 + $0x94] sm:$0xf]  ;;  %884 = vst [vmem:[#allocation2 + $0xc4] sm:$0xf] %v761_v28  ;;  %v957_v45 = vunpack.c.l.bf16 %v921_v42  ;;  %v544_v46 = vpack.c.bf16 %v508_v39, %v508_v39  ;;  %v992_v48 = vmax.f32 %v956_v38, 0.0  ;;  %2309 = vmatpush.bf16.msrb.mxu1 %v7799_v17 }
  0x80   : > { %v991_v52 = vmax.f32 %v955_v43, 0.0  ;;  %v474_v54 = vunpack.c.l.bf16 %v438_v49  ;;  %v545_v55 = vpack.c.bf16 %v509_v40, %v509_v40  ;;  %v331_v56 = vunpack.c.l.bf16 %v307_v51  ;;  %2195 = vmatpush.bf16.msra.mxu3 %v7779_v5  ;;  %v7714_v36 = vld [vmem:[#allocation2 + $0xac] sm:$0xf]  ;;  %v7777_v38 = vld [vmem:[%s9700_s1 + $0xc0] sm:$0xff]  ;;  %v6473_v41 = vld [vmem:[#allocation2 + $0x18] sm:$0xf] }
  0x81   : > { %v771_v37 = vsel %vm8339_vm5, %v766_v29, %v770_v25  ;;  %v993_v53 = vmax.f32 %v957_v45, 0.0  ;;  %v332_v57 = vunpack.c.h.bf16 %v307_v51  ;;  %v1028_v58 = vpack.c.bf16 %v992_v48, %v992_v48  ;;  %v7778_v25 = vld [vmem:[%s9700_s1 + $0xc8] sm:$0xff]  ;;  %v7797_v40 = vld [vmem:[%s9700_s1 + $0x160] sm:$0xff]  ;;  %v7795_v48 = vld [vmem:[%s9700_s1 + $0x150] sm:$0xff] }
  0x82   : > { %885 = vst [vmem:[#allocation2 + $0xd0] sm:$0xf] %v771_v37  ;;  %v773_v59 = vshrl.u32 %v544_v46, 16  ;;  %v1027_v61 = vpack.c.bf16 %v991_v52, %v991_v52  ;;  %v510_v63 = vmax.f32 %v474_v54, 0.0  ;;  %v776_v0 = vshll.u32 %v544_v46, 16  ;;  %v7798_v29 = vld [vmem:[%s9700_s1 + $0x168] sm:$0xff] }
  0x83   : > { %1691 = vmatmul.bf16.gmra.mxu1 %v6274_v47  ;;  %v6286_v47 = vor.u32 %v7711_v34, %v6283_v35  ;;  %v1029_v62 = vpack.c.bf16 %v993_v53, %v993_v53  ;;  %v355_v1 = vmax.f32 %v331_v56, 0.0  ;;  %v356_v2 = vmax.f32 %v332_v57, 0.0  ;;  %v7785_v35 = vld [vmem:[%s9700_s1 + $0x100] sm:$0xff]  ;;  %v6295_v37 = vld [vmem:[#allocation2 + $0xb4] sm:$0xf0] }
  0x84   : > { %v1140_v3 = vrot.slane %v1028_v58, 5  ;;  %v775_v4 = vrot.slane %v773_v59, 4  ;;  %v6204_v6 = vrot.slane %v1027_v61, 9  ;;  %v546_v8 = vpack.c.bf16 %v510_v63, %v510_v63  ;;  %2196 = vmatpush.bf16.msra.mxu3 %v7778_v25  ;;  %2310 = vmatpush.bf16.msrb.mxu1 %v7798_v29  ;;  %v7748_v45 = vld [vmem:[#allocation2 + $0x20] sm:$0xf0]  ;;  %v7838_v53 = vld [vmem:[%s9700_s1 + $0x1b8] sm:$0xff] }
  0x85   : > { %v1143_v7 = vrot.slane %v1029_v62, 5  ;;  %v778_v9 = vrot.slane %v776_v0, 5  ;;  %v379_v10 = vpack.c.bf16 %v355_v1, %v355_v1  ;;  %v380_v11 = vpack.c.bf16 %v356_v2, %v356_v2  ;;  %2256 = vmatpush.bf16.msrb.mxu0 %v7785_v35  ;;  %v6305_v49 = vld [vmem:[#allocation2 + $0xc0] sm:$0xf]  ;;  %v7718_v50 = vld [vmem:[#allocation2 + $0xc8] sm:$0xf0]  ;;  %2821 = vmatpush.bf16.msrb.mxu2 %v7838_v53 }
  0x86   : > { %v1142_v13 = vrot.slane %v1140_v3, 4  ;;  %v1141_v18 = vsel %vm8315_vm4, %v6204_v6, %v1140_v3  ;;  %v782_v20 = vshll.u32 %v545_v55, 16  ;;  %v786_v21 = vshrl.u32 %v545_v55, 16  ;;  %v6313_v51 = vld [vmem:[#allocation2 + $0xc8] sm:$0xf]  ;;  %v7846_v54 = vld [vmem:[%s9700_s1 + $0x1f8] sm:$0xff] }
  0x87   : > { %v779_v19 = vor.u32 %v778_v9, %v775_v4  ;;  %403 = vst [vmem:[#allocation2 + $0xd8] sm:$0xf] %v379_v10  ;;  %v792_v24 = vshll.u32 %v546_v8, 16  ;;  %v6302_v34 = vor.u32 %v7716_v22, %v6301_v16  ;;  %v6298_v43 = vor.u32 %v7714_v36, %v6295_v37  ;;  %v7719_v52 = vld [vmem:[#allocation2 + $0xd0] sm:$0xf0]  ;;  %v7794_v55 = vld [vmem:[%s9700_s1 + $0x148] sm:$0xff] }
  0x88   : > { %v1144_v23 = vsel %vm8315_vm4, %v1142_v13, %v1143_v7  ;;  %404 = vst [vmem:[#allocation2 + $0xe4] sm:$0xf] %v380_v11  ;;  %v784_v27 = vrot.slane %v782_v20, 5  ;;  %v788_v28 = vrot.slane %v786_v21, 4  ;;  %2197 = vmatpush.bf16.msra.mxu3 %v7777_v38  ;;  %2311 = vmatpush.bf16.msrb.mxu1 %v7797_v40  ;;  %v6474_v46 = vor.u32 %v7748_v45, %v6473_v41  ;;  %v7717_v59 = vld [vmem:[#allocation2 + $0xc4] sm:$0xf] }
  0x89   : > { %v780_v26 = vrot.slane %v779_v19, 4  ;;  %1201 = vst [vmem:[#allocation2 + $0xe0] sm:$0xf] %v1141_v18  ;;  %v6306_v56 = vor.u32 %v7718_v50, %v6305_v49  ;;  %v6314_v57 = vor.u32 %v7719_v52, %v6313_v51  ;;  %v6307_v60 = vld [vmem:[#allocation2 + $0xcc] sm:$0xf0]  ;;  %v7793_v61 = vld [vmem:[%s9700_s1 + $0x140] sm:$0xff] }
  0x8a   : > { %1202 = vst [vmem:[#allocation2 + $0xec] sm:$0xf] %v1144_v23  ;;  %v789_v31 = vor.u32 %v788_v28, %v784_v27  ;;  %v6485_v62 = vld [vmem:[#allocation2 + $0x30] sm:$0xf]  ;;  %v7751_v63 = vld [vmem:[#allocation2 + $0x38] sm:$0xf0]  ;;  %v6310_v0 = vor.u32 %v7717_v59, %v6307_v60 }
  0x8b   : > { %v785_v30 = vsel %vm8339_vm5, %v780_v26, %v784_v27  ;;  %2198 = vmatmul.bf16.vlgmr.msra.gmra.mxu3 %v6474_v46  ;;  %v6486_v1 = vor.u32 %v7751_v63, %v6485_v62  ;;  %v7854_v4 = vld [vmem:[%s9700_s1 + $0x238] sm:$0xff]  ;;  %v7837_v18 = vld [vmem:[%s9700_s1 + $0x1b0] sm:$0xff]  ;;  %v6497_v23 = vld [vmem:[#allocation2 + $0x48] sm:$0xf] }
  0x8c   : > { %886 = vst [vmem:[#allocation2 + $0xdc] sm:$0xf] %v785_v30  ;;  %v790_v39 = vrot.slane %v789_v31, 4  ;;  %2880 = vmatpush.bf16.msrb.mxu3 %v7846_v54  ;;  %2939 = vmatpush.bf16.msra.mxu0 %v7854_v4  ;;  %v7845_v19 = vld [vmem:[%s9700_s1 + $0x1f0] sm:$0xff]  ;;  %v6475_v35 = vld [vmem:[#allocation2 + $0x24] sm:$0xf0] }
  0x8d   : > { %2822 = vmatpush.bf16.msrb.mxu2 %v7837_v18  ;;  %v7853_v31 = vld [vmem:[%s9700_s1 + $0x230] sm:$0xff]  ;;  %v6481_v40 = vld [vmem:[#allocation2 + $0x20] sm:$0xf]  ;;  %v7749_v41 = vld [vmem:[#allocation2 + $0x28] sm:$0xf0] }
  0x8e   : > { %1637 = vmatmul.bf16.gmra.mxu0 %v6282_v32  ;;  %v794_v32 = vrot.slane %v792_v24, 5  ;;  %v6317_v8 = vld [vmem:[#allocation2 + $0xd8] sm:$0xf]  ;;  %v7754_v24 = vld [vmem:[#allocation2 + $0x50] sm:$0xf0]  ;;  %v6482_v45 = vor.u32 %v7749_v41, %v6481_v40  ;;  %v7836_v49 = vld [vmem:[%s9700_s1 + $0x1a8] sm:$0xff] }
  0x8f   : > { %1755 = vmatmul.bf16.gmra.mxu2 %v6290_v33  ;;  %v6294_v33 = vor.u32 %v7715_v15, %v6293_v14  ;;  %v7721_v10 = vld [vmem:[#allocation2 + $0xe0] sm:$0xf0]  ;;  %v6498_v26 = vor.u32 %v7754_v24, %v6497_v23  ;;  %v7844_v50 = vld [vmem:[%s9700_s1 + $0x1e8] sm:$0xff]  ;;  %v6493_v62 = vld [vmem:[#allocation2 + $0x38] sm:$0xf] }
  0x90   : > { %v795_v42 = vsel %vm8339_vm5, %v790_v39, %v794_v32  ;;  %v6325_v11 = vld [vmem:[#allocation2 + $0xe0] sm:$0xf]  ;;  %v6318_v16 = vor.u32 %v7721_v10, %v6317_v8  ;;  %2881 = vmatpush.bf16.msrb.mxu3 %v7845_v19  ;;  %2940 = vmatpush.bf16.msra.mxu0 %v7853_v31  ;;  %v7752_v63 = vld [vmem:[#allocation2 + $0x40] sm:$0xf0]  ;;  %v6505_v23 = vld [vmem:[#allocation2 + $0x50] sm:$0xf] }
  0x91   : > { %887 = vst [vmem:[#allocation2 + $0xe8] sm:$0xf] %v795_v42  ;;  %v7722_v13 = vld [vmem:[#allocation2 + $0xe8] sm:$0xf0]  ;;  %v6509_v42 = vld [vmem:[#allocation2 + $0x60] sm:$0xf]  ;;  %2823 = vmatpush.bf16.msrb.mxu2 %v7836_v49 }
  0x92   : > { %v6326_v17 = vor.u32 %v7722_v13, %v6325_v11  ;;  %v7843_v10 = vld [vmem:[%s9700_s1 + $0x1e0] sm:$0xff]  ;;  %v7755_v24 = vld [vmem:[#allocation2 + $0x58] sm:$0xf0]  ;;  %v6545_v49 = vld [vmem:[#allocation2 + $0xa8] sm:$0xf] }
  0x93   : > { %1696 = vmatmul.bf16.gmra.mxu1 %v6286_v47  ;;  %v7796_v47 = vld [vmem:[%s9700_s1 + $0x158] sm:$0xff] }
  0x94   : > { %2312 = vmatpush.bf16.msrb.mxu1 %v7796_v47  ;;  %v7720_v21 = vld [vmem:[#allocation2 + $0xdc] sm:$0xf]  ;;  %2882 = vmatpush.bf16.msrb.mxu3 %v7844_v50  ;;  %v7766_v50 = vld [vmem:[#allocation2 + $0xb0] sm:$0xf0] }
  0x95   : > { %v7834_v41 = vld [vmem:[%s9700_s1 + $0x198] sm:$0xff] }
  0x98   : > { %2313 = vmatpush.bf16.msrb.mxu1 %v7795_v48  ;;  %v6319_v22 = vld [vmem:[#allocation2 + $0xe4] sm:$0xf0]  ;;  %2883 = vmatpush.bf16.msrb.mxu3 %v7843_v10  ;;  %v7761_v10 = vld [vmem:[#allocation2 + $0x88] sm:$0xf0] }
  0x99   : > { %v6322_v25 = vor.u32 %v7720_v21, %v6319_v22  ;;  %v7851_v21 = vld [vmem:[%s9700_s1 + $0x220] sm:$0xff] }
  0x9b   : > { %2203 = vmatmul.bf16.gmra.mxu3 %v6486_v1  ;;  %v7760_v1 = vld [vmem:[#allocation2 + $0x80] sm:$0xf0] }
  0x9c   : > { %2314 = vmatpush.bf16.msrb.mxu1 %v7794_v55  ;;  %v7750_v55 = vld [vmem:[#allocation2 + $0x34] sm:$0xf] }
  0x9e   : > { %1642 = vmatmul.bf16.gmra.mxu0 %v6294_v33 }
  0x9f   : > { %1760 = vmatmul.bf16.gmra.mxu2 %v6302_v34  ;;  %v7747_v34 = vld [vmem:[#allocation2 + $0x1c] sm:$0xf] }
  0xa0   : > { %2315 = vmatpush.bf16.msrb.mxu1 %v7793_v61  ;;  %v6478_v38 = vor.u32 %v7747_v34, %v6475_v35 }
  0xa3   : > { %1701 = vmatmul.bf16.gmra.mxu1 %v6298_v43  ;;  %v7757_v43 = vld [vmem:[#allocation2 + $0x68] sm:$0xf0] }
  0xa4   : > { %v6510_v46 = vor.u32 %v7757_v43, %v6509_v42  ;;  %v7842_v42 = vld [vmem:[%s9700_s1 + $0x1d8] sm:$0xff] }
  0xa5   : > { %2884 = vmatpush.bf16.msrb.mxu3 %v7842_v42 }
  0xab   : > { %v1608_v58 = vpop.f32.mrf.mxu0  ;;  %2208 = vmatmul.bf16.gmra.mxu3 %v6498_v26  ;;  %v7763_v26 = vld [vmem:[#allocation2 + $0x98] sm:$0xf0] }
  0xae   : > { %1647 = vmatmul.bf16.gmra.mxu0 %v6306_v56  ;;  %v6487_v56 = vld [vmem:[#allocation2 + $0x3c] sm:$0xf0] }
  0xaf   : > { %1765 = vmatmul.bf16.gmra.mxu2 %v6314_v57  ;;  %v6490_v60 = vor.u32 %v7750_v55, %v6487_v56  ;;  %v7850_v56 = vld [vmem:[%s9700_s1 + $0x218] sm:$0xff] }
  0xb0   : > { %v1667_v2 = vpop.f32.mrf.mxu1 }
  0xb1   : > { %v1668_v3 = vadd.f32 %v1667_v2, %v1608_v58  ;;  %v7852_v58 = vld [vmem:[%s9700_s1 + $0x228] sm:$0xff]  ;;  %v6494_v2 = vor.u32 %v7752_v63, %v6493_v62  ;;  %v7759_v63 = vld [vmem:[#allocation2 + $0x7c] sm:$0xf] }
  0xb2   : > { %v1726_v5 = vpop.f32.mrf.mxu2  ;;  %2941 = vmatpush.bf16.msra.mxu0 %v7852_v58 }
  0xb3   : > { %1706 = vmatmul.bf16.gmra.mxu1 %v6310_v0  ;;  %v8577_v6 = vadd.f32 %v1726_v5, %v1668_v3  ;;  %v1610_v7 = vpop.f32.mrf.mxu0  ;;  %v6521_v0 = vld [vmem:[#allocation2 + $0x78] sm:$0xf] }
  0xb4   : > { %v6522_v3 = vor.u32 %v7760_v1, %v6521_v0  ;;  %v6523_v0 = vld [vmem:[#allocation2 + $0x84] sm:$0xf0] }
  0xb6   : > { %2942 = vmatpush.bf16.msra.mxu0 %v7851_v21 }
  0xb8   : > { %v1669_v9 = vpop.f32.mrf.mxu1 }
  0xb9   : > { %v8579_v14 = vadd.f32 %v1669_v9, %v1610_v7  ;;  %v7835_v9 = vld [vmem:[%s9700_s1 + $0x1a0] sm:$0xff] }
  0xba   : > { %v8581_v15 = vpop.f32.mrf.mxu2  ;;  %2824 = vmatpush.bf16.msrb.mxu2 %v7835_v9  ;;  %2943 = vmatpush.bf16.msra.mxu0 %v7850_v56  ;;  %v6529_v9 = vld [vmem:[#allocation2 + $0x80] sm:$0xf] }
  0xbb   : > { %v1613_v20 = vpop.f32.mrf.mxu0  ;;  %2213 = vmatmul.bf16.gmra.mxu3 %v6510_v46 }
  0xbe   : > { %1652 = vmatmul.bf16.gmra.mxu0 %v6318_v16  ;;  %v7753_v16 = vld [vmem:[#allocation2 + $0x4c] sm:$0xf]  ;;  %2825 = vmatpush.bf16.msrb.mxu2 %v7834_v41  ;;  %v7772_v41 = vld [vmem:[#allocation2 + $0xe0] sm:$0xf0] }
  0xbf   : > { %1770 = vmatmul.bf16.gmra.mxu2 %v6326_v17  ;;  %v6499_v17 = vld [vmem:[#allocation2 + $0x54] sm:$0xf0] }
  0xc0   : > { %v1672_v27 = vpop.f32.mrf.mxu1 }
  0xc1   : > { %v1673_v28 = vadd.f32 %v1672_v27, %v1613_v20  ;;  %v6502_v20 = vor.u32 %v7753_v16, %v6499_v17  ;;  %v6506_v27 = vor.u32 %v7755_v24, %v6505_v23  ;;  %v6530_v16 = vor.u32 %v7761_v10, %v6529_v9  ;;  %v7849_v24 = vld [vmem:[%s9700_s1 + $0x210] sm:$0xff]  ;;  %v7848_v9 = vld [vmem:[%s9700_s1 + $0x208] sm:$0xff] }
  0xc2   : > { %v1731_v29 = vpop.f32.mrf.mxu2  ;;  %2944 = vmatpush.bf16.msra.mxu0 %v7849_v24  ;;  %v923_v24 = vld [vmem:[%s8290_s7 + $0x7c] sm:$0xf] }
  0xc3   : > { %1711 = vmatmul.bf16.gmra.mxu1 %v6322_v25  ;;  %v8589_v30 = vadd.f32 %v1731_v29, %v1673_v28  ;;  %v1615_v32 = vpop.f32.mrf.mxu0  ;;  %v6533_v25 = vld [vmem:[#allocation2 + $0x90] sm:$0xf] }
  0xc4   : > { %v6534_v28 = vor.u32 %v7763_v26, %v6533_v25 }
  0xc6   : > { %2945 = vmatpush.bf16.msra.mxu0 %v7848_v9 }
  0xc8   : > { %v1674_v33 = vpop.f32.mrf.mxu1 }
  0xc9   : > { %v8594_v36 = vadd.f32 %v1674_v33, %v1615_v32 }
  0xca   : > { %v8596_v37 = vpop.f32.mrf.mxu2 }
  0xcb   : > { %v1618_v39 = vpop.f32.mrf.mxu0  ;;  %2218 = vmatmul.bf16.gmra.mxu3 %v6522_v3  ;;  %v6526_v3 = vor.u32 %v7759_v63, %v6523_v0 }
  0xce   : > { %2257 = vmatmul.bf16.vlgmr.msrb.gmra.mxu0 %v6478_v38  ;;  %v7756_v38 = vld [vmem:[#allocation2 + $0x64] sm:$0xf] }
  0xd0   : > { %v1677_v47 = vpop.f32.mrf.mxu1 }
  0xd1   : > { %v1678_v48 = vadd.f32 %v1677_v47, %v1618_v39  ;;  %v6511_v39 = vld [vmem:[#allocation2 + $0x6c] sm:$0xf0]  ;;  %v6517_v47 = vld [vmem:[#allocation2 + $0x68] sm:$0xf] }
  0xd2   : > { %v1736_v51 = vpop.f32.mrf.mxu2 }
  0xd3   : > { %2316 = vmatmul.bf16.vlgmr.msrb.gmra.mxu1 %v6482_v45  ;;  %v8604_v52 = vadd.f32 %v1736_v51, %v1678_v48  ;;  %v1620_v53 = vpop.f32.mrf.mxu0  ;;  %v6514_v45 = vor.u32 %v7756_v38, %v6511_v39  ;;  %v7758_v48 = vld [vmem:[#allocation2 + $0x70] sm:$0xf0]  ;;  %v7764_v38 = vld [vmem:[#allocation2 + $0xa0] sm:$0xf0]  ;;  %v6569_v39 = vld [vmem:[#allocation2 + $0xd8] sm:$0xf] }
  0xd4   : > { %v6518_v51 = vor.u32 %v7758_v48, %v6517_v47  ;;  %v8059_v47 = vld [vmem:[%s8290_s7 + $0x78] sm:$0xff]  }
  0xd8   : > { %v1679_v54 = vpop.f32.mrf.mxu1 }
  0xd9   : > { %v8606_v57 = vadd.f32 %v1679_v54, %v1620_v53  ;;  %v6546_v53 = vor.u32 %v7766_v50, %v6545_v49  ;;  %v7832_v49 = vld [vmem:[%s9700_s1 + $0x188] sm:$0xff] }
  0xda   : > { %v8611_v59 = vpop.f32.mrf.mxu2  ;;  %v7840_v50 = vld [vmem:[%s9700_s1 + $0x1c8] sm:$0xff] }
  0xdb   : > { %v1623_v61 = vpop.f32.mrf.mxu0  ;;  %2223 = vmatmul.bf16.gmra.mxu3 %v6534_v28  ;;  %v6535_v28 = vld [vmem:[#allocation2 + $0x9c] sm:$0xf0] }
  0xde   : > { %2262 = vmatmul.bf16.gmra.mxu0 %v6490_v60 }
  0xe0   : > { %v1682_v4 = vpop.f32.mrf.mxu1 }
  0xe1   : > { %v1683_v5 = vadd.f32 %v1682_v4, %v1623_v61  ;;  %v7833_v4 = vld [vmem:[%s9700_s1 + $0x190] sm:$0xff] }
  0xe2   : > { %v1741_v7 = vpop.f32.mrf.mxu2  ;;  %2826 = vmatpush.bf16.msrb.mxu2 %v7833_v4  ;;  %v7765_v4 = vld [vmem:[#allocation2 + $0xac] sm:$0xf] }
  0xe3   : > { %2321 = vmatmul.bf16.gmra.mxu1 %v6494_v2  ;;  %v8613_v8 = vadd.f32 %v1741_v7, %v1683_v5  ;;  %v1625_v11 = vpop.f32.mrf.mxu0  ;;  %v7841_v5 = vld [vmem:[%s9700_s1 + $0x1d0] sm:$0xff] }
  0xe4   : > { %2885 = vmatpush.bf16.msrb.mxu3 %v7841_v5  ;;  %v6547_v5 = vld [vmem:[#allocation2 + $0xb4] sm:$0xf0] }
  0xe6   : > { %2827 = vmatpush.bf16.msrb.mxu2 %v7832_v49  ;;  %v924_v49 = vld [vmem:[%s8290_s7 + $0x80] sm:$0x1] }
  0xe8   : > { %v1684_v13 = vpop.f32.mrf.mxu1  ;;  %2886 = vmatpush.bf16.msrb.mxu3 %v7840_v50 }
  0xe9   : > { %v8621_v18 = vadd.f32 %v1684_v13, %v1625_v11  ;;  %v6557_v11 = vld [vmem:[#allocation2 + $0xc0] sm:$0xf]  ;;  %v7769_v13 = vld [vmem:[#allocation2 + $0xc8] sm:$0xf0] }
  0xea   : > { %v8623_v19 = vpop.f32.mrf.mxu2  ;;  %v6558_v17 = vor.u32 %v7769_v13, %v6557_v11  ;;  %v6550_v11 = vor.u32 %v7765_v4, %v6547_v5  ;;  %v6553_v13 = vld [vmem:[#allocation2 + $0xb0] sm:$0xf] }
  0xeb   : > { %v1628_v22 = vpop.f32.mrf.mxu0  ;;  %2228 = vmatmul.bf16.gmra.mxu3 %v6546_v53  ;;  %v8030_v53 = vunpack.c.h.bf16 %v8059_v47 }
  0xee   : > { %2267 = vmatmul.bf16.gmra.mxu0 %v6502_v20 }
  0xf0   : > { %v1687_v29 = vpop.f32.mrf.mxu1 }
  0xf1   : > { %v1688_v31 = vadd.f32 %v1687_v29, %v1628_v22 }
  0xf2   : > { %v1746_v32 = vpop.f32.mrf.mxu2 }
  0xf3   : > { %2326 = vmatmul.bf16.gmra.mxu1 %v6506_v27  ;;  %v8628_v33 = vadd.f32 %v1746_v32, %v1688_v31  ;;  %v1630_v34 = vpop.f32.mrf.mxu0  ;;  %v7762_v27 = vld [vmem:[#allocation2 + $0x94] sm:$0xf] }
  0xf4   : > { %v6538_v32 = vor.u32 %v7762_v27, %v6535_v28 }
  0xf8   : > { %v1689_v35 = vpop.f32.mrf.mxu1 }
  0xf9   : > { %v8630_v40 = vadd.f32 %v1689_v35, %v1630_v34  ;;  %v6541_v35 = vld [vmem:[#allocation2 + $0x98] sm:$0xf] }
  0xfa   : > { %v8638_v43 = vpop.f32.mrf.mxu2  ;;  %v6542_v42 = vor.u32 %v7764_v38, %v6541_v35  ;;  %v959_v35 = vunpack.c.l.bf16 %v923_v24 }
  0xfb   : > { %v1633_v46 = vpop.f32.mrf.mxu0  ;;  %2233 = vmatmul.bf16.gmra.mxu3 %v6558_v17  ;;  %v441_v17 = vld [vmem:[%s8290_s7 + $0x80] sm:$0x1] }
  0xfc   : > { %v995_v4 = vmax.f32 %v959_v35, 0.0 }
  0xfe   : > { %2272 = vmatmul.bf16.gmra.mxu0 %v6514_v45  ;;  %v6570_v45 = vor.u32 %v7772_v41, %v6569_v39 }
 0x100   : > { %v1692_v54 = vpop.f32.mrf.mxu1 }
 0x101   : > { %v1693_v55 = vadd.f32 %v1692_v54, %v1633_v46 }
 0x102   : > { %v1751_v58 = vpop.f32.mrf.mxu2 }
 0x103   : > { %2331 = vmatmul.bf16.gmra.mxu1 %v6518_v51  ;;  %v8643_v60 = vadd.f32 %v1751_v58, %v1693_v55  ;;  %v1635_v61 = vpop.f32.mrf.mxu0  ;;  %v8029_v51 = vunpack.c.l.bf16 %v8059_v47  ;;  %v358_v58 = vmax.f32 %v8030_v53, 0.0 }
 0x105   : > { %v357_v56 = vmax.f32 %v8029_v51, 0.0  ;;  %v382_v0 = vpack.c.bf16 %v358_v58, %v358_v58 }
 0x107   : > { %v381_v63 = vpack.c.bf16 %v357_v56, %v357_v56  ;;  %406 = vst [vmem:[#allocation2 + $0xfc] sm:$0xf] %v382_v0  ;;  %v806_v41 = vshll.u32 %v382_v0, 16 }
 0x108   : > { %v1694_v62 = vpop.f32.mrf.mxu1 }
 0x109   : > { %v8645_v1 = vadd.f32 %v1694_v62, %v1635_v61  ;;  %405 = vst [vmem:[#allocation2 + $0xf0] sm:$0xf] %v381_v63  ;;  %v808_v53 = vrot.slane %v806_v41, 5 }
 0x10a   : > { %v8647_v2 = vpop.f32.mrf.mxu2 }
 0x10b   : > { %v1638_v7 = vpop.f32.mrf.mxu0  ;;  %2238 = vmatmul.bf16.gmra.mxu3 %v6570_v45 }
 0x10e   : > { %2277 = vmatmul.bf16.gmra.mxu0 %v6526_v3  ;;  %v8673_v62 = vpop.f32.mrf.mxu3  ;;  %v7775_v27 = vld [vmem:[#allocation2 + $0xf8] sm:$0xf0] }
 0x110   : > { %v1697_v20 = vpop.f32.mrf.mxu1 }
 0x111   : > { %v1698_v21 = vadd.f32 %v1697_v20, %v1638_v7 }
 0x112   : > { %v1756_v22 = vpop.f32.mrf.mxu2 }
 0x113   : > { %2336 = vmatmul.bf16.gmra.mxu1 %v6530_v16  ;;  %v8655_v23 = vadd.f32 %v1756_v22, %v1698_v21  ;;  %v1640_v25 = vpop.f32.mrf.mxu0  ;;  %v7767_v16 = vld [vmem:[#allocation2 + $0xb8] sm:$0xf0]  ;;  %v477_v21 = vunpack.c.l.bf16 %v441_v17 }
 0x115   : > { %v513_v28 = vmax.f32 %v477_v21, 0.0  ;;  %v1031_v21 = vpack.c.bf16 %v995_v4, %v995_v4  ;;  %v7801_v4 = vld [vmem:[#allocation2 + $0x34] sm:$0xf] }
 0x116   : > { %v8683_v22 = vpop.f32.mrf.mxu3 }
 0x118   : > { %v1699_v26 = vpop.f32.mrf.mxu1 }
 0x119   : > { %v8660_v29 = vadd.f32 %v1699_v26, %v1640_v25  ;;  %v6554_v25 = vor.u32 %v7767_v16, %v6553_v13  ;;  %v6581_v26 = vld [vmem:[#allocation2 + $0xf0] sm:$0xf] }
 0x11a   : > { %v8662_v31 = vpop.f32.mrf.mxu2  ;;  %v6582_v39 = vor.u32 %v7775_v27, %v6581_v26 }
 0x11b   : > { %v1643_v34 = vpop.f32.mrf.mxu0 }
 0x11c   : > { %2243 = vmatmul.bf16.gmra.mxu3 %v6582_v39 }
 0x11e   : > { %2282 = vmatmul.bf16.gmra.mxu0 %v6538_v32  ;;  %v797_v32 = vshrl.u32 %v381_v63, 16  ;;  %v8696_v16 = vpop.f32.mrf.mxu3 }
 0x120   : > { %v1702_v46 = vpop.f32.mrf.mxu1  ;;  %v799_v47 = vrot.slane %v797_v32, 4 }
 0x121   : > { %v1703_v48 = vadd.f32 %v1702_v46, %v1643_v34  ;;  %v800_v34 = vshll.u32 %v381_v63, 16  ;;  %v549_v46 = vpack.c.bf16 %v513_v28, %v513_v28  ;;  %v7839_v63 = vld [vmem:[%s9700_s1 + $0x1c0] sm:$0xff]  ;;  %v1147_v28 = vrot.slane %v1031_v21, 5 }
 0x122   : > { %v1761_v54 = vpop.f32.mrf.mxu2  ;;  %2887 = vmatpush.bf16.msrb.mxu3 %v7839_v63 }
 0x123   : > { %2341 = vmatmul.bf16.gmra.mxu1 %v6542_v42  ;;  %v8671_v55 = vadd.f32 %v1761_v54, %v1703_v48  ;;  %v1645_v61 = vpop.f32.mrf.mxu0  ;;  %v810_v42 = vshrl.u32 %v382_v0, 16  ;;  %v922_v48 = vld [vmem:[%s8290_s7 + $0x78] sm:$0xe]  ;;  %v802_v51 = vrot.slane %v800_v34, 5  ;;  %v816_v0 = vshll.u32 %v549_v46, 16 }
 0x124   : > { %v958_v56 = vunpack.c.l.bf16 %v922_v48  ;;  %v7768_v34 = vld [vmem:[#allocation2 + $0xc4] sm:$0xf] }
 0x125   : > { %v812_v54 = vrot.slane %v810_v42, 4  ;;  %v803_v9 = vor.u32 %v802_v51, %v799_v47  ;;  %v818_v17 = vrot.slane %v816_v0, 5  ;;  %v7847_v51 = vld [vmem:[%s9700_s1 + $0x200] sm:$0xff]  ;;  %v6737_v0 = vld [vmem:[#allocation2 + $0x30] sm:$0xf] }
 0x126   : > { %v994_v13 = vmax.f32 %v958_v56, 0.0  ;;  %v6565_v56 = vld [vmem:[#allocation2 + $0xc8] sm:$0xf]  ;;  %v8711_v63 = vpop.f32.mrf.mxu3  ;;  %2946 = vmatpush.bf16.msra.mxu0 %v7847_v51 }
 0x127   : > { %v804_v24 = vrot.slane %v803_v9, 4 }
 0x128   : > { %v1704_v3 = vpop.f32.mrf.mxu1  ;;  %v1030_v26 = vpack.c.bf16 %v994_v13, %v994_v13 }
 0x129   : > { %v8675_v7 = vadd.f32 %v1704_v3, %v1645_v61  ;;  %v7831_v61 = vld [vmem:[%s9700_s1 + $0x180] sm:$0xff]  ;;  %v960_v3 = vunpack.c.l.bf16 %v924_v49  ;;  %v809_v35 = vsel %vm8339_vm5, %v804_v24, %v808_v53 }
 0x12a   : > { %v8680_v10 = vpop.f32.mrf.mxu2  ;;  %2828 = vmatpush.bf16.msrb.mxu2 %v7831_v61  ;;  %v6205_v41 = vrot.slane %v1030_v26, 9  ;;  %888 = vst [vmem:[#allocation2 + $0xf4] sm:$0xf] %v809_v35  ;;  %v7770_v61 = vld [vmem:[#allocation2 + $0xd0] sm:$0xf0] }
 0x12b   : > { %v1648_v20 = vpop.f32.mrf.mxu0 }
 0x12c   : > { %v1148_v48 = vsel %vm8315_vm4, %v6205_v41, %v1147_v28  ;;  %v7773_v41 = vld [vmem:[#allocation2 + $0xe8] sm:$0xf0] }
 0x12d   : > { %1203 = vst [vmem:[#allocation2 + $0xf8] sm:$0xf] %v1148_v48  ;;  %v7804_v48 = vld [vmem:[#allocation2 + $0x4c] sm:$0xf] }
 0x12e   : > { %2287 = vmatmul.bf16.gmra.mxu0 %v6550_v11  ;;  %v813_v11 = vor.u32 %v812_v54, %v808_v53  ;;  %v8715_v26 = vpop.f32.mrf.mxu3 }
 0x130   : > { %v1707_v38 = vpop.f32.mrf.mxu1 }
 0x131   : > { %v1708_v45 = vadd.f32 %v1707_v38, %v1648_v20  ;;  %v996_v20 = vmax.f32 %v960_v3, 0.0  ;;  %v6559_v38 = vld [vmem:[#allocation2 + $0xcc] sm:$0xf0]  ;;  %v7802_v3 = vld [vmem:[#allocation2 + $0x38] sm:$0xf0] }
 0x132   : > { %v1766_v50 = vpop.f32.mrf.mxu2  ;;  %v6738_v9 = vor.u32 %v7802_v3, %v6737_v0 }
 0x133   : > { %2346 = vmatmul.bf16.gmra.mxu1 %v6554_v25  ;;  %v8688_v58 = vadd.f32 %v1766_v50, %v1708_v45  ;;  %v1650_v5 = vpop.f32.mrf.mxu0  ;;  %v814_v25 = vrot.slane %v813_v11, 4  ;;  %v1032_v27 = vpack.c.bf16 %v996_v20, %v996_v20  ;;  %v1149_v45 = vrot.slane %v1147_v28, 4  ;;  %v6739_v11 = vld [vmem:[#allocation2 + $0x3c] sm:$0xf0]  ;;  %v7771_v28 = vld [vmem:[#allocation2 + $0xdc] sm:$0xf] }
 0x134   : > { %v6562_v50 = vor.u32 %v7768_v34, %v6559_v38  ;;  %2829 = vmatmul.bf16.vlgmr.msrb.gmra.mxu2 %v6738_v9  ;;  %v7774_v9 = vld [vmem:[#allocation2 + $0xf4] sm:$0xf] }
 0x135   : > { %v819_v39 = vsel %vm8339_vm5, %v814_v25, %v818_v17  ;;  %v1150_v46 = vrot.slane %v1032_v27, 5  ;;  %v6742_v17 = vor.u32 %v7801_v4, %v6739_v11 }
 0x136   : > { %889 = vst [vmem:[#allocation2 + $0x100] sm:$0xf] %v819_v39  ;;  %v6577_v39 = vld [vmem:[#allocation2 + $0xe0] sm:$0xf] }
 0x137   : > { %v1151_v53 = vsel %vm8315_vm4, %v1149_v45, %v1150_v46  ;;  %2888 = vmatmul.bf16.vlgmr.msrb.gmra.mxu3 %v6742_v17  ;;  %v8720_v45 = vpop.f32.mrf.mxu3  ;;  %v6749_v46 = vld [vmem:[#allocation2 + $0x48] sm:$0xf] }
 0x138   : > { %v1709_v32 = vpop.f32.mrf.mxu1  ;;  %1204 = vst [vmem:[#allocation2 + $0x104] sm:$0xf] %v1151_v53  ;;  %v6751_v53 = vld [vmem:[#allocation2 + $0x54] sm:$0xf0] }
 0x139   : > { %v1710_v42 = vadd.f32 %v1709_v32, %v1650_v5  ;;  %v6566_v5 = vor.u32 %v7770_v61, %v6565_v56  ;;  %v6571_v32 = vld [vmem:[#allocation2 + $0xe4] sm:$0xf0]  ;;  %v6754_v56 = vor.u32 %v7804_v48, %v6751_v53  ;;  %v6745_v53 = vld [vmem:[#allocation2 + $0x38] sm:$0xf] }
 0x13a   : > { %v1768_v47 = vpop.f32.mrf.mxu2  ;;  %v6574_v38 = vor.u32 %v7771_v28, %v6571_v32 }
 0x13b   : > { %v8704_v49 = vadd.f32 %v1768_v47, %v1710_v42  ;;  %v1653_v54 = vpop.f32.mrf.mxu0  ;;  %v7805_v47 = vld [vmem:[#allocation2 + $0x50] sm:$0xf0] }
 0x13c   : > { %v6750_v51 = vor.u32 %v7805_v47, %v6749_v46 }
 0x13d   : > { %v6583_v11 = vld [vmem:[#allocation2 + $0xfc] sm:$0xf0] }
 0x13e   : > { %2292 = vmatmul.bf16.gmra.mxu0 %v6562_v50  ;;  %v6578_v50 = vor.u32 %v7773_v41, %v6577_v39 }
 0x13f   : > { %v8726_v4 = vpop.f32.mrf.mxu3 }
 0x140   : > { %v1712_v13 = vpop.f32.mrf.mxu1 }
 0x141   : > { %v1713_v20 = vadd.f32 %v1712_v13, %v1653_v54  ;;  %v1729_v13 = vadd.f32 %v8581_v15, %v8579_v14 }
 0x142   : > { %v1771_v21 = vpop.f32.mrf.mxu2 }
 0x143   : > { %2351 = vmatmul.bf16.gmra.mxu1 %v6566_v5  ;;  %v8713_v24 = vadd.f32 %v1771_v21, %v1713_v20  ;;  %v1655_v25 = vpop.f32.mrf.mxu0  ;;  %v6586_v21 = vor.u32 %v7774_v9, %v6583_v11  ;;  %v6773_v11 = vld [vmem:[#allocation2 + $0x78] sm:$0xf] }
 0x144   : > { %2834 = vmatmul.bf16.gmra.mxu2 %v6750_v51 }
 0x147   : > { %2893 = vmatmul.bf16.gmra.mxu3 %v6754_v56  ;;  %v8733_v32 = vpop.f32.mrf.mxu3  ;;  %v1734_v56 = vadd.f32 %v8596_v37, %v8594_v36 }
 0x148   : > { %v1714_v27 = vpop.f32.mrf.mxu1 }
 0x149   : > { %v8717_v34 = vadd.f32 %v1714_v27, %v1655_v25  ;;  %v6589_v27 = vld [vmem:[#allocation2 + $0xf8] sm:$0xf] }
 0x14b   : > { %v2258_v35 = vpop.f32.mrf.mxu0 }
 0x14c   : > { %v2259_v42 = vadd.f32 %v2258_v35, %v8673_v62  ;;  %v7807_v35 = vld [vmem:[#allocation2 + $0x64] sm:$0xf] }
 0x14e   : > { %2297 = vmatmul.bf16.gmra.mxu0 %v6574_v38  ;;  %v7808_v38 = vld [vmem:[#allocation2 + $0x68] sm:$0xf0] }
 0x150   : > { %v2317_v54 = vpop.f32.mrf.mxu1 }
 0x151   : > { %v2318_v61 = vadd.f32 %v2317_v54, %v2259_v42  ;;  %v6763_v42 = vld [vmem:[#allocation2 + $0x6c] sm:$0xf0]  ;;  %v7803_v54 = vld [vmem:[#allocation2 + $0x40] sm:$0xf0] }
 0x152   : > { %v6766_v14 = vor.u32 %v7807_v35, %v6763_v42  ;;  %v7806_v35 = vld [vmem:[#allocation2 + $0x58] sm:$0xf0] }
 0x153   : > { %v8723_v0 = vadd.f32 %v2318_v61, %v8577_v6  ;;  %2356 = vmatmul.bf16.gmra.mxu1 %v6578_v50  ;;  %v2260_v3 = vpop.f32.mrf.mxu0  ;;  %v7776_v6 = vld [vmem:[#allocation2 + $0x100] sm:$0xf0]  ;;  %v2219_v50 = vpop.f32.mrf.mxu3 }
 0x154   : > { %v2261_v62 = vadd.f32 %v2260_v3, %v8683_v22  ;;  %v6761_v22 = vld [vmem:[#allocation2 + $0x60] sm:$0xf]  ;;  %v6590_v39 = vor.u32 %v7776_v6, %v6589_v27 }
 0x155   : > { %v6762_v41 = vor.u32 %v7808_v38, %v6761_v22  ;;  %v6757_v38 = vld [vmem:[#allocation2 + $0x50] sm:$0xf] }
 0x157   : > { %2839 = vmatmul.bf16.gmra.mxu2 %v6762_v41  ;;  %2898 = vmatmul.bf16.gmra.mxu3 %v6766_v14 }
 0x158   : > { %v2319_v5 = vpop.f32.mrf.mxu1 }
 0x159   : > { %v2320_v17 = vadd.f32 %v2319_v5, %v2261_v62  ;;  %v6746_v62 = vor.u32 %v7803_v54, %v6745_v53  ;;  %v6787_v53 = vld [vmem:[#allocation2 + $0x9c] sm:$0xf0] }
 0x15b   : > { %v8730_v20 = vadd.f32 %v2320_v17, %v1729_v13  ;;  %v2263_v25 = vpop.f32.mrf.mxu0  ;;  %v7811_v13 = vld [vmem:[#allocation2 + $0x80] sm:$0xf0]  ;;  %v7810_v17 = vld [vmem:[#allocation2 + $0x7c] sm:$0xf] }
 0x15c   : > { %v2264_v28 = vadd.f32 %v2263_v25, %v8696_v16 }
 0x15e   : > { %2302 = vmatmul.bf16.gmra.mxu0 %v6586_v21  ;;  %v6775_v21 = vld [vmem:[#allocation2 + $0x84] sm:$0xf0] }
 0x15f   : > { %v6778_v27 = vor.u32 %v7810_v17, %v6775_v21 }
 0x160   : > { %v2322_v46 = vpop.f32.mrf.mxu1 }
 0x161   : > { %v2323_v15 = vadd.f32 %v2322_v46, %v2264_v28  ;;  %v6758_v46 = vor.u32 %v7806_v35, %v6757_v38 }
 0x163   : > { %v8736_v47 = vadd.f32 %v2323_v15, %v8589_v30  ;;  %2361 = vmatmul.bf16.gmra.mxu1 %v6590_v39  ;;  %v2265_v48 = vpop.f32.mrf.mxu0  ;;  %v8744_v30 = vpop.f32.mrf.mxu3  ;;  %v1739_v39 = vadd.f32 %v8611_v59, %v8606_v57 }
 0x164   : > { %v2266_v16 = vadd.f32 %v2265_v48, %v8711_v63  ;;  %v6774_v63 = vor.u32 %v7811_v13, %v6773_v11  ;;  %v7809_v11 = vld [vmem:[#allocation2 + $0x70] sm:$0xf0]  ;;  %v1744_v13 = vadd.f32 %v8623_v19, %v8621_v18 }
 0x167   : > { %2844 = vmatmul.bf16.gmra.mxu2 %v6774_v63  ;;  %2903 = vmatmul.bf16.gmra.mxu3 %v6778_v27 }
 0x168   : > { %v2324_v51 = vpop.f32.mrf.mxu1 }
 0x169   : > { %v2325_v61 = vadd.f32 %v2324_v51, %v2266_v16  ;;  %v7814_v16 = vld [vmem:[#allocation2 + $0x98] sm:$0xf0]  ;;  %v7813_v51 = vld [vmem:[#allocation2 + $0x94] sm:$0xf] }
 0x16b   : > { %v8741_v3 = vadd.f32 %v2325_v61, %v1734_v56  ;;  %v2268_v5 = vpop.f32.mrf.mxu0  ;;  %v6790_v56 = vor.u32 %v7813_v51, %v6787_v53 }
 0x16c   : > { %v2269_v9 = vadd.f32 %v2268_v5, %v8715_v26  ;;  %v2224_v26 = vpop.f32.mrf.mxu3 }
 0x16e   : > { %2947 = vmatmul.bf16.vlgmr.msra.gmra.mxu0 %v6746_v62 }
 0x170   : > { %v2327_v25 = vpop.f32.mrf.mxu1 }
 0x171   : > { %v2328_v6 = vadd.f32 %v2327_v25, %v2269_v9  ;;  %v6769_v9 = vld [vmem:[#allocation2 + $0x68] sm:$0xf] }
 0x172   : > { %v6770_v21 = vor.u32 %v7809_v11, %v6769_v9 }
 0x173   : > { %v8747_v36 = vadd.f32 %v2328_v6, %v8604_v52  ;;  %v2270_v37 = vpop.f32.mrf.mxu0  ;;  %v6785_v52 = vld [vmem:[#allocation2 + $0x90] sm:$0xf] }
 0x174   : > { %v2271_v28 = vadd.f32 %v2270_v37, %v8720_v45  ;;  %v8755_v48 = vpop.f32.mrf.mxu3  ;;  %v6786_v45 = vor.u32 %v7814_v16, %v6785_v52  ;;  %v7817_v37 = vld [vmem:[#allocation2 + $0xb0] sm:$0xf0]  ;;  %v1749_v52 = vadd.f32 %v8638_v43, %v8630_v40 }
 0x177   : > { %2849 = vmatmul.bf16.gmra.mxu2 %v6786_v45  ;;  %2908 = vmatmul.bf16.gmra.mxu3 %v6790_v56 }
 0x178   : > { %v2329_v22 = vpop.f32.mrf.mxu1 }
 0x179   : > { %v2330_v41 = vadd.f32 %v2329_v22, %v2271_v28  ;;  %v7816_v28 = vld [vmem:[#allocation2 + $0xac] sm:$0xf]  ;;  %v6799_v22 = vld [vmem:[#allocation2 + $0xb4] sm:$0xf0] }
 0x17a   : > { %v6802_v35 = vor.u32 %v7816_v28, %v6799_v22 }
 0x17b   : > { %v8752_v42 = vadd.f32 %v2330_v41, %v1739_v39  ;;  %v2273_v14 = vpop.f32.mrf.mxu0 }
 0x17c   : > { %v2274_v15 = vadd.f32 %v2273_v14, %v8726_v4  ;;  %v2229_v4 = vpop.f32.mrf.mxu3  ;;  %v6781_v14 = vld [vmem:[#allocation2 + $0x80] sm:$0xf] }
 0x17e   : > { %2952 = vmatmul.bf16.gmra.mxu0 %v6758_v46 }
 0x180   : > { %v2332_v54 = vpop.f32.mrf.mxu1 }
 0x181   : > { %v2333_v61 = vadd.f32 %v2332_v54, %v2274_v15  ;;  %v7812_v15 = vld [vmem:[#allocation2 + $0x88] sm:$0xf0] }
 0x182   : > { %v6782_v45 = vor.u32 %v7812_v15, %v6781_v14 }
 0x183   : > { %v8758_v57 = vadd.f32 %v2333_v61, %v8613_v8  ;;  %v2275_v59 = vpop.f32.mrf.mxu0  ;;  %v6797_v8 = vld [vmem:[#allocation2 + $0xa8] sm:$0xf]  ;;  %v7820_v61 = vld [vmem:[#allocation2 + $0xc8] sm:$0xf0] }
 0x184   : > { %v2276_v62 = vadd.f32 %v2275_v59, %v8733_v32  ;;  %v8765_v6 = vpop.f32.mrf.mxu3  ;;  %v6798_v32 = vor.u32 %v7817_v37, %v6797_v8  ;;  %v7819_v59 = vld [vmem:[#allocation2 + $0xc4] sm:$0xf] }
 0x187   : > { %2854 = vmatmul.bf16.gmra.mxu2 %v6798_v32  ;;  %2913 = vmatmul.bf16.gmra.mxu3 %v6802_v35  ;;  %v7823_v35 = vld [vmem:[#allocation2 + $0xe0] sm:$0xf0] }
 0x188   : > { %v2334_v5 = vpop.f32.mrf.mxu1 }
 0x189   : > { %v2335_v17 = vadd.f32 %v2334_v5, %v2276_v62  ;;  %v6811_v62 = vld [vmem:[#allocation2 + $0xcc] sm:$0xf0] }
 0x18a   : > { %v6814_v9 = vor.u32 %v7819_v59, %v6811_v62 }
 0x18b   : > { %v8763_v63 = vadd.f32 %v2335_v17, %v1744_v13  ;;  %v2278_v25 = vpop.f32.mrf.mxu0 }
 0x18c   : > { %v2279_v27 = vadd.f32 %v2278_v25, %v2219_v50  ;;  %v8771_v50 = vpop.f32.mrf.mxu3  ;;  %v7815_v25 = vld [vmem:[#allocation2 + $0xa0] sm:$0xf0] }
 0x18e   : > { %2957 = vmatmul.bf16.gmra.mxu0 %v6770_v21  ;;  %v6793_v21 = vld [vmem:[#allocation2 + $0x98] sm:$0xf] }
 0x18f   : > { %v6794_v28 = vor.u32 %v7815_v25, %v6793_v21  ;;  %v6833_v25 = vld [vmem:[#allocation2 + $0xf0] sm:$0xf] }
 0x190   : > { %v2337_v38 = vpop.f32.mrf.mxu1 }
 0x191   : > { %v2338_v39 = vadd.f32 %v2337_v38, %v2279_v27  ;;  %v1754_v27 = vadd.f32 %v8647_v2, %v8645_v1 }
 0x193   : > { %v8768_v18 = vadd.f32 %v2338_v39, %v8628_v33  ;;  %v2280_v19 = vpop.f32.mrf.mxu0  ;;  %v6809_v33 = vld [vmem:[#allocation2 + $0xc0] sm:$0xf] }
 0x194   : > { %v2281_v41 = vadd.f32 %v2280_v19, %v8744_v30  ;;  %v8777_v56 = vpop.f32.mrf.mxu3  ;;  %v6810_v30 = vor.u32 %v7820_v61, %v6809_v33  ;;  %v6823_v19 = vld [vmem:[#allocation2 + $0xe4] sm:$0xf0]  ;;  %v1759_v61 = vadd.f32 %v8662_v31, %v8660_v29  ;;  %v7825_v29 = vld [vmem:[#allocation2 + $0xf4] sm:$0xf] }
 0x197   : > { %2859 = vmatmul.bf16.gmra.mxu2 %v6810_v30  ;;  %2918 = vmatmul.bf16.gmra.mxu3 %v6814_v9  ;;  %v444_v9 = vld [vmem:[%s8290_s7 + $0x8c] sm:$0x1] }
 0x198   : > { %v2339_v46 = vpop.f32.mrf.mxu1 }
 0x199   : > { %v2340_v16 = vadd.f32 %v2339_v46, %v2281_v41 }
 0x19b   : > { %v8775_v51 = vadd.f32 %v2340_v16, %v1749_v52  ;;  %v2283_v53 = vpop.f32.mrf.mxu0  ;;  %v442_v52 = vld [vmem:[%s8290_s7 + $0x84] sm:$0xff]  }
 0x19c   : > { %v2284_v54 = vadd.f32 %v2283_v53, %v2224_v26  ;;  %v8783_v26 = vpop.f32.mrf.mxu3  ;;  %v7818_v53 = vld [vmem:[#allocation2 + $0xb8] sm:$0xf0]  ;;  %v479_v33 = vunpack.c.h.bf16 %v442_v52 }
 0x19e   : > { %2962 = vmatmul.bf16.gmra.mxu0 %v6782_v45  ;;  %v6805_v45 = vld [vmem:[#allocation2 + $0xb0] sm:$0xf]  ;;  %v515_v62 = vmax.f32 %v479_v33, 0.0 }
 0x1a0   : > { %v2342_v5 = vpop.f32.mrf.mxu1  ;;  %v551_v31 = vpack.c.bf16 %v515_v62, %v515_v62 }
 0x1a1   : > { %v2343_v11 = vadd.f32 %v2342_v5, %v2284_v54  ;;  %v478_v54 = vunpack.c.l.bf16 %v442_v52  ;;  %v6806_v5 = vor.u32 %v7818_v53, %v6805_v45 }
 0x1a3   : > { %v8780_v40 = vadd.f32 %v2343_v11, %v8643_v60  ;;  %v2285_v43 = vpop.f32.mrf.mxu0  ;;  %v6821_v60 = vld [vmem:[#allocation2 + $0xd8] sm:$0xf]  ;;  %v514_v30 = vmax.f32 %v478_v54, 0.0 }
 0x1a4   : > { %v2286_v13 = vadd.f32 %v2285_v43, %v8755_v48  ;;  %v8789_v38 = vpop.f32.mrf.mxu3  ;;  %v7822_v48 = vld [vmem:[#allocation2 + $0xdc] sm:$0xf]  ;;  %v6822_v39 = vor.u32 %v7823_v35, %v6821_v60  ;;  %v480_v43 = vunpack.c.l.bf16 %v444_v9  ;;  %v311_v60 = vld [vmem:[%s8290_s7 + $0x84] sm:$0xff]  }
 0x1a5   : > { %v6826_v46 = vor.u32 %v7822_v48, %v6823_v19  ;;  %v335_v19 = vunpack.c.l.bf16 %v311_v60 }
 0x1a6   : > { %v516_v35 = vmax.f32 %v480_v43, 0.0 }
 0x1a7   : > { %2864 = vmatmul.bf16.gmra.mxu2 %v6822_v39  ;;  %2923 = vmatmul.bf16.gmra.mxu3 %v6826_v46 }
 0x1a8   : > { %v2344_v17 = vpop.f32.mrf.mxu1 }
 0x1a9   : > { %v2345_v8 = vadd.f32 %v2344_v17, %v2286_v13  ;;  %v550_v13 = vpack.c.bf16 %v514_v30, %v514_v30 }
 0x1ab   : > { %v8787_v37 = vadd.f32 %v2345_v8, %v1754_v27  ;;  %v2288_v32 = vpop.f32.mrf.mxu0  ;;  %v7826_v27 = vld [vmem:[#allocation2 + $0xf8] sm:$0xf0]  ;;  %v821_v48 = vshrl.u32 %v550_v13, 16  ;;  %v824_v46 = vshll.u32 %v550_v13, 16 }
 0x1ac   : > { %v2289_v22 = vadd.f32 %v2288_v32, %v2229_v4  ;;  %v8795_v15 = vpop.f32.mrf.mxu3  ;;  %v6834_v8 = vor.u32 %v7826_v27, %v6833_v25 }
 0x1ad   : > { %v826_v53 = vrot.slane %v824_v46, 5  ;;  %v927_v46 = vld [vmem:[%s8290_s7 + $0x8c] sm:$0x1] }
 0x1ae   : > { %2967 = vmatmul.bf16.gmra.mxu0 %v6794_v28  ;;  %v6835_v28 = vld [vmem:[#allocation2 + $0xfc] sm:$0xf0] }
 0x1b0   : > { %v2347_v41 = vpop.f32.mrf.mxu1 }
 0x1b1   : > { %v2348_v14 = vadd.f32 %v2347_v41, %v2289_v22  ;;  %v6838_v22 = vor.u32 %v7825_v29, %v6835_v28  ;;  %v336_v41 = vunpack.c.h.bf16 %v311_v60  ;;  %v7821_v29 = vld [vmem:[#allocation2 + $0xd0] sm:$0xf0] }
 0x1b3   : > { %v8792_v1 = vadd.f32 %v2348_v14, %v8655_v23  ;;  %v2290_v2 = vpop.f32.mrf.mxu0  ;;  %v823_v14 = vrot.slane %v821_v48, 4  ;;  %v360_v45 = vmax.f32 %v336_v41, 0.0 }
 0x1b4   : > { %v2291_v4 = vadd.f32 %v2290_v2, %v8765_v6  ;;  %v8803_v6 = vpop.f32.mrf.mxu2  ;;  %v8806_v21 = vpop.f32.mrf.mxu3  ;;  %v830_v2 = vshll.u32 %v551_v31, 16 }
 0x1b5   : > { %v827_v43 = vor.u32 %v826_v53, %v823_v14 }
 0x1b7   : > { %2869 = vmatmul.bf16.gmra.mxu2 %v6834_v8  ;;  %2928 = vmatmul.bf16.gmra.mxu3 %v6838_v22  ;;  %v828_v25 = vrot.slane %v827_v43, 4 }
 0x1b8   : > { %v2349_v16 = vpop.f32.mrf.mxu1 }
 0x1b9   : > { %v2350_v59 = vadd.f32 %v2349_v16, %v2291_v4  ;;  %v834_v4 = vshrl.u32 %v551_v31, 16  ;;  %v359_v16 = vmax.f32 %v335_v19, 0.0 }
 0x1bb   : > { %v8800_v23 = vadd.f32 %v2350_v59, %v1759_v61  ;;  %v2293_v11 = vpop.f32.mrf.mxu0  ;;  %v832_v61 = vrot.slane %v830_v2, 5  ;;  %v836_v59 = vrot.slane %v834_v4, 4  ;;  %v383_v9 = vpack.c.bf16 %v359_v16, %v359_v16 }
 0x1bc   : > { %v2294_v17 = vadd.f32 %v2293_v11, %v8771_v50  ;;  %v552_v50 = vpack.c.bf16 %v516_v35, %v516_v35  ;;  %v8812_v33 = vpop.f32.mrf.mxu2  ;;  %v384_v11 = vpack.c.bf16 %v360_v45, %v360_v45  ;;  %v926_v35 = vld [vmem:[%s8290_s7 + $0x88] sm:$0xf]  ;;  %v963_v2 = vunpack.c.l.bf16 %v927_v46 }
 0x1bd   : > { %v837_v13 = vor.u32 %v836_v59, %v832_v61  ;;  %407 = vst [vmem:[#allocation2 + $0x108] sm:$0xf] %v383_v9  ;;  %v833_v28 = vsel %vm8339_vm5, %v828_v25, %v832_v61  ;;  %v962_v19 = vunpack.c.l.bf16 %v926_v35  ;;  %v7824_v35 = vld [vmem:[#allocation2 + $0xe8] sm:$0xf0] }
 0x1be   : > { %2972 = vmatmul.bf16.gmra.mxu0 %v6806_v5  ;;  %v840_v30 = vshll.u32 %v552_v50, 16  ;;  %v8815_v5 = vpop.f32.mrf.mxu3  ;;  %408 = vst [vmem:[#allocation2 + $0x114] sm:$0xf] %v384_v11  ;;  %v999_v61 = vmax.f32 %v963_v2, 0.0 }
 0x1bf   : > { %v838_v31 = vrot.slane %v837_v13, 4  ;;  %890 = vst [vmem:[#allocation2 + $0x10c] sm:$0xf] %v833_v28  ;;  %v998_v16 = vmax.f32 %v962_v19, 0.0 }
 0x1c0   : > { %v2352_v32 = vpop.f32.mrf.mxu1  ;;  %v1035_v11 = vpack.c.bf16 %v999_v61, %v999_v61  ;;  %v1774_v61 = vadd.f32 %v8803_v6, %v8717_v34 }
 0x1c1   : > { %v2353_v39 = vadd.f32 %v2352_v32, %v2294_v17  ;;  %v842_v17 = vrot.slane %v840_v30, 5 }
 0x1c3   : > { %v8810_v52 = vadd.f32 %v2353_v39, %v8671_v55  ;;  %v2295_v54 = vpop.f32.mrf.mxu0  ;;  %v6817_v55 = vld [vmem:[#allocation2 + $0xc8] sm:$0xf]  ;;  %v843_v32 = vsel %vm8339_vm5, %v838_v31, %v842_v17 }
 0x1c4   : > { %v2296_v62 = vadd.f32 %v2295_v54, %v8777_v56  ;;  %v1764_v56 = vadd.f32 %v8680_v10, %v8675_v7  ;;  %v6818_v60 = vor.u32 %v7821_v29, %v6817_v55  ;;  %891 = vst [vmem:[#allocation2 + $0x118] sm:$0xf] %v843_v32  ;;  %v8826_v39 = vpop.f32.mrf.mxu2  ;;  %v925_v10 = vld [vmem:[%s8290_s7 + $0x84] sm:$0xe]  ;;  %v6845_v50 = vld [vmem:[#allocation2 + $0x108] sm:$0xf] }
 0x1c5   : > { %v961_v14 = vunpack.c.l.bf16 %v925_v10  ;;  %v7829_v4 = vld [vmem:[#allocation2 + $0x110] sm:$0xf0] }
 0x1c6   : > { %v8829_v7 = vpop.f32.mrf.mxu3  ;;  %v6846_v53 = vor.u32 %v7829_v4, %v6845_v50  ;;  %v7828_v30 = vld [vmem:[#allocation2 + $0x10c] sm:$0xf] }
 0x1c7   : > { %v997_v54 = vmax.f32 %v961_v14, 0.0 }
 0x1c8   : > { %v2354_v27 = vpop.f32.mrf.mxu1  ;;  %2874 = vmatmul.bf16.gmra.mxu2 %v6846_v53 }
 0x1c9   : > { %v2355_v8 = vadd.f32 %v2354_v27, %v2296_v62  ;;  %v1034_v62 = vpack.c.bf16 %v998_v16, %v998_v16  ;;  %v1157_v27 = vrot.slane %v1035_v11, 5 }
 0x1cb   : > { %v8823_v22 = vadd.f32 %v2355_v8, %v1764_v56  ;;  %v2298_v48 = vpop.f32.mrf.mxu0  ;;  %v6847_v9 = vld [vmem:[#allocation2 + $0x114] sm:$0xf0]  ;;  %v1154_v17 = vrot.slane %v1034_v62, 5 }
 0x1cc   : > { %v2299_v41 = vadd.f32 %v2298_v48, %v8783_v26  ;;  %v1033_v26 = vpack.c.bf16 %v997_v54, %v997_v54  ;;  %v6850_v13 = vor.u32 %v7828_v30, %v6847_v9  ;;  %v2835_v31 = vpop.f32.mrf.mxu2  ;;  %v7827_v54 = vld [vmem:[#allocation2 + $0x100] sm:$0xf0] }
 0x1cd   : > { %v1156_v8 = vrot.slane %v1154_v17, 4 }
 0x1ce   : > { %2977 = vmatmul.bf16.gmra.mxu0 %v6818_v60  ;;  %v6206_v25 = vrot.slane %v1033_v26, 9  ;;  %2933 = vmatmul.bf16.gmra.mxu3 %v6850_v13  ;;  %v2894_v56 = vpop.f32.mrf.mxu3  ;;  %v6829_v60 = vld [vmem:[#allocation2 + $0xe0] sm:$0xf] }
 0x1cf   : > { %v1158_v32 = vsel %vm8315_vm4, %v1156_v8, %v1157_v27 }
 0x1d0   : > { %v2357_v45 = vpop.f32.mrf.mxu1  ;;  %v1155_v28 = vsel %vm8315_vm4, %v6206_v25, %v1154_v17  ;;  %1206 = vst [vmem:[#allocation2 + $0x11c] sm:$0xf] %v1158_v32 }
 0x1d1   : > { %v2358_v59 = vadd.f32 %v2357_v45, %v2299_v41  ;;  %1205 = vst [vmem:[#allocation2 + $0x110] sm:$0xf] %v1155_v28 }
 0x1d3   : > { %v8834_v43 = vadd.f32 %v2358_v59, %v8688_v58  ;;  %v2300_v55 = vpop.f32.mrf.mxu0 }
 0x1d4   : > { %v2301_v29 = vadd.f32 %v2300_v55, %v8789_v38  ;;  %v6830_v38 = vor.u32 %v7824_v35, %v6829_v60  ;;  %v8845_v46 = vpop.f32.mrf.mxu2  ;;  %v2895_v60 = vadd.f32 %v2894_v56, %v2835_v31  ;;  %v3348_v35 = vld [vmem:[#allocation3] sm:$0xf] }
 0x1d6   : > { %v8847_v50 = vpop.f32.mrf.mxu3 }
 0x1d7   : > { %v7830_v28 = vld [vmem:[#allocation2 + $0x118] sm:$0xf0] }
 0x1d8   : > { %v2359_v58 = vpop.f32.mrf.mxu1 }
 0x1d9   : > { %v2360_v48 = vadd.f32 %v2359_v58, %v2301_v29 }
 0x1db   : > { %v8842_v19 = vadd.f32 %v2360_v48, %v8704_v49  ;;  %v2303_v41 = vpop.f32.mrf.mxu0  ;;  %v6841_v49 = vld [vmem:[#allocation2 + $0xf8] sm:$0xf] }
 0x1dc   : > { %v2304_v10 = vadd.f32 %v2303_v41, %v8795_v15  ;;  %v2890_v15 = vadd.f32 %v8815_v5, %v8812_v33  ;;  %v8857_v30 = vpop.f32.mrf.mxu2  ;;  %v2892_v33 = vadd.f32 %v8829_v7, %v8826_v39 }
 0x1de   : > { %2982 = vmatmul.bf16.gmra.mxu0 %v6830_v38  ;;  %v8859_v62 = vpop.f32.mrf.mxu3 }
 0x1e0   : > { %v2362_v14 = vpop.f32.mrf.mxu1 }
 0x1e1   : > { %v2363_v2 = vadd.f32 %v2362_v14, %v2304_v10 }
 0x1e3   : > { %v8850_v4 = vadd.f32 %v2363_v2, %v8713_v24  ;;  %v2305_v16 = vpop.f32.mrf.mxu0  ;;  %v6842_v24 = vor.u32 %v7827_v54, %v6841_v49 }
 0x1e4   : > { %v2306_v45 = vadd.f32 %v2305_v16, %v8806_v21  ;;  %v8866_v21 = vld [vmem:[%s9701_s2] ss:$0 sm:$0xff]  ;;  %v8872_v13 = vpop.f32.mrf.mxu2 }
 0x1e6   : > { %v8874_v17 = vpop.f32.mrf.mxu3 }
 0x1e8   : > { %v2364_v53 = vpop.f32.mrf.mxu1 }
 0x1e9   : > { %v2365_v59 = vadd.f32 %v2364_v53, %v2306_v45 }
 0x1eb   : > { %v8861_v9 = vadd.f32 %v2365_v59, %v1774_v61  ;;  %v2948_v26 = vpop.f32.mrf.mxu0  ;;  %v3354_v59 = vld [vmem:[#allocation3 + $0x8] sm:$0x1] }
 0x1ec   : > { %v2949_v11 = vadd.f32 %v2948_v26, %v2890_v15  ;;  %v8885_v16 = vpop.f32.mrf.mxu2 }
 0x1ee   : > { %v3018_v34 = vadd.f32 %v2949_v11, %v8723_v0  ;;  %2987 = vmatmul.bf16.gmra.mxu0 %v6842_v24  ;;  %v6853_v0 = vld [vmem:[#allocation2 + $0x110] sm:$0xf]  ;;  %v8887_v31 = vpop.f32.mrf.mxu3  ;;  %v2897_v24 = vadd.f32 %v8847_v50, %v8845_v46 }
 0x1ef   : > { %v6854_v41 = vor.u32 %v7830_v28, %v6853_v0 }
 0x1f0   : > { %v3082_v6 = vadd.f32 %v8866_v21, %v3018_v34 }
 0x1f2   : > { %v3102_v5 = vmax.f32 %v3082_v6, 0.0 }
 0x1f3   : > { %v2950_v55 = vpop.f32.mrf.mxu0 }
 0x1f4   : > { %v3122_v25 = vpack.c.bf16 %v3102_v5, %v3102_v5  ;;  %v2951_v27 = vadd.f32 %v2950_v55, %v2892_v33 }
 0x1f6   : > { %v3146_v29 = vshrl.u32 %v3122_v25, 16  ;;  %v3019_v8 = vadd.f32 %v2951_v27, %v8730_v20  ;;  %v3149_v58 = vshll.u32 %v3122_v25, 16  ;;  %v8911_v0 = vpop.f32.mrf.mxu3 }
 0x1f8   : > { %v3148_v32 = vrot.slane %v3146_v29, 7  ;;  %v3083_v39 = vadd.f32 %v8866_v21, %v3019_v8  ;;  %v8909_v8 = vpop.f32.mrf.mxu2 }
 0x1fa   : > { %v3151_v48 = vor.u32 %v3149_v58, %v3148_v32  ;;  %v3103_v38 = vmax.f32 %v3083_v39, 0.0  ;;  %v3152_v26 = vrot.slane %v3148_v32, 4  ;;  %v2900_v58 = vadd.f32 %v8859_v62, %v8857_v30  ;;  %v3357_v39 = vld [vmem:[#allocation3 + $0xc] sm:$0xf] }
 0x1fb   : > { %v2953_v10 = vpop.f32.mrf.mxu0 }
 0x1fc   : > { %v3349_v20 = vsel %vm8879_vm8, %v3151_v48, %v3348_v35  ;;  %v3123_v14 = vpack.c.bf16 %v3103_v38, %v3103_v38  ;;  %v2954_v2 = vadd.f32 %v2953_v10, %v2895_v60 }
 0x1fd   : > { %3350 = vst [vmem:[#allocation3] sm:$0xf] %v3349_v20 }
 0x1fe   : > { %v3154_v56 = vshrl.u32 %v3123_v14, 16  ;;  %v3020_v45 = vadd.f32 %v2954_v2, %v8736_v47  ;;  %2992 = vmatmul.bf16.gmra.mxu0 %v6854_v41  ;;  %v3157_v54 = vshll.u32 %v3123_v14, 16 }
 0x200   : > { %v3156_v49 = vrot.slane %v3154_v56, 7  ;;  %v3084_v61 = vadd.f32 %v8866_v21, %v3020_v45 }
 0x202   : > { %v3159_v47 = vor.u32 %v3157_v54, %v3156_v49  ;;  %v3161_v11 = vrot.slane %v3156_v49, 4  ;;  %v3104_v34 = vmax.f32 %v3084_v61, 0.0  ;;  %v8928_v54 = vpop.f32.mrf.mxu2  ;;  %v8930_v61 = vpop.f32.mrf.mxu3 }
 0x203   : > { %v2955_v6 = vpop.f32.mrf.mxu0 }
 0x204   : > { %v3420_v33 = vld [vmem:[#allocation3] sm:$0x1]  ;;  %v3160_v5 = vsel %vm8896_vm13, %v3152_v26, %v3159_v47  ;;  %v3355_v55 = vsel %vm8891_vm12, %v3161_v11, %v3354_v59  ;;  %v3124_v25 = vpack.c.bf16 %v3104_v34, %v3104_v34  ;;  %v2956_v27 = vadd.f32 %v2955_v6, %v2897_v24  ;;  %v3361_v59 = vld [vmem:[#allocation3 + $0x14] sm:$0x1] }
 0x205   : > { %v3421_v29 = vsel %vm8891_vm12, 0, %v3420_v33  ;;  %3351 = vst [vmem:[#allocation3 + $0x4] sm:$0xf] %v3160_v5  ;;  %v2902_v24 = vadd.f32 %v8874_v17, %v8872_v13 }
 0x206   : > { %3422 = vst [vmem:[#allocation3] sm:$0x1] %v3421_v29  ;;  %v3163_v46 = vshrl.u32 %v3124_v25, 16  ;;  %v3021_v50 = vadd.f32 %v2956_v27, %v8741_v3  ;;  %v3166_v32 = vshll.u32 %v3124_v25, 16 }
 0x207   : > { %3356 = vst [vmem:[#allocation3 + $0x8] sm:$0x1] %v3355_v55 }
 0x208   : > { %v3165_v28 = vrot.slane %v3163_v46, 7  ;;  %v3085_v60 = vadd.f32 %v8866_v21, %v3021_v50  ;;  %v2905_v50 = vadd.f32 %v8887_v31, %v8885_v16 }
 0x20a   : > { %v3168_v35 = vor.u32 %v3166_v32, %v3165_v28  ;;  %v3105_v48 = vmax.f32 %v3085_v60, 0.0  ;;  %v3169_v26 = vrot.slane %v3165_v28, 4  ;;  %v3364_v32 = vld [vmem:[#allocation3 + $0x18] sm:$0xf] }
 0x20b   : > { %v2958_v38 = vpop.f32.mrf.mxu0 }
 0x20c   : > { %v3358_v41 = vsel %vm8879_vm8, %v3168_v35, %v3357_v39  ;;  %v3125_v10 = vpack.c.bf16 %v3105_v48, %v3105_v48  ;;  %v2959_v20 = vadd.f32 %v2958_v38, %v2900_v58  ;;  %v2852_v39 = vpop.f32.mrf.mxu2  ;;  %v2911_v35 = vpop.f32.mrf.mxu3 }
 0x20d   : > { %3359 = vst [vmem:[#allocation3 + $0xc] sm:$0xf] %v3358_v41 }
 0x20e   : > { %v3451_v14 = vld [vmem:[#allocation3 + $0x8] sm:$0x1]  ;;  %v3171_v30 = vshrl.u32 %v3125_v10, 16  ;;  %v3022_v62 = vadd.f32 %v2959_v20, %v8747_v36  ;;  %v3174_v45 = vshll.u32 %v3125_v10, 16 }
 0x20f   : > { %v3452_v2 = vsel %vm8918_vm14, 0, %v3451_v14 }
 0x210   : > { %3453 = vst [vmem:[#allocation3 + $0x8] sm:$0x1] %v3452_v2  ;;  %v3173_v56 = vrot.slane %v3171_v30, 7  ;;  %v3086_v49 = vadd.f32 %v8866_v21, %v3022_v62  ;;  %v3368_v2 = vld [vmem:[#allocation3 + $0x20] sm:$0x1] }
 0x212   : > { %v3176_v47 = vor.u32 %v3174_v45, %v3173_v56  ;;  %v3178_v11 = vrot.slane %v3173_v56, 4  ;;  %v3106_v36 = vmax.f32 %v3086_v49, 0.0  ;;  %v2907_v56 = vadd.f32 %v8911_v0, %v8909_v8 }
 0x213   : > { %v2960_v34 = vpop.f32.mrf.mxu0 }
 0x214   : > { %v3423_v6 = vld [vmem:[#allocation3 + $0xc] sm:$0x1]  ;;  %v3177_v33 = vsel %vm8896_vm13, %v3169_v26, %v3176_v47  ;;  %v3362_v5 = vsel %vm8891_vm12, %v3178_v11, %v3361_v59  ;;  %v3126_v55 = vpack.c.bf16 %v3106_v36, %v3106_v36  ;;  %v2961_v25 = vadd.f32 %v2960_v34, %v2902_v24 }
 0x215   : > { %v3424_v27 = vsel %vm8891_vm12, 0, %v3423_v6  ;;  %3360 = vst [vmem:[#allocation3 + $0x10] sm:$0xf] %v3177_v33  ;;  %v2855_v6 = vpop.f32.mrf.mxu2  ;;  %v2914_v33 = vpop.f32.mrf.mxu3 }
 0x216   : > { %3425 = vst [vmem:[#allocation3 + $0xc] sm:$0x1] %v3424_v27  ;;  %v3180_v13 = vshrl.u32 %v3126_v55, 16  ;;  %v3023_v17 = vadd.f32 %v2961_v25, %v8752_v42  ;;  %v3183_v46 = vshll.u32 %v3126_v55, 16  ;;  %v2910_v27 = vadd.f32 %v8930_v61, %v8928_v54 }
 0x217   : > { %3363 = vst [vmem:[#allocation3 + $0x14] sm:$0x1] %v3362_v5 }
 0x218   : > { %v3182_v29 = vrot.slane %v3180_v13, 7  ;;  %v3087_v28 = vadd.f32 %v8866_v21, %v3023_v17  ;;  %v3371_v17 = vld [vmem:[#allocation3 + $0x24] sm:$0xf] }
 0x21a   : > { %v3185_v58 = vor.u32 %v3183_v46, %v3182_v29  ;;  %v3107_v60 = vmax.f32 %v3087_v28, 0.0  ;;  %v3186_v45 = vrot.slane %v3182_v29, 4 }
 0x21b   : > { %v2963_v48 = vpop.f32.mrf.mxu0 }
 0x21c   : > { %v3365_v38 = vsel %vm8879_vm8, %v3185_v58, %v3364_v32  ;;  %v3127_v41 = vpack.c.bf16 %v3107_v60, %v3107_v60  ;;  %v2964_v10 = vadd.f32 %v2963_v48, %v2905_v50 }
 0x21d   : > { %3366 = vst [vmem:[#allocation3 + $0x18] sm:$0xf] %v3365_v38  ;;  %v2857_v38 = vpop.f32.mrf.mxu2 }
 0x21e   : > { %v3454_v42 = vld [vmem:[#allocation3 + $0x14] sm:$0x1]  ;;  %v3188_v20 = vshrl.u32 %v3127_v41, 16  ;;  %v3024_v14 = vadd.f32 %v2964_v10, %v8758_v57  ;;  %v3191_v30 = vshll.u32 %v3127_v41, 16  ;;  %v2916_v41 = vpop.f32.mrf.mxu3 }
 0x21f   : > { %v3455_v16 = vsel %vm8918_vm14, 0, %v3454_v42 }
 0x220   : > { %3456 = vst [vmem:[#allocation3 + $0x14] sm:$0x1] %v3455_v16  ;;  %v3190_v31 = vrot.slane %v3188_v20, 7  ;;  %v3088_v62 = vadd.f32 %v8866_v21, %v3024_v14  ;;  %v3375_v20 = vld [vmem:[#allocation3 + $0x2c] sm:$0x1]  ;;  %v2912_v14 = vadd.f32 %v2911_v35, %v2852_v39 }
 0x222   : > { %v3193_v49 = vor.u32 %v3191_v30, %v3190_v31  ;;  %v3195_v59 = vrot.slane %v3190_v31, 4  ;;  %v3108_v24 = vmax.f32 %v3088_v62, 0.0 }
 0x223   : > { %v2965_v26 = vpop.f32.mrf.mxu0 }
 0x224   : > { %v3426_v47 = vld [vmem:[#allocation3 + $0x18] sm:$0x1]  ;;  %v3194_v57 = vsel %vm8896_vm13, %v3186_v45, %v3193_v49  ;;  %v3369_v11 = vsel %vm8891_vm12, %v3195_v59, %v3368_v2  ;;  %v3128_v36 = vpack.c.bf16 %v3108_v24, %v3108_v24  ;;  %v2966_v34 = vadd.f32 %v2965_v26, %v2907_v56 }
 0x225   : > { %v3427_v5 = vsel %vm8891_vm12, 0, %v3426_v47  ;;  %3367 = vst [vmem:[#allocation3 + $0x1c] sm:$0xf] %v3194_v57  ;;  %v2915_v57 = vadd.f32 %v2914_v33, %v2855_v6 }
 0x226   : > { %3428 = vst [vmem:[#allocation3 + $0x18] sm:$0x1] %v3427_v5  ;;  %v3197_v8 = vshrl.u32 %v3128_v36, 16  ;;  %v3025_v0 = vadd.f32 %v2966_v34, %v8763_v63  ;;  %v3200_v25 = vshll.u32 %v3128_v36, 16  ;;  %v2860_v36 = vpop.f32.mrf.mxu2  ;;  %v2919_v34 = vpop.f32.mrf.mxu3  ;;  %v3378_v5 = vld [vmem:[#allocation3 + $0x30] sm:$0xf] }
 0x227   : > { %3370 = vst [vmem:[#allocation3 + $0x20] sm:$0x1] %v3369_v11 }
 0x228   : > { %v3199_v55 = vrot.slane %v3197_v8, 7  ;;  %v3089_v13 = vadd.f32 %v8866_v21, %v3025_v0 }
 0x22a   : > { %v3202_v29 = vor.u32 %v3200_v25, %v3199_v55  ;;  %v3109_v46 = vmax.f32 %v3089_v13, 0.0  ;;  %v3203_v16 = vrot.slane %v3199_v55, 4 }
 0x22b   : > { %v2968_v50 = vpop.f32.mrf.mxu0 }
 0x22c   : > { %v3372_v28 = vsel %vm8879_vm8, %v3202_v29, %v3371_v17  ;;  %v3129_v32 = vpack.c.bf16 %v3109_v46, %v3109_v46  ;;  %v2969_v58 = vadd.f32 %v2968_v50, %v2910_v27 }
 0x22d   : > { %3373 = vst [vmem:[#allocation3 + $0x24] sm:$0xf] %v3372_v28  ;;  %v3382_v28 = vld [vmem:[#allocation3 + $0x38] sm:$0x1] }
 0x22e   : > { %v3457_v60 = vld [vmem:[#allocation3 + $0x20] sm:$0x1]  ;;  %v3205_v63 = vshrl.u32 %v3129_v32, 16  ;;  %v3026_v48 = vadd.f32 %v2969_v58, %v8768_v18  ;;  %v3208_v10 = vshll.u32 %v3129_v32, 16  ;;  %v2917_v32 = vadd.f32 %v2916_v41, %v2857_v38 }
 0x22f   : > { %v3458_v54 = vsel %vm8918_vm14, 0, %v3457_v60 }
 0x230   : > { %3459 = vst [vmem:[#allocation3 + $0x20] sm:$0x1] %v3458_v54  ;;  %v3207_v61 = vrot.slane %v3205_v63, 7  ;;  %v3090_v42 = vadd.f32 %v8866_v21, %v3026_v48  ;;  %v2862_v54 = vpop.f32.mrf.mxu2 }
 0x232   : > { %v3210_v31 = vor.u32 %v3208_v10, %v3207_v61  ;;  %v3212_v30 = vrot.slane %v3207_v61, 4  ;;  %v3110_v62 = vmax.f32 %v3090_v42, 0.0  ;;  %v2921_v61 = vpop.f32.mrf.mxu3 }
 0x233   : > { %v2970_v2 = vpop.f32.mrf.mxu0 }
 0x234   : > { %v3429_v56 = vld [vmem:[#allocation3 + $0x24] sm:$0x1]  ;;  %v3211_v18 = vsel %vm8896_vm13, %v3203_v16, %v3210_v31  ;;  %v3376_v45 = vsel %vm8891_vm12, %v3212_v30, %v3375_v20  ;;  %v3130_v49 = vpack.c.bf16 %v3110_v62, %v3110_v62  ;;  %v2971_v59 = vadd.f32 %v2970_v2, %v2912_v14 }
 0x235   : > { %v3430_v24 = vsel %vm8891_vm12, 0, %v3429_v56  ;;  %3374 = vst [vmem:[#allocation3 + $0x28] sm:$0xf] %v3211_v18  ;;  %v2920_v2 = vadd.f32 %v2919_v34, %v2860_v36  ;;  %v3385_v18 = vld [vmem:[#allocation3 + $0x3c] sm:$0xf] }
 0x236   : > { %3431 = vst [vmem:[#allocation3 + $0x24] sm:$0x1] %v3430_v24  ;;  %v3214_v39 = vshrl.u32 %v3130_v49, 16  ;;  %v3027_v35 = vadd.f32 %v2971_v59, %v8775_v51  ;;  %v3217_v47 = vshll.u32 %v3130_v49, 16 }
 0x237   : > { %3377 = vst [vmem:[#allocation3 + $0x2c] sm:$0x1] %v3376_v45 }
 0x238   : > { %v3216_v26 = vrot.slane %v3214_v39, 7  ;;  %v3091_v11 = vadd.f32 %v8866_v21, %v3027_v35 }
 0x23a   : > { %v3219_v8 = vor.u32 %v3217_v47, %v3216_v26  ;;  %v3111_v0 = vmax.f32 %v3091_v11, 0.0  ;;  %v3220_v58 = vrot.slane %v3216_v26, 4  ;;  %v2865_v26 = vpop.f32.mrf.mxu2  ;;  %v2924_v47 = vpop.f32.mrf.mxu3 }
 0x23b   : > { %v2973_v55 = vpop.f32.mrf.mxu0 }
 0x23c   : > { %v3379_v25 = vsel %vm8879_vm8, %v3219_v8, %v3378_v5  ;;  %v3131_v27 = vpack.c.bf16 %v3111_v0, %v3111_v0  ;;  %v2974_v13 = vadd.f32 %v2973_v55, %v2915_v57  ;;  %v3389_v0 = vld [vmem:[#allocation3 + $0x44] sm:$0x1]  ;;  %v2922_v55 = vadd.f32 %v2921_v61, %v2862_v54 }
 0x23d   : > { %3380 = vst [vmem:[#allocation3 + $0x30] sm:$0xf] %v3379_v25  ;;  %v2925_v54 = vadd.f32 %v2924_v47, %v2865_v26 }
 0x23e   : > { %v3460_v17 = vld [vmem:[#allocation3 + $0x2c] sm:$0x1]  ;;  %v3222_v51 = vshrl.u32 %v3131_v27, 16  ;;  %v3028_v29 = vadd.f32 %v2974_v13, %v8780_v40  ;;  %v3225_v46 = vshll.u32 %v3131_v27, 16 }
 0x23f   : > { %v3461_v6 = vsel %vm8918_vm14, 0, %v3460_v17 }
 0x240   : > { %3462 = vst [vmem:[#allocation3 + $0x2c] sm:$0x1] %v3461_v6  ;;  %v3224_v33 = vrot.slane %v3222_v51, 7  ;;  %v3092_v50 = vadd.f32 %v8866_v21, %v3028_v29 }
 0x242   : > { %v3227_v60 = vor.u32 %v3225_v46, %v3224_v33  ;;  %v3229_v63 = vrot.slane %v3224_v33, 4  ;;  %v3112_v48 = vmax.f32 %v3092_v50, 0.0 }
 0x243   : > { %v2975_v10 = vpop.f32.mrf.mxu0 }
 0x244   : > { %v3432_v42 = vld [vmem:[#allocation3 + $0x30] sm:$0x1]  ;;  %v3228_v40 = vsel %vm8896_vm13, %v3220_v58, %v3227_v60  ;;  %v3383_v20 = vsel %vm8891_vm12, %v3229_v63, %v3382_v28  ;;  %v3132_v14 = vpack.c.bf16 %v3112_v48, %v3112_v48  ;;  %v2976_v16 = vadd.f32 %v2975_v10, %v2917_v32  ;;  %v2867_v58 = vpop.f32.mrf.mxu2  ;;  %v2926_v60 = vpop.f32.mrf.mxu3  ;;  %v3392_v10 = vld [vmem:[#allocation3 + $0x48] sm:$0xf] }
 0x245   : > { %v3433_v31 = vsel %vm8891_vm12, 0, %v3432_v42  ;;  %3381 = vst [vmem:[#allocation3 + $0x34] sm:$0xf] %v3228_v40 }
 0x246   : > { %3434 = vst [vmem:[#allocation3 + $0x30] sm:$0x1] %v3433_v31  ;;  %v3231_v38 = vshrl.u32 %v3132_v14, 16  ;;  %v3029_v41 = vadd.f32 %v2976_v16, %v8787_v37  ;;  %v3234_v62 = vshll.u32 %v3132_v14, 16 }
 0x247   : > { %3384 = vst [vmem:[#allocation3 + $0x38] sm:$0x1] %v3383_v20 }
 0x248   : > { %v3233_v30 = vrot.slane %v3231_v38, 7  ;;  %v3093_v56 = vadd.f32 %v8866_v21, %v3029_v41 }
 0x24a   : > { %v3236_v45 = vor.u32 %v3234_v62, %v3233_v30  ;;  %v3113_v49 = vmax.f32 %v3093_v56, 0.0  ;;  %v3237_v25 = vrot.slane %v3233_v30, 4 }
 0x24b   : > { %v2978_v59 = vpop.f32.mrf.mxu0 }
 0x24c   : > { %v3386_v24 = vsel %vm8879_vm8, %v3236_v45, %v3385_v18  ;;  %v3133_v39 = vpack.c.bf16 %v3113_v49, %v3113_v49  ;;  %v2979_v35 = vadd.f32 %v2978_v59, %v2920_v2  ;;  %v2870_v18 = vpop.f32.mrf.mxu2  ;;  %v2929_v45 = vpop.f32.mrf.mxu3  ;;  %v3396_v49 = vld [vmem:[#allocation3 + $0x50] sm:$0x1]  ;;  %v2927_v59 = vadd.f32 %v2926_v60, %v2867_v58 }
 0x24d   : > { %3387 = vst [vmem:[#allocation3 + $0x3c] sm:$0xf] %v3386_v24 }
 0x24e   : > { %v3463_v57 = vld [vmem:[#allocation3 + $0x38] sm:$0x1]  ;;  %v3239_v37 = vshrl.u32 %v3133_v39, 16  ;;  %v3030_v11 = vadd.f32 %v2979_v35, %v8792_v1  ;;  %v3242_v5 = vshll.u32 %v3133_v39, 16 }
 0x24f   : > { %v3464_v36 = vsel %vm8918_vm14, 0, %v3463_v57 }
 0x250   : > { %3465 = vst [vmem:[#allocation3 + $0x38] sm:$0x1] %v3464_v36  ;;  %v3241_v34 = vrot.slane %v3239_v37, 7  ;;  %v3094_v8 = vadd.f32 %v8866_v21, %v3030_v11 }
 0x252   : > { %v3244_v27 = vor.u32 %v3242_v5, %v3241_v34  ;;  %v3246_v13 = vrot.slane %v3241_v34, 4  ;;  %v3114_v17 = vmax.f32 %v3094_v8, 0.0 }
 0x253   : > { %v2980_v51 = vpop.f32.mrf.mxu0 }
 0x254   : > { %v3435_v29 = vld [vmem:[#allocation3 + $0x3c] sm:$0x1]  ;;  %v3245_v6 = vsel %vm8896_vm13, %v3237_v25, %v3244_v27  ;;  %v3390_v1 = vsel %vm8891_vm12, %v3246_v13, %v3389_v0  ;;  %v3134_v33 = vpack.c.bf16 %v3114_v17, %v3114_v17  ;;  %v2981_v46 = vadd.f32 %v2980_v51, %v2922_v55  ;;  %v3399_v13 = vld [vmem:[#allocation3 + $0x54] sm:$0xf] }
 0x255   : > { %v3436_v50 = vsel %vm8891_vm12, 0, %v3435_v29  ;;  %3388 = vst [vmem:[#allocation3 + $0x40] sm:$0xf] %v3245_v6  ;;  %v2930_v25 = vadd.f32 %v2929_v45, %v2870_v18  ;;  %v2872_v29 = vpop.f32.mrf.mxu2  ;;  %v2931_v6 = vpop.f32.mrf.mxu3 }
 0x256   : > { %3437 = vst [vmem:[#allocation3 + $0x3c] sm:$0x1] %v3436_v50  ;;  %v3248_v28 = vshrl.u32 %v3134_v33, 16  ;;  %v3031_v32 = vadd.f32 %v2981_v46, %v8800_v23  ;;  %v3251_v48 = vshll.u32 %v3134_v33, 16 }
 0x257   : > { %3391 = vst [vmem:[#allocation3 + $0x44] sm:$0x1] %v3390_v1 }
 0x258   : > { %v3250_v63 = vrot.slane %v3248_v28, 7  ;;  %v3095_v61 = vadd.f32 %v8866_v21, %v3031_v32 }
 0x25a   : > { %v3253_v42 = vor.u32 %v3251_v48, %v3250_v63  ;;  %v3115_v40 = vmax.f32 %v3095_v61, 0.0  ;;  %v3254_v24 = vrot.slane %v3250_v63, 4  ;;  %v2932_v61 = vadd.f32 %v2931_v6, %v2872_v29 }
 0x25b   : > { %v2983_v20 = vpop.f32.mrf.mxu0 }
 0x25c   : > { %v3393_v14 = vsel %vm8879_vm8, %v3253_v42, %v3392_v10  ;;  %v3135_v16 = vpack.c.bf16 %v3115_v40, %v3115_v40  ;;  %v2984_v31 = vadd.f32 %v2983_v20, %v2925_v54  ;;  %v3403_v54 = vld [vmem:[#allocation3 + $0x5c] sm:$0x1] }
 0x25d   : > { %3394 = vst [vmem:[#allocation3 + $0x48] sm:$0xf] %v3393_v14 }
 0x25e   : > { %v3466_v38 = vld [vmem:[#allocation3 + $0x44] sm:$0x1]  ;;  %v3256_v23 = vshrl.u32 %v3135_v16, 16  ;;  %v3032_v41 = vadd.f32 %v2984_v31, %v8810_v52  ;;  %v3259_v2 = vshll.u32 %v3135_v16, 16 }
 0x25f   : > { %v3467_v30 = vsel %vm8918_vm14, 0, %v3466_v38 }
 0x260   : > { %3468 = vst [vmem:[#allocation3 + $0x44] sm:$0x1] %v3467_v30  ;;  %v3258_v62 = vrot.slane %v3256_v23, 7  ;;  %v3096_v56 = vadd.f32 %v8866_v21, %v3032_v41  ;;  %v2875_v23 = vpop.f32.mrf.mxu2  ;;  %v2934_v41 = vpop.f32.mrf.mxu3 }
 0x262   : > { %v3261_v39 = vor.u32 %v3259_v2, %v3258_v62  ;;  %v3263_v35 = vrot.slane %v3258_v62, 4  ;;  %v3116_v26 = vmax.f32 %v3096_v56, 0.0 }
 0x263   : > { %v2985_v47 = vpop.f32.mrf.mxu0 }
 0x264   : > { %v3438_v57 = vld [vmem:[#allocation3 + $0x48] sm:$0x1]  ;;  %v3262_v52 = vsel %vm8896_vm13, %v3254_v24, %v3261_v39  ;;  %v3397_v37 = vsel %vm8891_vm12, %v3263_v35, %v3396_v49  ;;  %v3136_v11 = vpack.c.bf16 %v3116_v26, %v3116_v26  ;;  %v2986_v36 = vadd.f32 %v2985_v47, %v2927_v59  ;;  %v3406_v24 = vld [vmem:[#allocation3 + $0x60] sm:$0xf] }
 0x265   : > { %v3439_v34 = vsel %vm8891_vm12, 0, %v3438_v57  ;;  %3395 = vst [vmem:[#allocation3 + $0x4c] sm:$0xf] %v3262_v52  ;;  %v2935_v49 = vadd.f32 %v2934_v41, %v2875_v23 }
 0x266   : > { %3440 = vst [vmem:[#allocation3 + $0x48] sm:$0x1] %v3439_v34  ;;  %v3265_v5 = vshrl.u32 %v3136_v11, 16  ;;  %v3033_v8 = vadd.f32 %v2986_v36, %v8823_v22  ;;  %v3268_v55 = vshll.u32 %v3136_v11, 16 }
 0x267   : > { %3398 = vst [vmem:[#allocation3 + $0x50] sm:$0x1] %v3397_v37 }
 0x268   : > { %v3267_v0 = vrot.slane %v3265_v5, 7  ;;  %v3097_v27 = vadd.f32 %v8866_v21, %v3033_v8  ;;  %v2877_v36 = vpop.f32.mrf.mxu2 }
 0x26a   : > { %v3270_v17 = vor.u32 %v3268_v55, %v3267_v0  ;;  %v3117_v51 = vmax.f32 %v3097_v27, 0.0  ;;  %v3271_v10 = vrot.slane %v3267_v0, 4 }
 0x26b   : > { %v2988_v1 = vpop.f32.mrf.mxu0 }
 0x26c   : > { %v3400_v33 = vsel %vm8879_vm8, %v3270_v17, %v3399_v13  ;;  %v3137_v46 = vpack.c.bf16 %v3117_v51, %v3117_v51  ;;  %v2989_v50 = vadd.f32 %v2988_v1, %v2930_v25  ;;  %v3410_v25 = vld [vmem:[#allocation3 + $0x68] sm:$0x1] }
 0x26d   : > { %3401 = vst [vmem:[#allocation3 + $0x54] sm:$0xf] %v3400_v33 }
 0x26e   : > { %v3469_v28 = vld [vmem:[#allocation3 + $0x50] sm:$0x1]  ;;  %v3273_v22 = vshrl.u32 %v3137_v46, 16  ;;  %v3034_v32 = vadd.f32 %v2989_v50, %v8834_v43  ;;  %v3276_v63 = vshll.u32 %v3137_v46, 16 }
 0x26f   : > { %v3470_v58 = vsel %vm8918_vm14, 0, %v3469_v28 }
 0x270   : > { %3471 = vst [vmem:[#allocation3 + $0x50] sm:$0x1] %v3470_v58  ;;  %v3275_v60 = vrot.slane %v3273_v22, 7  ;;  %v3098_v48 = vadd.f32 %v8866_v21, %v3034_v32 }
 0x272   : > { %v3278_v42 = vor.u32 %v3276_v63, %v3275_v60  ;;  %v3280_v40 = vrot.slane %v3275_v60, 4  ;;  %v3118_v20 = vmax.f32 %v3098_v48, 0.0  ;;  %v3413_v48 = vld [vmem:[#allocation3 + $0x6c] sm:$0xf] }
 0x273   : > { %v2990_v14 = vpop.f32.mrf.mxu0 }
 0x274   : > { %v3441_v16 = vld [vmem:[#allocation3 + $0x54] sm:$0x1]  ;;  %v3279_v31 = vsel %vm8896_vm13, %v3271_v10, %v3278_v42  ;;  %v3404_v43 = vsel %vm8891_vm12, %v3280_v40, %v3403_v54  ;;  %v3138_v38 = vpack.c.bf16 %v3118_v20, %v3118_v20  ;;  %v2991_v30 = vadd.f32 %v2990_v14, %v2932_v61 }
 0x275   : > { %v3442_v62 = vsel %vm8891_vm12, 0, %v3441_v16  ;;  %3402 = vst [vmem:[#allocation3 + $0x58] sm:$0xf] %v3279_v31  ;;  %v3417_v31 = vld [vmem:[#allocation3 + $0x74] sm:$0x1] }
 0x276   : > { %3443 = vst [vmem:[#allocation3 + $0x54] sm:$0x1] %v3442_v62  ;;  %v3282_v2 = vshrl.u32 %v3138_v38, 16  ;;  %v3035_v56 = vadd.f32 %v2991_v30, %v8842_v19  ;;  %v3285_v45 = vshll.u32 %v3138_v38, 16  ;;  %v2936_v19 = vpop.f32.mrf.mxu3 }
 0x277   : > { %3405 = vst [vmem:[#allocation3 + $0x5c] sm:$0x1] %v3404_v43  ;;  %v2937_v27 = vadd.f32 %v2936_v19, %v2877_v36 }
 0x278   : > { %v3284_v18 = vrot.slane %v3282_v2, 7  ;;  %v3099_v59 = vadd.f32 %v8866_v21, %v3035_v56 }
 0x27a   : > { %v3287_v39 = vor.u32 %v3285_v45, %v3284_v18  ;;  %v3119_v35 = vmax.f32 %v3099_v59, 0.0  ;;  %v3288_v13 = vrot.slane %v3284_v18, 4 }
 0x27b   : > { %v2993_v26 = vpop.f32.mrf.mxu0 }
 0x27c   : > { %v3407_v47 = vsel %vm8879_vm8, %v3287_v39, %v3406_v24  ;;  %v3139_v57 = vpack.c.bf16 %v3119_v35, %v3119_v35  ;;  %v2994_v52 = vadd.f32 %v2993_v26, %v2935_v49 }
 0x27d   : > { %3408 = vst [vmem:[#allocation3 + $0x60] sm:$0xf] %v3407_v47 }
 0x27e   : > { %v3472_v37 = vld [vmem:[#allocation3 + $0x5c] sm:$0x1]  ;;  %v3290_v11 = vshrl.u32 %v3139_v57, 16  ;;  %v3036_v34 = vadd.f32 %v2994_v52, %v8850_v4  ;;  %v3293_v0 = vshll.u32 %v3139_v57, 16 }
 0x27f   : > { %v3473_v5 = vsel %vm8918_vm14, 0, %v3472_v37 }
 0x280   : > { %3474 = vst [vmem:[#allocation3 + $0x5c] sm:$0x1] %v3473_v5  ;;  %v3292_v8 = vrot.slane %v3290_v11, 7  ;;  %v3100_v55 = vadd.f32 %v8866_v21, %v3036_v34 }
 0x282   : > { %v3295_v17 = vor.u32 %v3293_v0, %v3292_v8  ;;  %v3297_v51 = vrot.slane %v3292_v8, 4  ;;  %v3120_v29 = vmax.f32 %v3100_v55, 0.0 }
 0x283   : > { %v2995_v6 = vpop.f32.mrf.mxu0 }
 0x284   : > { %v3444_v1 = vld [vmem:[#allocation3 + $0x60] sm:$0x1]  ;;  %v3296_v33 = vsel %vm8896_vm13, %v3288_v13, %v3295_v17  ;;  %v3411_v4 = vsel %vm8891_vm12, %v3297_v51, %v3410_v25  ;;  %v3140_v46 = vpack.c.bf16 %v3120_v29, %v3120_v29  ;;  %v2996_v50 = vadd.f32 %v2995_v6, %v2937_v27 }
 0x285   : > { %v3445_v28 = vsel %vm8891_vm12, 0, %v3444_v1  ;;  %3409 = vst [vmem:[#allocation3 + $0x64] sm:$0xf] %v3296_v33 }
 0x286   : > { %3446 = vst [vmem:[#allocation3 + $0x60] sm:$0x1] %v3445_v28  ;;  %v3299_v22 = vshrl.u32 %v3140_v46, 16  ;;  %v3037_v32 = vadd.f32 %v2996_v50, %v8861_v9  ;;  %v3302_v60 = vshll.u32 %v3140_v46, 16 }
 0x287   : > { %3412 = vst [vmem:[#allocation3 + $0x68] sm:$0x1] %v3411_v4 }
 0x288   : > { %v3301_v58 = vrot.slane %v3299_v22, 7  ;;  %v3101_v63 = vadd.f32 %v8866_v21, %v3037_v32 }
 0x28a   : > { %v3304_v54 = vor.u32 %v3302_v60, %v3301_v58  ;;  %v3121_v61 = vmax.f32 %v3101_v63, 0.0  ;;  %v3305_v43 = vrot.slane %v3301_v58, 4 }
 0x28c   : > { %v3414_v10 = vsel %vm8879_vm8, %v3304_v54, %v3413_v48  ;;  %v3141_v42 = vpack.c.bf16 %v3121_v61, %v3121_v61 }
 0x28d   : > { %3415 = vst [vmem:[#allocation3 + $0x6c] sm:$0xf] %v3414_v10 }
 0x28e   : > { %v3475_v40 = vld [vmem:[#allocation3 + $0x68] sm:$0x1]  ;;  %v3307_v20 = vshrl.u32 %v3141_v42, 16  ;;  %v3310_v16 = vshll.u32 %v3141_v42, 16 }
 0x28f   : > { %v3476_v14 = vsel %vm8918_vm14, 0, %v3475_v40 }
 0x290   : > { %3477 = vst [vmem:[#allocation3 + $0x68] sm:$0x1] %v3476_v14  ;;  %v3309_v9 = vrot.slane %v3307_v20, 7 }
 0x292   : > { %v3312_v38 = vor.u32 %v3310_v16, %v3309_v9  ;;  %v3314_v21 = vrot.slane %v3309_v9, 4 }
 0x294   : > { %v3447_v23 = vld [vmem:[#allocation3 + $0x6c] sm:$0x1]  ;;  %v3313_v41 = vsel %vm8896_vm13, %v3305_v43, %v3312_v38  ;;  %v3418_v7 = vsel %vm8891_vm12, %v3314_v21, %v3417_v31 }
 0x295   : > { %v3448_v30 = vsel %vm8891_vm12, 0, %v3447_v23  ;;  %3416 = vst [vmem:[#allocation3 + $0x70] sm:$0xf] %v3313_v41 }
 0x296   : > { %3449 = vst [vmem:[#allocation3 + $0x6c] sm:$0x1] %v3448_v30 }
 0x297   : > { %3419 = vst [vmem:[#allocation3 + $0x74] sm:$0x1] %v3418_v7 }
 0x29c   : > { %3484 = sbr.rel (%p6951_p7) target bundleno = 677 (0x2a5), region = 48 }
 0x29e   : > { %v3478_v62 = vld [vmem:[#allocation3 + $0x74] sm:$0x1] }
 0x29f   : > { %v3479_v2 = vsel %vm8918_vm14, 0, %v3478_v62 }
 0x2a0   : > { %3480 = vst [vmem:[#allocation3 + $0x74] sm:$0x1] %v3479_v2 }
 0x2a1   : > { %v8175_v56 = vmov 0  }
 0x2a2   : > { %3485 = vst [vmem:[#allocation3] sm:$0xf] %v8175_v56 }
 0x2a3   : > { %3486 = vst [vmem:[#allocation3 + $0x4] sm:$0xf] %v8175_v56 }
 0x2a4   : > { %3487 = vst [vmem:[#allocation3 + $0x8] sm:$0x1] %v8175_v56 }
 0x2a5 PF: > { %p6952_p8 = scmp.ne.s32.totalorder %s8157_s21, 1 }
 0x2a7   : > { %3491 = sbr.rel (%p6952_p8) target bundleno = 688 (0x2b0), region = 52 }
 0x2ac   : > { %v8176_v53 = vmov 0  }
 0x2ad   : > { %3493 = vst [vmem:[#allocation3 + $0x6c] sm:$0xf] %v8176_v53 }
 0x2ae   : > { %3494 = vst [vmem:[#allocation3 + $0x70] sm:$0xf] %v8176_v53 }
 0x2af   : > { %3495 = vst [vmem:[#allocation3 + $0x74] sm:$0x1] %v8176_v53 }
 0x2b0 PF: > { %v7886_v15 = vld [vmem:[%s9702_s3 + $0x38] sm:$0xff]  ;;  %v7885_v49 = vld [vmem:[%s9702_s3 + $0x30] sm:$0xff]  ;;  %v7884_v35 = vld [vmem:[%s9702_s3 + $0x28] sm:$0xff] }
 0x2b1   : > { %v7894_v3 = vld [vmem:[%s9702_s3 + $0x78] sm:$0xff]  ;;  %4368 = vmatpush.bf16.msra.mxu1 %v7886_v15  ;;  %v7893_v59 = vld [vmem:[%s9702_s3 + $0x70] sm:$0xff]  ;;  %v7892_v26 = vld [vmem:[%s9702_s3 + $0x68] sm:$0xff] }
 0x2b2   : > { %v7902_v18 = vld [vmem:[%s9702_s3 + $0xb8] sm:$0xff]  ;;  %4417 = vmatpush.bf16.msra.mxu2 %v7894_v3  ;;  %v7901_v24 = vld [vmem:[%s9702_s3 + $0xb0] sm:$0xff]  ;;  %v7900_v47 = vld [vmem:[%s9702_s3 + $0xa8] sm:$0xff] }
 0x2b3   : > { %v7982_v45 = vld [vmem:[%s9702_s3 + $0x1b8] sm:$0xff]  ;;  %4466 = vmatpush.bf16.msra.mxu3 %v7902_v18  ;;  %v7981_v39 = vld [vmem:[%s9702_s3 + $0x1b0] sm:$0xff]  ;;  %v7980_v57 = vld [vmem:[%s9702_s3 + $0x1a8] sm:$0xff] }
 0x2b4   : > { %5434 = vmatpush.bf16.msrb.mxu0 %v7982_v45  ;;  %v7883_v52 = vld [vmem:[%s9702_s3 + $0x20] sm:$0xff]  ;;  %v7882_v8 = vld [vmem:[%s9702_s3 + $0x18] sm:$0xff]  ;;  %v3538_v25 = vld [vmem:[#allocation3 + $0x8] sm:$0x1] }
 0x2b5   : > { %4369 = vmatpush.bf16.msra.mxu1 %v7885_v49  ;;  %v7891_v37 = vld [vmem:[%s9702_s3 + $0x60] sm:$0xff]  ;;  %v7890_v0 = vld [vmem:[%s9702_s3 + $0x58] sm:$0xff]  ;;  %v3586_v6 = vshll.u32 %v3538_v25, 16  ;;  %v3848_v33 = vld [vmem:[#allocation3 + $0x8] sm:$0x1] }
 0x2b6   : > { %4418 = vmatpush.bf16.msra.mxu2 %v7893_v59  ;;  %v7899_v11 = vld [vmem:[%s9702_s3 + $0xa0] sm:$0xff]  ;;  %v7898_v46 = vld [vmem:[%s9702_s3 + $0x98] sm:$0xff]  ;;  %v3911_v48 = vrot.slane %v3848_v33, 5  ;;  %v3498_v40 = vld [vmem:[#allocation3 + $0xc] sm:$0xf] }
 0x2b7   : > { %4467 = vmatpush.bf16.msra.mxu3 %v7901_v24  ;;  %v7979_v36 = vld [vmem:[%s9702_s3 + $0x1a0] sm:$0xff]  ;;  %v7978_v50 = vld [vmem:[%s9702_s3 + $0x198] sm:$0xff]  ;;  %v3588_v60 = vrot.slane %v3586_v6, 5  ;;  %v7881_v20 = vld [vmem:[%s9702_s3 + $0x10] sm:$0xff]  ;;  %3518 = vst [vmem:[#allocation4 + $0x18] sm:$0xf] %v3498_v40 }
 0x2b8   : > { %5435 = vmatpush.bf16.msrb.mxu0 %v7981_v39  ;;  %v3496_v19 = vld [vmem:[#allocation3] sm:$0xf]  ;;  %v3497_v34 = vld [vmem:[#allocation3 + $0x4] sm:$0xf]  ;;  %v3500_v54 = vld [vmem:[#allocation3 + $0x18] sm:$0xf] }
 0x2b9   : > { %4370 = vmatpush.bf16.msra.mxu1 %v7884_v35  ;;  %3516 = vst [vmem:[#allocation4] sm:$0xf] %v3496_v19  ;;  %v3536_v5 = vld [vmem:[#allocation3] sm:$0xf]  ;;  %v3537_v55 = vld [vmem:[#allocation3 + $0x4] sm:$0xf] }
 0x2ba   : > { %4419 = vmatpush.bf16.msra.mxu2 %v7892_v26  ;;  %3517 = vst [vmem:[#allocation4 + $0xc] sm:$0xf] %v3497_v34  ;;  %v3567_v27 = vshrl.u32 %v3536_v5, 16  ;;  %v3570_v13 = vshll.u32 %v3536_v5, 16  ;;  %v3576_v17 = vshll.u32 %v3537_v55, 16  ;;  %v3580_v51 = vshrl.u32 %v3537_v55, 16 }
 0x2bb   : > { %4468 = vmatpush.bf16.msra.mxu3 %v7900_v47  ;;  %v3846_v29 = vld [vmem:[#allocation3] sm:$0xe]  ;;  %v3847_v1 = vld [vmem:[#allocation3 + $0x4] sm:$0xf]  ;;  %v3501_v42 = vld [vmem:[#allocation3 + $0x1c] sm:$0xf] }
 0x2bc   : > { %5436 = vmatpush.bf16.msrb.mxu0 %v7980_v57  ;;  %v6953_v4 = vrot.slane %v3846_v29, 9  ;;  %v3569_v28 = vrot.slane %v3567_v27, 4  ;;  %v3572_v22 = vrot.slane %v3570_v13, 5  ;;  %v3578_v32 = vrot.slane %v3576_v17, 5  ;;  %3520 = vst [vmem:[#allocation4 + $0x30] sm:$0xf] %v3500_v54 }
 0x2bd   : > { %4371 = vmatpush.bf16.msra.mxu1 %v7883_v52  ;;  %v3582_v58 = vrot.slane %v3580_v51, 4  ;;  %v3908_v63 = vrot.slane %v3847_v1, 5  ;;  %v7889_v14 = vld [vmem:[%s9702_s3 + $0x50] sm:$0xff]  ;;  %3521 = vst [vmem:[#allocation4 + $0x3c] sm:$0xf] %v3501_v42  ;;  %v7880_v23 = vld [vmem:[%s9702_s3 + $0x8] sm:$0xff] }
 0x2be   : > { %4420 = vmatpush.bf16.msra.mxu2 %v7891_v37  ;;  %v3573_v61 = vor.u32 %v3572_v22, %v3569_v28  ;;  %v7897_v31 = vld [vmem:[%s9702_s3 + $0x90] sm:$0xff]  ;;  %v7888_v41 = vld [vmem:[%s9702_s3 + $0x48] sm:$0xff]  ;;  %v7879_v26 = vld [vmem:[%s9702_s3] sm:$0xff] }
 0x2bf   : > { %4469 = vmatpush.bf16.msra.mxu3 %v7899_v11  ;;  %v3583_v10 = vor.u32 %v3582_v58, %v3578_v32  ;;  %v3909_v9 = vsel %vm8315_vm4, %v6953_v4, %v3908_v63  ;;  %v3910_v16 = vrot.slane %v3908_v63, 4  ;;  %v7977_v43 = vld [vmem:[%s9702_s3 + $0x190] sm:$0xff]  ;;  %v3539_v62 = vld [vmem:[#allocation3 + $0xc] sm:$0xf]  ;;  %v7887_v47 = vld [vmem:[%s9702_s3 + $0x40] sm:$0xff] }
 0x2c0   : > { %5437 = vmatpush.bf16.msrb.mxu0 %v7979_v36  ;;  %v3574_v38 = vrot.slane %v3573_v61, 4  ;;  %3996 = vst [vmem:[#allocation4 + $0x8] sm:$0xf] %v3909_v9  ;;  %v3499_v30 = vld [vmem:[#allocation3 + $0x10] sm:$0xf]  ;;  %v7896_v2 = vld [vmem:[%s9702_s3 + $0x88] sm:$0xff] }
 0x2c1   : > { %4372 = vmatpush.bf16.msra.mxu1 %v7882_v8  ;;  %v3584_v21 = vrot.slane %v3583_v10, 4  ;;  %v3912_v7 = vsel %vm8315_vm4, %v3910_v16, %v3911_v48  ;;  %v3540_v15 = vld [vmem:[#allocation3 + $0x10] sm:$0xf]  ;;  %v3541_v3 = vld [vmem:[#allocation3 + $0x14] sm:$0x1]  ;;  %v3591_v18 = vshrl.u32 %v3539_v62, 16 }
 0x2c2   : > { %4421 = vmatpush.bf16.msra.mxu2 %v7890_v0  ;;  %v3579_v56 = vsel %vm8339_vm5, %v3574_v38, %v3578_v32  ;;  %3997 = vst [vmem:[#allocation4 + $0x14] sm:$0xf] %v3912_v7  ;;  %v3594_v45 = vshll.u32 %v3539_v62, 16  ;;  %v3600_v49 = vshll.u32 %v3540_v15, 16  ;;  %v3604_v59 = vshrl.u32 %v3540_v15, 16  ;;  %v7976_v24 = vld [vmem:[%s9702_s3 + $0x188] sm:$0xff] }
 0x2c3   : > { %4470 = vmatpush.bf16.msra.mxu3 %v7898_v46  ;;  %v3589_v53 = vsel %vm8339_vm5, %v3584_v21, %v3588_v60  ;;  %3826 = vst [vmem:[#allocation4 + $0x4] sm:$0xf] %v3579_v56  ;;  %v3610_v39 = vshll.u32 %v3541_v3, 16  ;;  %v3849_v35 = vld [vmem:[#allocation3 + $0xc] sm:$0xe]  ;;  %v3593_v37 = vrot.slane %v3591_v18, 4 }
 0x2c4   : > { %5438 = vmatpush.bf16.msrb.mxu0 %v7978_v50  ;;  %3827 = vst [vmem:[#allocation4 + $0x10] sm:$0xf] %v3589_v53  ;;  %v6965_v57 = vld [vmem:[#allocation4] sm:$0xf]  ;;  %v7856_v52 = vld [vmem:[#allocation4 + $0x8] sm:$0xf0] }
 0x2c5   : > { %4373 = vmatpush.bf16.msra.mxu1 %v7881_v20  ;;  %3519 = vst [vmem:[#allocation4 + $0x24] sm:$0xf] %v3499_v30  ;;  %v3596_v11 = vrot.slane %v3594_v45, 5  ;;  %v7895_v36 = vld [vmem:[%s9702_s3 + $0x80] sm:$0xff]  ;;  %v7445_v19 = vld [vmem:[#allocation4 + $0x30] sm:$0xf]  ;;  %v6966_v22 = vor.u32 %v7856_v52, %v6965_v57 }
 0x2c6   : > { %4422 = vmatpush.bf16.msra.mxu2 %v7889_v14  ;;  %v7952_v34 = vld [vmem:[#allocation4 + $0x38] sm:$0xf0]  ;;  %v3602_v5 = vrot.slane %v3600_v49, 5  ;;  %v3606_v8 = vrot.slane %v3604_v59, 4  ;;  %v6954_v0 = vrot.slane %v3849_v35, 9  ;;  %v7975_v55 = vld [vmem:[%s9702_s3 + $0x180] sm:$0xff] }
 0x2c7   : > { %4471 = vmatpush.bf16.msra.mxu3 %v7897_v31  ;;  %v3597_v25 = vor.u32 %v3596_v11, %v3593_v37  ;;  %v3612_v27 = vrot.slane %v3610_v39, 5  ;;  %v3850_v13 = vld [vmem:[#allocation3 + $0x10] sm:$0xf]  ;;  %v3851_v17 = vld [vmem:[#allocation3 + $0x14] sm:$0x1]  ;;  %v7942_v46 = vld [vmem:[%s9702_s3 + $0x138] sm:$0xff]  ;;  %v7446_v61 = vor.u32 %v7952_v34, %v7445_v19 }
 0x2c8   : > { %5439 = vmatpush.bf16.msrb.mxu0 %v7977_v43  ;;  %v6973_v51 = vld [vmem:[#allocation4 + $0x8] sm:$0xf]  ;;  %v3607_v29 = vor.u32 %v3606_v8, %v3602_v5  ;;  %v3915_v6 = vrot.slane %v3850_v13, 5  ;;  %v3918_v1 = vrot.slane %v3851_v17, 5  ;;  %v3502_v33 = vld [vmem:[#allocation3 + $0x24] sm:$0xf] }
 0x2c9   : > { %4374 = vmatpush.bf16.msra.mxu1 %v7880_v23  ;;  %v7857_v4 = vld [vmem:[#allocation4 + $0x10] sm:$0xf0]  ;;  %v7934_v50 = vld [vmem:[%s9702_s3 + $0xf8] sm:$0xff]  ;;  %v3598_v28 = vrot.slane %v3597_v25, 4  ;;  %3522 = vst [vmem:[#allocation4 + $0x48] sm:$0xf] %v3502_v33 }
 0x2ca   : > { %4423 = vmatpush.bf16.msra.mxu2 %v7888_v41  ;;  %v7855_v32 = vld [vmem:[#allocation4 + $0x4] sm:$0xf]  ;;  %v3608_v58 = vrot.slane %v3607_v29, 4  ;;  %v3916_v60 = vsel %vm8315_vm4, %v6954_v0, %v3915_v6  ;;  %v3917_v63 = vrot.slane %v3915_v6, 4  ;;  %v6974_v54 = vor.u32 %v7857_v4, %v6973_v51  ;;  %v7941_v9 = vld [vmem:[%s9702_s3 + $0x130] sm:$0xff]  ;;  %v7940_v59 = vld [vmem:[%s9702_s3 + $0x128] sm:$0xff] }
 0x2cb   : > { %4472 = vmatpush.bf16.msra.mxu3 %v7896_v2  ;;  %v6967_v48 = vld [vmem:[#allocation4 + $0xc] sm:$0xf0]  ;;  %v7950_v10 = vld [vmem:[%s9702_s3 + $0x178] sm:$0xff]  ;;  %v3603_v42 = vsel %vm8339_vm5, %v3598_v28, %v3602_v5  ;;  %3998 = vst [vmem:[#allocation4 + $0x20] sm:$0xf] %v3916_v60  ;;  %v7933_v31 = vld [vmem:[%s9702_s3 + $0xf0] sm:$0xff] }
 0x2cc   : > { %5440 = vmatpush.bf16.msrb.mxu0 %v7976_v24  ;;  %v6970_v40 = vor.u32 %v7855_v32, %v6967_v48  ;;  %v3613_v20 = vsel %vm8339_vm5, %v3608_v58, %v3612_v27  ;;  %3828 = vst [vmem:[#allocation4 + $0x1c] sm:$0xf] %v3603_v42  ;;  %v3919_v14 = vsel %vm8315_vm4, %v3917_v63, %v3918_v1  ;;  %v3503_v16 = vld [vmem:[#allocation3 + $0x28] sm:$0xf]  ;;  %v3542_v43 = vld [vmem:[#allocation3 + $0x18] sm:$0xf] }
 0x2cd   : > { %4375 = vmatpush.bf16.msra.mxu1 %v7879_v26  ;;  %3829 = vst [vmem:[#allocation4 + $0x28] sm:$0xf] %v3613_v20  ;;  %v3543_v38 = vld [vmem:[#allocation3 + $0x1c] sm:$0xf]  ;;  %v3544_v21 = vld [vmem:[#allocation3 + $0x20] sm:$0x1] }
 0x2ce   : > { %4424 = vmatpush.bf16.msra.mxu2 %v7887_v47  ;;  %3999 = vst [vmem:[#allocation4 + $0x2c] sm:$0xf] %v3919_v14  ;;  %v3615_v23 = vshrl.u32 %v3542_v43, 16  ;;  %v3618_v41 = vshll.u32 %v3542_v43, 16  ;;  %v7949_v7 = vld [vmem:[%s9702_s3 + $0x170] sm:$0xff]  ;;  %v3624_v30 = vshll.u32 %v3543_v38, 16 }
 0x2cf   : > { %4473 = vmatpush.bf16.msra.mxu3 %v7895_v36  ;;  %3523 = vst [vmem:[#allocation4 + $0x54] sm:$0xf] %v3503_v16  ;;  %v3628_v62 = vshrl.u32 %v3543_v38, 16  ;;  %v3634_v2 = vshll.u32 %v3544_v21, 16  ;;  %v3852_v15 = vld [vmem:[#allocation3 + $0x18] sm:$0xe] }
 0x2d0   : > { %5441 = vmatpush.bf16.msrb.mxu0 %v7975_v55  ;;  %4376 = vmatmul.bf16.vlgmr.msra.gmra.mxu1 %v6966_v22  ;;  %v3617_v56 = vrot.slane %v3615_v23, 4  ;;  %v3620_v53 = vrot.slane %v3618_v41, 5  ;;  %v3853_v3 = vld [vmem:[#allocation3 + $0x1c] sm:$0xf]  ;;  %v3626_v18 = vrot.slane %v3624_v30, 5  ;;  %v6955_v49 = vrot.slane %v3852_v15, 9 }
 0x2d1   : > { %4885 = vmatpush.bf16.msrb.mxu1 %v7934_v50  ;;  %4425 = vmatmul.bf16.vlgmr.msra.gmra.mxu2 %v6970_v40  ;;  %v3630_v45 = vrot.slane %v3628_v62, 4  ;;  %v3854_v39 = vld [vmem:[#allocation3 + $0x20] sm:$0x1]  ;;  %v3922_v35 = vrot.slane %v3853_v3, 5  ;;  %v7932_v26 = vld [vmem:[%s9702_s3 + $0xe8] sm:$0xff]  ;;  %v3636_v52 = vrot.slane %v3634_v2, 5 }
 0x2d2   : > { %4934 = vmatpush.bf16.msrb.mxu2 %v7942_v46  ;;  %4474 = vmatmul.bf16.vlgmr.msra.gmra.mxu3 %v6974_v54  ;;  %v3621_v24 = vor.u32 %v3620_v53, %v3617_v56  ;;  %v6977_v47 = vld [vmem:[#allocation4 + $0x18] sm:$0xf]  ;;  %v3925_v37 = vrot.slane %v3854_v39, 5  ;;  %v7859_v36 = vld [vmem:[#allocation4 + $0x20] sm:$0xf0]  ;;  %v7948_v8 = vld [vmem:[%s9702_s3 + $0x168] sm:$0xff] }
 0x2d3   : > { %5442 = vmatmul.bf16.vlgmr.msrb.gmra.mxu0 %v7446_v61  ;;  %4983 = vmatpush.bf16.msrb.mxu3 %v7950_v10  ;;  %v3631_v57 = vor.u32 %v3630_v45, %v3626_v18  ;;  %v3504_v11 = vld [vmem:[#allocation3 + $0x30] sm:$0xf]  ;;  %v3923_v34 = vsel %vm8315_vm4, %v6955_v49, %v3922_v35  ;;  %v3924_v5 = vrot.slane %v3922_v35, 4  ;;  %v7858_v0 = vld [vmem:[#allocation4 + $0x1c] sm:$0xf]  ;;  %v6978_v46 = vor.u32 %v7859_v36, %v6977_v47  ;;  %v7939_v53 = vld [vmem:[%s9702_s3 + $0x120] sm:$0xff] }
 0x2d4   : > { %v3622_v19 = vrot.slane %v3621_v24, 4  ;;  %v6979_v55 = vld [vmem:[#allocation4 + $0x24] sm:$0xf0]  ;;  %v6985_v25 = vld [vmem:[#allocation4 + $0x20] sm:$0xf] }
 0x2d5   : > { %4886 = vmatpush.bf16.msrb.mxu1 %v7933_v31  ;;  %v7457_v27 = vld [vmem:[#allocation4 + $0x48] sm:$0xf]  ;;  %v3632_v13 = vrot.slane %v3631_v57, 4  ;;  %4000 = vst [vmem:[#allocation4 + $0x38] sm:$0xf] %v3923_v34  ;;  %v3926_v29 = vsel %vm8315_vm4, %v3924_v5, %v3925_v37  ;;  %v6982_v63 = vor.u32 %v7858_v0, %v6979_v55 }
 0x2d6   : > { %4935 = vmatpush.bf16.msrb.mxu2 %v7941_v9  ;;  %v7860_v17 = vld [vmem:[#allocation4 + $0x28] sm:$0xf0]  ;;  %v3627_v51 = vsel %vm8339_vm5, %v3622_v19, %v3626_v18  ;;  %v3505_v6 = vld [vmem:[#allocation3 + $0x34] sm:$0xf]  ;;  %3524 = vst [vmem:[#allocation4 + $0x60] sm:$0xf] %v3504_v11 }
 0x2d7   : > { %4984 = vmatpush.bf16.msrb.mxu3 %v7949_v7  ;;  %v7955_v1 = vld [vmem:[#allocation4 + $0x50] sm:$0xf0]  ;;  %v3637_v33 = vsel %vm8339_vm5, %v3632_v13, %v3636_v52  ;;  %3830 = vst [vmem:[#allocation4 + $0x34] sm:$0xf] %v3627_v51  ;;  %v3545_v4 = vld [vmem:[#allocation3 + $0x24] sm:$0xf]  ;;  %v6986_v48 = vor.u32 %v7860_v17, %v6985_v25 }
 0x2d8   : > { %3831 = vst [vmem:[#allocation4 + $0x40] sm:$0xf] %v3637_v33  ;;  %v3546_v50 = vld [vmem:[#allocation3 + $0x28] sm:$0xf]  ;;  %v3547_v28 = vld [vmem:[#allocation3 + $0x2c] sm:$0x1]  ;;  %v7458_v54 = vor.u32 %v7955_v1, %v7457_v27 }
 0x2d9   : > { %4887 = vmatpush.bf16.msrb.mxu1 %v7932_v26  ;;  %4001 = vst [vmem:[#allocation4 + $0x44] sm:$0xf] %v3926_v29  ;;  %v3639_v22 = vshrl.u32 %v3545_v4, 16  ;;  %v3642_v32 = vshll.u32 %v3545_v4, 16  ;;  %v3648_v58 = vshll.u32 %v3546_v50, 16  ;;  %v3652_v60 = vshrl.u32 %v3546_v50, 16 }
 0x2da   : > { %4936 = vmatpush.bf16.msrb.mxu2 %v7940_v59  ;;  %3525 = vst [vmem:[#allocation4 + $0x6c] sm:$0xf] %v3505_v6  ;;  %v3658_v61 = vshll.u32 %v3547_v28, 16  ;;  %v3855_v10 = vld [vmem:[#allocation3 + $0x24] sm:$0xe] }
 0x2db   : > { %4985 = vmatpush.bf16.msrb.mxu3 %v7948_v8  ;;  %v3641_v42 = vrot.slane %v3639_v22, 4  ;;  %v3644_v40 = vrot.slane %v3642_v32, 5  ;;  %v3650_v20 = vrot.slane %v3648_v58, 5  ;;  %v3654_v14 = vrot.slane %v3652_v60, 4  ;;  %v3856_v9 = vld [vmem:[#allocation3 + $0x28] sm:$0xf] }
 0x2dc   : > { %v3660_v16 = vrot.slane %v3658_v61, 5  ;;  %v3857_v31 = vld [vmem:[#allocation3 + $0x2c] sm:$0x1]  ;;  %v6956_v43 = vrot.slane %v3855_v10, 9  ;;  %v3929_v23 = vrot.slane %v3856_v9, 5  ;;  %v7931_v15 = vld [vmem:[%s9702_s3 + $0xe0] sm:$0xff] }
 0x2dd   : > { %v3645_v38 = vor.u32 %v3644_v40, %v3641_v42  ;;  %v3655_v21 = vor.u32 %v3654_v14, %v3650_v20  ;;  %v3932_v41 = vrot.slane %v3857_v31, 5  ;;  %v3506_v7 = vld [vmem:[#allocation3 + $0x3c] sm:$0xf]  ;;  %v7947_v3 = vld [vmem:[%s9702_s3 + $0x160] sm:$0xff]  ;;  %4888 = vmatpush.bf16.msrb.mxu1 %v7931_v15  ;;  %v3548_v24 = vld [vmem:[#allocation3 + $0x30] sm:$0xf] }
 0x2de   : > { %3526 = vst [vmem:[#allocation4 + $0x78] sm:$0xf] %v3506_v7  ;;  %v3930_v2 = vsel %vm8315_vm4, %v6956_v43, %v3929_v23  ;;  %v3931_v56 = vrot.slane %v3929_v23, 4  ;;  %4937 = vmatpush.bf16.msrb.mxu2 %v7939_v53  ;;  %v3507_v59 = vld [vmem:[#allocation3 + $0x40] sm:$0xf]  ;;  %v3663_v26 = vshrl.u32 %v3548_v24, 16 }
 0x2df   : > { %v3646_v30 = vrot.slane %v3645_v38, 4  ;;  %v3656_v62 = vrot.slane %v3655_v21, 4  ;;  %4002 = vst [vmem:[#allocation4 + $0x50] sm:$0xf] %v3930_v2  ;;  %4986 = vmatpush.bf16.msrb.mxu3 %v7947_v3  ;;  %v3549_v39 = vld [vmem:[#allocation3 + $0x34] sm:$0xf] }
 0x2e0   : > { %4381 = vmatmul.bf16.gmra.mxu1 %v6978_v46  ;;  %v3933_v49 = vsel %vm8315_vm4, %v3931_v56, %v3932_v41  ;;  %v3550_v35 = vld [vmem:[#allocation3 + $0x38] sm:$0x1]  ;;  %v3666_v47 = vshll.u32 %v3548_v24, 16  ;;  %v6989_v57 = vld [vmem:[#allocation4 + $0x30] sm:$0xf]  ;;  %v3672_v37 = vshll.u32 %v3549_v39, 16 }
 0x2e1   : > { %4430 = vmatmul.bf16.gmra.mxu2 %v6982_v63  ;;  %v3651_v18 = vsel %vm8339_vm5, %v3646_v30, %v3650_v20  ;;  %v3661_v45 = vsel %vm8339_vm5, %v3656_v62, %v3660_v16  ;;  %v7862_v52 = vld [vmem:[#allocation4 + $0x38] sm:$0xf0]  ;;  %4003 = vst [vmem:[#allocation4 + $0x5c] sm:$0xf] %v3933_v49  ;;  %v3676_v11 = vshrl.u32 %v3549_v39, 16  ;;  %v3682_v36 = vshll.u32 %v3550_v35, 16 }
 0x2e2   : > { %4479 = vmatmul.bf16.gmra.mxu3 %v6986_v48  ;;  %3832 = vst [vmem:[#allocation4 + $0x4c] sm:$0xf] %v3651_v18  ;;  %v7861_v19 = vld [vmem:[#allocation4 + $0x34] sm:$0xf]  ;;  %v6991_v34 = vld [vmem:[#allocation4 + $0x3c] sm:$0xf0]  ;;  %v6990_v32 = vor.u32 %v7862_v52, %v6989_v57 }
 0x2e3   : > { %5447 = vmatmul.bf16.gmra.mxu0 %v7458_v54  ;;  %3833 = vst [vmem:[#allocation4 + $0x58] sm:$0xf] %v3661_v45  ;;  %v3665_v5 = vrot.slane %v3663_v26, 4  ;;  %v3668_v8 = vrot.slane %v3666_v47, 5  ;;  %v6997_v0 = vld [vmem:[#allocation4 + $0x38] sm:$0xf]  ;;  %v6994_v60 = vor.u32 %v7861_v19, %v6991_v34 }
 0x2e4   : > { %3527 = vst [vmem:[#allocation4 + $0x84] sm:$0xf] %v3507_v59  ;;  %v7863_v55 = vld [vmem:[#allocation4 + $0x40] sm:$0xf0]  ;;  %v7469_v25 = vld [vmem:[#allocation4 + $0x60] sm:$0xf] }
 0x2e5   : > { %v7958_v27 = vld [vmem:[#allocation4 + $0x68] sm:$0xf0]  ;;  %v3674_v13 = vrot.slane %v3672_v37, 5  ;;  %v3678_v17 = vrot.slane %v3676_v11, 4  ;;  %v3858_v51 = vld [vmem:[#allocation3 + $0x30] sm:$0xe]  ;;  %v3669_v29 = vor.u32 %v3668_v8, %v3665_v5  ;;  %v6998_v61 = vor.u32 %v7863_v55, %v6997_v0 }
 0x2e6   : > { %v3684_v6 = vrot.slane %v3682_v36, 5  ;;  %v3859_v1 = vld [vmem:[#allocation3 + $0x34] sm:$0xf]  ;;  %v3860_v33 = vld [vmem:[#allocation3 + $0x38] sm:$0x1]  ;;  %v6957_v46 = vrot.slane %v3858_v51, 9  ;;  %v7470_v10 = vor.u32 %v7958_v27, %v7469_v25 }
 0x2e7   : > { %v3679_v4 = vor.u32 %v3678_v17, %v3674_v13  ;;  %v3936_v50 = vrot.slane %v3859_v1, 5  ;;  %v3939_v28 = vrot.slane %v3860_v33, 5  ;;  %v3508_v22 = vld [vmem:[#allocation3 + $0x48] sm:$0xf]  ;;  %v3670_v58 = vrot.slane %v3669_v29, 4  ;;  %v7938_v23 = vld [vmem:[%s9702_s3 + $0x118] sm:$0xff] }
 0x2e8   : > { %3528 = vst [vmem:[#allocation4 + $0x90] sm:$0xf] %v3508_v22  ;;  %v3551_v40 = vld [vmem:[#allocation3 + $0x3c] sm:$0xf]  ;;  %v3509_v9 = vld [vmem:[#allocation3 + $0x4c] sm:$0xf]  ;;  %4938 = vmatpush.bf16.msrb.mxu2 %v7938_v23 }
 0x2e9   : > { %v3680_v63 = vrot.slane %v3679_v4, 4  ;;  %v3937_v48 = vsel %vm8315_vm4, %v6957_v46, %v3936_v50  ;;  %v3938_v54 = vrot.slane %v3936_v50, 4  ;;  %v3675_v42 = vsel %vm8339_vm5, %v3670_v58, %v3674_v13  ;;  %v3552_v16 = vld [vmem:[#allocation3 + $0x40] sm:$0xf]  ;;  %3529 = vst [vmem:[#allocation4 + $0x9c] sm:$0xf] %v3509_v9 }
 0x2ea   : > { %4004 = vst [vmem:[#allocation4 + $0x68] sm:$0xf] %v3937_v48  ;;  %v3687_v31 = vshrl.u32 %v3551_v40, 16  ;;  %v3690_v43 = vshll.u32 %v3551_v40, 16  ;;  %v3696_v38 = vshll.u32 %v3552_v16, 16  ;;  %v3700_v21 = vshrl.u32 %v3552_v16, 16 }
 0x2eb   : > { %v3685_v20 = vsel %vm8339_vm5, %v3680_v63, %v3684_v6  ;;  %3834 = vst [vmem:[#allocation4 + $0x64] sm:$0xf] %v3675_v42  ;;  %v3940_v14 = vsel %vm8315_vm4, %v3938_v54, %v3939_v28  ;;  %v7930_v41 = vld [vmem:[%s9702_s3 + $0xd8] sm:$0xff]  ;;  %v9250_v15 = vld [vmem:[%s9702_s3 + $0x1f0] sm:$0xff]  ;;  %v3553_v3 = vld [vmem:[#allocation3 + $0x44] sm:$0x1] }
 0x2ec   : > { %3835 = vst [vmem:[#allocation4 + $0x70] sm:$0xf] %v3685_v20  ;;  %v7946_v7 = vld [vmem:[%s9702_s3 + $0x158] sm:$0xff]  ;;  %v3689_v30 = vrot.slane %v3687_v31, 4  ;;  %v3692_v2 = vrot.slane %v3690_v43, 5  ;;  %v3698_v56 = vrot.slane %v3696_v38, 5  ;;  %4889 = vmatpush.bf16.msrb.mxu1 %v7930_v41 }
 0x2ed   : > { %4005 = vst [vmem:[#allocation4 + $0x74] sm:$0xf] %v3940_v14  ;;  %v9244_v62 = vld [vmem:[%s9702_s3 + $0x1f8] sm:$0xff]  ;;  %v3702_v53 = vrot.slane %v3700_v21, 4  ;;  %4987 = vmatpush.bf16.msrb.mxu3 %v7946_v7  ;;  %v3706_v59 = vshll.u32 %v3553_v3, 16  ;;  %v9256_v0 = vld [vmem:[%s9702_s3 + $0x1e8] sm:$0xff] }
 0x2ee   : > { %5483 = vmatpush.bf16.msra.mxu0 %v9244_v62  ;;  %v3693_v18 = vor.u32 %v3692_v2, %v3689_v30  ;;  %v3861_v49 = vld [vmem:[#allocation3 + $0x3c] sm:$0xe]  ;;  %v3862_v24 = vld [vmem:[#allocation3 + $0x40] sm:$0xf]  ;;  %v3863_v47 = vld [vmem:[#allocation3 + $0x44] sm:$0x1] }
 0x2ef   : > { %v3703_v45 = vor.u32 %v3702_v53, %v3698_v56  ;;  %v6958_v39 = vrot.slane %v3861_v49, 9  ;;  %v7001_v57 = vld [vmem:[#allocation4 + $0x48] sm:$0xf]  ;;  %v7865_v52 = vld [vmem:[#allocation4 + $0x50] sm:$0xf0]  ;;  %v3708_v37 = vrot.slane %v3706_v59, 5 }
 0x2f0   : > { %4386 = vmatmul.bf16.gmra.mxu1 %v6990_v32  ;;  %v3694_v35 = vrot.slane %v3693_v18, 4  ;;  %v3943_v11 = vrot.slane %v3862_v24, 5  ;;  %v3946_v36 = vrot.slane %v3863_v47, 5  ;;  %v7864_v19 = vld [vmem:[#allocation4 + $0x4c] sm:$0xf]  ;;  %v7002_v33 = vor.u32 %v7865_v52, %v7001_v57  ;;  %v7937_v42 = vld [vmem:[%s9702_s3 + $0x110] sm:$0xff] }
 0x2f1   : > { %4435 = vmatmul.bf16.gmra.mxu2 %v6994_v60  ;;  %v3704_v26 = vrot.slane %v3703_v45, 4  ;;  %v7003_v34 = vld [vmem:[#allocation4 + $0x54] sm:$0xf0]  ;;  %v7009_v5 = vld [vmem:[#allocation4 + $0x50] sm:$0xf]  ;;  %v9273_v40 = vld [vmem:[%s9702_s3 + $0x1e0] sm:$0xff] }
 0x2f2   : > { %4484 = vmatmul.bf16.gmra.mxu3 %v6998_v61  ;;  %v7481_v8 = vld [vmem:[#allocation4 + $0x78] sm:$0xf]  ;;  %5484 = vmatpush.bf16.msra.mxu0 %v9250_v15  ;;  %v3699_v55 = vsel %vm8339_vm5, %v3694_v35, %v3698_v56  ;;  %v7866_v25 = vld [vmem:[#allocation4 + $0x58] sm:$0xf0]  ;;  %v3944_v13 = vsel %vm8315_vm4, %v6958_v39, %v3943_v11  ;;  %v3945_v17 = vrot.slane %v3943_v11, 4  ;;  %v7006_v4 = vor.u32 %v7864_v19, %v7003_v34  ;;  %v9285_v31 = vld [vmem:[%s9702_s3 + $0x1d8] sm:$0xff] }
 0x2f3   : > { %5452 = vmatmul.bf16.gmra.mxu0 %v7470_v10  ;;  %v3709_v27 = vsel %vm8339_vm5, %v3704_v26, %v3708_v37  ;;  %3836 = vst [vmem:[#allocation4 + $0x7c] sm:$0xf] %v3699_v55  ;;  %v7961_v51 = vld [vmem:[#allocation4 + $0x80] sm:$0xf0]  ;;  %v3510_v29 = vld [vmem:[#allocation3 + $0x54] sm:$0xf]  ;;  %v7010_v46 = vor.u32 %v7866_v25, %v7009_v5  ;;  %4939 = vmatpush.bf16.msrb.mxu2 %v7937_v42 }
 0x2f4   : > { %3837 = vst [vmem:[#allocation4 + $0x88] sm:$0xf] %v3709_v27  ;;  %v3947_v6 = vsel %vm8315_vm4, %v3945_v17, %v3946_v36  ;;  %v3511_v1 = vld [vmem:[#allocation3 + $0x58] sm:$0xf]  ;;  %v7482_v50 = vor.u32 %v7961_v51, %v7481_v8  ;;  %v3554_v28 = vld [vmem:[#allocation3 + $0x48] sm:$0xf] }
 0x2f5   : > { %4006 = vst [vmem:[#allocation4 + $0x80] sm:$0xf] %v3944_v13  ;;  %v3555_v22 = vld [vmem:[#allocation3 + $0x4c] sm:$0xf]  ;;  %v3711_v32 = vshrl.u32 %v3554_v28, 16  ;;  %v3714_v58 = vshll.u32 %v3554_v28, 16 }
 0x2f6   : > { %5485 = vmatpush.bf16.msra.mxu0 %v9256_v0  ;;  %4007 = vst [vmem:[#allocation4 + $0x8c] sm:$0xf] %v3947_v6  ;;  %v3720_v60 = vshll.u32 %v3555_v22, 16  ;;  %v3724_v63 = vshrl.u32 %v3555_v22, 16  ;;  %v7929_v20 = vld [vmem:[%s9702_s3 + $0xd0] sm:$0xff]  ;;  %v9301_v19 = vld [vmem:[%s9702_s3 + $0x1c8] sm:$0xff] }
 0x2f7   : > { %3530 = vst [vmem:[#allocation4 + $0xa8] sm:$0xf] %v3510_v29  ;;  %v3713_v48 = vrot.slane %v3711_v32, 4  ;;  %v3716_v54 = vrot.slane %v3714_v58, 5  ;;  %v7945_v14 = vld [vmem:[%s9702_s3 + $0x150] sm:$0xff]  ;;  %4890 = vmatpush.bf16.msrb.mxu1 %v7929_v20  ;;  %v7936_v28 = vld [vmem:[%s9702_s3 + $0x108] sm:$0xff] }
 0x2f8   : > { %3531 = vst [vmem:[#allocation4 + $0xb4] sm:$0xf] %v3511_v1  ;;  %v3722_v61 = vrot.slane %v3720_v60, 5  ;;  %v3726_v10 = vrot.slane %v3724_v63, 4  ;;  %4988 = vmatpush.bf16.msrb.mxu3 %v7945_v14  ;;  %v3556_v38 = vld [vmem:[#allocation3 + $0x50] sm:$0x1]  ;;  %4940 = vmatpush.bf16.msrb.mxu2 %v7936_v28 }
 0x2f9   : > { %v3717_v9 = vor.u32 %v3716_v54, %v3713_v48  ;;  %v9290_v21 = vld [vmem:[%s9702_s3 + $0x1d0] sm:$0xff]  ;;  %v3864_v7 = vld [vmem:[#allocation3 + $0x48] sm:$0xe]  ;;  %v3865_v30 = vld [vmem:[#allocation3 + $0x4c] sm:$0xf]  ;;  %v3730_v18 = vshll.u32 %v3556_v38, 16 }
 0x2fa   : > { %v3727_v16 = vor.u32 %v3726_v10, %v3722_v61  ;;  %5486 = vmatpush.bf16.msra.mxu0 %v9273_v40  ;;  %v7013_v2 = vld [vmem:[#allocation4 + $0x60] sm:$0xf]  ;;  %v7868_v56 = vld [vmem:[#allocation4 + $0x68] sm:$0xf0]  ;;  %v7867_v53 = vld [vmem:[#allocation4 + $0x64] sm:$0xf] }
 0x2fb   : > { %v3718_v43 = vrot.slane %v3717_v9, 4  ;;  %v7015_v3 = vld [vmem:[#allocation4 + $0x6c] sm:$0xf0]  ;;  %v3866_v45 = vld [vmem:[#allocation3 + $0x50] sm:$0x1]  ;;  %v6959_v49 = vrot.slane %v3864_v7, 9  ;;  %v7014_v5 = vor.u32 %v7868_v56, %v7013_v2 }
 0x2fc   : > { %v3728_v41 = vrot.slane %v3727_v16, 4  ;;  %v7021_v59 = vld [vmem:[#allocation4 + $0x68] sm:$0xf]  ;;  %v7493_v24 = vld [vmem:[#allocation4 + $0x90] sm:$0xf]  ;;  %v3950_v39 = vrot.slane %v3865_v30, 5  ;;  %v7018_v8 = vor.u32 %v7867_v53, %v7015_v3 }
 0x2fd   : > { %v3723_v23 = vsel %vm8339_vm5, %v3718_v43, %v3722_v61  ;;  %v3953_v35 = vrot.slane %v3866_v45, 5  ;;  %v3512_v26 = vld [vmem:[#allocation3 + $0x60] sm:$0xf]  ;;  %v3513_v47 = vld [vmem:[#allocation3 + $0x64] sm:$0xf]  ;;  %v3732_v52 = vrot.slane %v3730_v18, 5 }
 0x2fe   : > { %5487 = vmatpush.bf16.msra.mxu0 %v9285_v31  ;;  %3838 = vst [vmem:[#allocation4 + $0x94] sm:$0xf] %v3723_v23  ;;  %v7869_v57 = vld [vmem:[#allocation4 + $0x70] sm:$0xf0]  ;;  %v7964_v37 = vld [vmem:[#allocation4 + $0x98] sm:$0xf0]  ;;  %v3951_v11 = vsel %vm8315_vm4, %v6959_v49, %v3950_v39 }
 0x2ff   : > { %3532 = vst [vmem:[#allocation4 + $0xc0] sm:$0xf] %v3512_v26  ;;  %v3952_v36 = vrot.slane %v3950_v39, 4  ;;  %v3733_v34 = vsel %vm8339_vm5, %v3728_v41, %v3732_v52  ;;  %v7022_v25 = vor.u32 %v7869_v57, %v7021_v59  ;;  %v7494_v27 = vor.u32 %v7964_v37, %v7493_v24  ;;  %v3557_v13 = vld [vmem:[#allocation3 + $0x54] sm:$0xf]  ;;  %v9314_v22 = vld [vmem:[%s9702_s3 + $0x1c0] sm:$0xff] }
 0x300   : > { %4391 = vmatmul.bf16.gmra.mxu1 %v7002_v33  ;;  %3533 = vst [vmem:[#allocation4 + $0xcc] sm:$0xf] %v3513_v47  ;;  %v3558_v17 = vld [vmem:[#allocation3 + $0x58] sm:$0xf]  ;;  %v3735_v51 = vshrl.u32 %v3557_v13, 16  ;;  %v3738_v29 = vshll.u32 %v3557_v13, 16 }
 0x301   : > { %4440 = vmatmul.bf16.gmra.mxu2 %v7006_v4  ;;  %4008 = vst [vmem:[#allocation4 + $0x98] sm:$0xf] %v3951_v11  ;;  %v3954_v55 = vsel %vm8315_vm4, %v3952_v36, %v3953_v35  ;;  %v3744_v6 = vshll.u32 %v3558_v17, 16  ;;  %v3748_v1 = vshrl.u32 %v3558_v17, 16  ;;  %v7928_v32 = vld [vmem:[%s9702_s3 + $0xc8] sm:$0xff]  ;;  %v7998_v48 = vld [vmem:[%s9702_s3 + $0x238] sm:$0xff] }
 0x302   : > { %4489 = vmatmul.bf16.gmra.mxu3 %v7010_v46  ;;  %5488 = vmatpush.bf16.msra.mxu0 %v9290_v21  ;;  %3839 = vst [vmem:[#allocation4 + $0xa0] sm:$0xf] %v3733_v34  ;;  %v3737_v33 = vrot.slane %v3735_v51, 4  ;;  %v3740_v4 = vrot.slane %v3738_v29, 5  ;;  %v7944_v58 = vld [vmem:[%s9702_s3 + $0x148] sm:$0xff]  ;;  %v7997_v61 = vld [vmem:[%s9702_s3 + $0x230] sm:$0xff] }
 0x303   : > { %5457 = vmatmul.bf16.gmra.mxu0 %v7482_v50  ;;  %4009 = vst [vmem:[#allocation4 + $0xa4] sm:$0xf] %v3954_v55  ;;  %v3746_v46 = vrot.slane %v3744_v6, 5  ;;  %v3750_v50 = vrot.slane %v3748_v1, 4  ;;  %4891 = vmatpush.bf16.msrb.mxu1 %v7928_v32  ;;  %v3559_v10 = vld [vmem:[#allocation3 + $0x5c] sm:$0x1] }
 0x304   : > { %v3741_v60 = vor.u32 %v3740_v4, %v3737_v33  ;;  %4989 = vmatpush.bf16.msrb.mxu3 %v7944_v58  ;;  %v3754_v14 = vshll.u32 %v3559_v10, 16  ;;  %v3867_v9 = vld [vmem:[#allocation3 + $0x54] sm:$0xe]  ;;  %v3868_v16 = vld [vmem:[#allocation3 + $0x58] sm:$0xf]  ;;  %v7996_v59 = vld [vmem:[%s9702_s3 + $0x228] sm:$0xff] }
 0x305   : > { %v3751_v63 = vor.u32 %v3750_v50, %v3746_v46  ;;  %v7025_v43 = vld [vmem:[#allocation4 + $0x78] sm:$0xf]  ;;  %v7871_v38 = vld [vmem:[#allocation4 + $0x80] sm:$0xf0]  ;;  %v7870_v23 = vld [vmem:[#allocation4 + $0x7c] sm:$0xf] }
 0x306   : > { %5489 = vmatpush.bf16.msra.mxu0 %v9301_v19  ;;  %v3742_v54 = vrot.slane %v3741_v60, 4  ;;  %v7027_v41 = vld [vmem:[#allocation4 + $0x84] sm:$0xf0]  ;;  %v3869_v7 = vld [vmem:[#allocation3 + $0x5c] sm:$0x1]  ;;  %v6960_v30 = vrot.slane %v3867_v9, 9  ;;  %v7026_v52 = vor.u32 %v7871_v38, %v7025_v43 }
 0x307   : > { %v3752_v20 = vrot.slane %v3751_v63, 4  ;;  %v3957_v2 = vrot.slane %v3868_v16, 5  ;;  %v7033_v56 = vld [vmem:[#allocation4 + $0x80] sm:$0xf]  ;;  %v7872_v53 = vld [vmem:[#allocation4 + $0x88] sm:$0xf0]  ;;  %v7030_v37 = vor.u32 %v7870_v23, %v7027_v41 }
 0x308   : > { %v3747_v42 = vsel %vm8339_vm5, %v3742_v54, %v3746_v46  ;;  %v3756_v3 = vrot.slane %v3754_v14, 5  ;;  %v3960_v18 = vrot.slane %v3869_v7, 5  ;;  %v3514_v45 = vld [vmem:[#allocation3 + $0x6c] sm:$0xf]  ;;  %v7505_v49 = vld [vmem:[#allocation4 + $0xa8] sm:$0xf]  ;;  %v7034_v11 = vor.u32 %v7872_v53, %v7033_v56 }
 0x309   : > { %3840 = vst [vmem:[#allocation4 + $0xac] sm:$0xf] %v3747_v42  ;;  %v3958_v24 = vsel %vm8315_vm4, %v6960_v30, %v3957_v2  ;;  %v3959_v39 = vrot.slane %v3957_v2, 4  ;;  %v7967_v35 = vld [vmem:[#allocation4 + $0xb0] sm:$0xf0]  ;;  %v7995_v34 = vld [vmem:[%s9702_s3 + $0x220] sm:$0xff] }
 0x30a   : > { %5490 = vmatpush.bf16.msra.mxu0 %v9314_v22  ;;  %3534 = vst [vmem:[#allocation4 + $0xd8] sm:$0xf] %v3514_v45  ;;  %v3757_v26 = vsel %vm8339_vm5, %v3752_v20, %v3756_v3  ;;  %v3515_v47 = vld [vmem:[#allocation3 + $0x70] sm:$0xf]  ;;  %v7506_v36 = vor.u32 %v7967_v35, %v7505_v49  ;;  %v7943_v55 = vld [vmem:[%s9702_s3 + $0x140] sm:$0xff]  ;;  %v8006_v58 = vld [vmem:[%s9703_s4 + $0x38] sm:$0xff] }
 0x30b   : > { %4010 = vst [vmem:[#allocation4 + $0xb0] sm:$0xf] %v3958_v24  ;;  %v3961_v57 = vsel %vm8315_vm4, %v3959_v39, %v3960_v18  ;;  %4990 = vmatpush.bf16.msrb.mxu3 %v7943_v55  ;;  %v7037_v13 = vld [vmem:[#allocation4 + $0x90] sm:$0xf]  ;;  %v7874_v17 = vld [vmem:[#allocation4 + $0x98] sm:$0xf0] }
 0x30c   : > { %3841 = vst [vmem:[#allocation4 + $0xb8] sm:$0xf] %v3757_v26  ;;  %v7873_v51 = vld [vmem:[#allocation4 + $0x94] sm:$0xf]  ;;  %v7039_v29 = vld [vmem:[#allocation4 + $0x9c] sm:$0xf0]  ;;  %v7038_v46 = vor.u32 %v7874_v17, %v7037_v13 }
 0x30d   : > { %4011 = vst [vmem:[#allocation4 + $0xbc] sm:$0xf] %v3961_v57  ;;  %v7517_v6 = vld [vmem:[#allocation4 + $0xc0] sm:$0xf]  ;;  %v7970_v1 = vld [vmem:[#allocation4 + $0xc8] sm:$0xf0]  ;;  %v7042_v50 = vor.u32 %v7873_v51, %v7039_v29 }
 0x30e   : > { %5532 = vmatpush.bf16.msrb.mxu0 %v7998_v48  ;;  %3535 = vst [vmem:[#allocation4 + $0xe4] sm:$0xf] %v3515_v47  ;;  %v7045_v33 = vld [vmem:[#allocation4 + $0x98] sm:$0xf]  ;;  %v7875_v4 = vld [vmem:[#allocation4 + $0xa0] sm:$0xf0]  ;;  %v7518_v32 = vor.u32 %v7970_v1, %v7517_v6 }
 0x30f   : > { %v7046_v28 = vor.u32 %v7875_v4, %v7045_v33  ;;  %8081 = vmatpush.bf16.msra.mxu3 %v8006_v58  ;;  %v7049_v60 = vld [vmem:[#allocation4 + $0xa8] sm:$0xf]  ;;  %v7877_v63 = vld [vmem:[#allocation4 + $0xb0] sm:$0xf0]  ;;  %v9402_v38 = vld [vmem:[%s9703_s4 + $0x10] sm:$0xff] }
 0x310   : > { %4396 = vmatmul.bf16.gmra.mxu1 %v7014_v5  ;;  %v7935_v5 = vld [vmem:[%s9702_s3 + $0x100] sm:$0xff]  ;;  %v9381_v10 = vld [vmem:[%s9703_s4 + $0x28] sm:$0xff]  ;;  %v7050_v14 = vor.u32 %v7877_v63, %v7049_v60  ;;  %v7904_v23 = vld [vmem:[#allocation4 + $0x20] sm:$0xf0] }
 0x311   : > { %4445 = vmatmul.bf16.gmra.mxu2 %v7018_v8  ;;  %v7927_v8 = vld [vmem:[%s9702_s3 + $0xc0] sm:$0xff]  ;;  %v7903_v41 = vld [vmem:[#allocation4 + $0x1c] sm:$0xf]  ;;  %v7213_v30 = vld [vmem:[#allocation4 + $0x20] sm:$0xf] }
 0x312   : > { %4494 = vmatmul.bf16.gmra.mxu3 %v7022_v25  ;;  %5533 = vmatpush.bf16.msrb.mxu0 %v7997_v61  ;;  %v7994_v25 = vld [vmem:[%s9702_s3 + $0x218] sm:$0xff]  ;;  %v9388_v43 = vld [vmem:[%s9703_s4 + $0x20] sm:$0xff]  ;;  %v9408_v2 = vld [vmem:[%s9703_s4 + $0x8] sm:$0xff] }
 0x313   : > { %5462 = vmatmul.bf16.gmra.mxu0 %v7494_v27  ;;  %4941 = vmatpush.bf16.msrb.mxu2 %v7935_v5  ;;  %v7993_v27 = vld [vmem:[%s9702_s3 + $0x210] sm:$0xff]  ;;  %v7207_v7 = vld [vmem:[#allocation4 + $0x24] sm:$0xf0]  ;;  %v7905_v56 = vld [vmem:[#allocation4 + $0x28] sm:$0xf0] }
 0x314   : > { %4892 = vmatpush.bf16.msrb.mxu1 %v7927_v8  ;;  %v7051_v54 = vld [vmem:[#allocation4 + $0xb4] sm:$0xf0]  ;;  %v7878_v42 = vld [vmem:[#allocation4 + $0xb8] sm:$0xf0]  ;;  %v7951_v53 = vld [vmem:[#allocation4 + $0x34] sm:$0xf]  ;;  %v7210_v18 = vor.u32 %v7903_v41, %v7207_v7  ;;  %v7214_v49 = vor.u32 %v7905_v56, %v7213_v30 }
 0x315   : > { %v7973_v20 = vld [vmem:[#allocation4 + $0xe0] sm:$0xf0]  ;;  %v9414_v24 = vld [vmem:[%s9703_s4] sm:$0xff]  ;;  %v7635_v35 = vld [vmem:[%s8290_s7 + $0x18] sm:$0xf] }
 0x316   : > { %5534 = vmatpush.bf16.msrb.mxu0 %v7996_v59  ;;  %v7636_v47 = vld [vmem:[%s8290_s7 + $0x1c] sm:$0xf]  ;;  %v5658_v5 = vshll.u32 %v7635_v35, 16  ;;  %v7906_v13 = vld [vmem:[#allocation4 + $0x34] sm:$0xf] }
 0x317   : > { %8073 = vmatpush.bf16.msra.mxu2 %v7998_v48  ;;  %v7876_v48 = vld [vmem:[#allocation4 + $0xac] sm:$0xf]  ;;  %v5664_v8 = vshll.u32 %v7636_v47, 16  ;;  %v5668_v55 = vshrl.u32 %v7636_v47, 16  ;;  %v7219_v17 = vld [vmem:[#allocation4 + $0x3c] sm:$0xf0] }
 0x318   : > { %8065 = vmatpush.bf16.msra.mxu1 %v9244_v62  ;;  %v7992_v62 = vld [vmem:[%s9702_s3 + $0x208] sm:$0xff]  ;;  %v7225_v51 = vld [vmem:[#allocation4 + $0x38] sm:$0xf]  ;;  %v7908_v29 = vld [vmem:[#allocation4 + $0x40] sm:$0xf0]  ;;  %v5660_v4 = vrot.slane %v5658_v5, 5 }
 0x319   : > { %v7453_v6 = vld [vmem:[#allocation4 + $0x38] sm:$0xf]  ;;  %v7953_v1 = vld [vmem:[#allocation4 + $0x40] sm:$0xf0]  ;;  %v7226_v63 = vor.u32 %v7908_v29, %v7225_v51  ;;  %v7910_v56 = vld [vmem:[#allocation4 + $0x50] sm:$0xf0] }
 0x31a   : > { %5535 = vmatpush.bf16.msrb.mxu0 %v7995_v34  ;;  %v7913_v51 = vld [vmem:[#allocation4 + $0x68] sm:$0xf0]  ;;  %v7912_v29 = vld [vmem:[#allocation4 + $0x64] sm:$0xf] }
 0x31b   : > { %8074 = vmatpush.bf16.msra.mxu2 %v7997_v61  ;;  %v7529_v61 = vld [vmem:[#allocation4 + $0xd8] sm:$0xf] }
 0x31c   : > { %8066 = vmatpush.bf16.msra.mxu1 %v9250_v15  ;;  %v7991_v15 = vld [vmem:[%s9702_s3 + $0x200] sm:$0xff]  ;;  %v7530_v16 = vor.u32 %v7973_v20, %v7529_v61 }
 0x31e   : > { %5536 = vmatpush.bf16.msrb.mxu0 %v7994_v25 }
 0x31f   : > { %8075 = vmatpush.bf16.msra.mxu2 %v7996_v59 }
 0x320   : > { %4401 = vmatmul.bf16.gmra.mxu1 %v7026_v52 }
 0x321   : > { %4450 = vmatmul.bf16.gmra.mxu2 %v7030_v37  ;;  %8067 = vmatpush.bf16.msra.mxu1 %v9256_v0  ;;  %v9374_v0 = vld [vmem:[%s9703_s4 + $0x30] sm:$0xff] }
 0x322   : > { %4499 = vmatmul.bf16.gmra.mxu3 %v7034_v11  ;;  %5537 = vmatpush.bf16.msrb.mxu0 %v7993_v27  ;;  %v5655_v11 = vshrl.u32 %v7635_v35, 16 }
 0x323   : > { %5467 = vmatmul.bf16.gmra.mxu0 %v7506_v36  ;;  %8076 = vmatpush.bf16.msra.mxu2 %v7995_v34 }
 0x324   : > { %8082 = vmatpush.bf16.msra.mxu3 %v9374_v0  ;;  %v5657_v33 = vrot.slane %v5655_v11, 4 }
 0x325   : > { %8068 = vmatpush.bf16.msra.mxu1 %v9273_v40  ;;  %v7057_v40 = vld [vmem:[#allocation4 + $0xb0] sm:$0xf] }
 0x326   : > { %5538 = vmatpush.bf16.msrb.mxu0 %v7992_v62  ;;  %v7058_v9 = vor.u32 %v7878_v42, %v7057_v40 }
 0x327   : > { %8077 = vmatpush.bf16.msra.mxu2 %v7994_v25  ;;  %v7217_v25 = vld [vmem:[#allocation4 + $0x30] sm:$0xf] }
 0x328   : > { %8083 = vmatpush.bf16.msra.mxu3 %v9381_v10 }
 0x329   : > { %8069 = vmatpush.bf16.msra.mxu1 %v9285_v31  ;;  %v7054_v31 = vor.u32 %v7876_v48, %v7051_v54  ;;  %v7454_v48 = vor.u32 %v7953_v1, %v7453_v6  ;;  %v7243_v6 = vld [vmem:[#allocation4 + $0x6c] sm:$0xf0]  ;;  %v7249_v1 = vld [vmem:[#allocation4 + $0x68] sm:$0xf] }
 0x32a   : > { %5539 = vmatpush.bf16.msrb.mxu0 %v7991_v15 }
 0x32b   : > { %8078 = vmatpush.bf16.msra.mxu2 %v7993_v27  ;;  %v7907_v27 = vld [vmem:[#allocation4 + $0x38] sm:$0xf0] }
 0x32c   : > { %8084 = vmatpush.bf16.msra.mxu3 %v9388_v43 }
 0x32d   : > { %8070 = vmatpush.bf16.msra.mxu1 %v9290_v21  ;;  %v9395_v21 = vld [vmem:[%s9703_s4 + $0x18] sm:$0xff] }
 0x32f   : > { %8079 = vmatpush.bf16.msra.mxu2 %v7992_v62  ;;  %v5666_v62 = vrot.slane %v5664_v8, 5 }
 0x330   : > { %4406 = vmatmul.bf16.gmra.mxu1 %v7038_v46  ;;  %8085 = vmatpush.bf16.msra.mxu3 %v9395_v21  ;;  %v5670_v46 = vrot.slane %v5668_v55, 4 }
 0x331   : > { %4455 = vmatmul.bf16.gmra.mxu2 %v7042_v50  ;;  %8071 = vmatpush.bf16.msra.mxu1 %v9301_v19  ;;  %v7205_v19 = vld [vmem:[#allocation4 + $0x18] sm:$0xf] }
 0x332   : > { %4504 = vmatmul.bf16.gmra.mxu3 %v7046_v28  ;;  %v7206_v3 = vor.u32 %v7904_v23, %v7205_v19  ;;  %v7637_v28 = vld [vmem:[%s8290_s7 + $0x20] sm:$0x1]  ;;  %v5671_v40 = vor.u32 %v5670_v46, %v5666_v62 }
 0x333   : > { %5472 = vmatmul.bf16.gmra.mxu0 %v7518_v32  ;;  %8080 = vmatpush.bf16.msra.mxu2 %v7991_v15  ;;  %v5674_v42 = vshll.u32 %v7637_v28, 16 }
 0x334   : > { %8086 = vmatpush.bf16.msra.mxu3 %v9402_v38 }
 0x335   : > { %8072 = vmatpush.bf16.msra.mxu1 %v9314_v22  ;;  %v7447_v22 = vld [vmem:[#allocation4 + $0x3c] sm:$0xf0] }
 0x336   : > { %v7450_v59 = vor.u32 %v7951_v53, %v7447_v22  ;;  %v7909_v53 = vld [vmem:[#allocation4 + $0x4c] sm:$0xf]  ;;  %v7231_v22 = vld [vmem:[#allocation4 + $0x54] sm:$0xf0] }
 0x337   : > { %v7234_v47 = vor.u32 %v7909_v53, %v7231_v22  ;;  %v3560_v22 = vld [vmem:[#allocation3 + $0x60] sm:$0xf] }
 0x338   : > { %8087 = vmatpush.bf16.msra.mxu3 %v9408_v2 }
 0x33c   : > { %8088 = vmatpush.bf16.msra.mxu3 %v9414_v24 }
 0x340   : > { %4411 = vmatmul.bf16.gmra.mxu1 %v7050_v14  ;;  %v5672_v14 = vrot.slane %v5671_v40, 4 }
 0x341   : > { %4460 = vmatmul.bf16.gmra.mxu2 %v7054_v31  ;;  %v5676_v31 = vrot.slane %v5674_v42, 5  ;;  %v7253_v42 = vld [vmem:[#allocation4 + $0x78] sm:$0xf] }
 0x342   : > { %4509 = vmatmul.bf16.gmra.mxu3 %v7058_v9 }
 0x343   : > { %5477 = vmatmul.bf16.gmra.mxu0 %v7530_v16  ;;  %v5677_v30 = vsel %vm8339_vm5, %v5672_v14, %v5676_v31  ;;  %v7915_v14 = vld [vmem:[#allocation4 + $0x7c] sm:$0xf]  ;;  %v7255_v31 = vld [vmem:[#allocation4 + $0x84] sm:$0xf0] }
 0x34d   : > { %v4377_v45 = vpop.f32.mrf.mxu1 }
 0x350   : > { %v9416_v39 = vpop.f32.mrf.mxu0  ;;  %4893 = vmatmul.bf16.vlgmr.msrb.gmra.mxu1 %v7206_v3 }
 0x351   : > { %4942 = vmatmul.bf16.vlgmr.msrb.gmra.mxu2 %v7210_v18  ;;  %v5879_v18 = vunpack.c.l.b16 %v5677_v30 }
 0x352   : > { %4991 = vmatmul.bf16.vlgmr.msrb.gmra.mxu3 %v7214_v49  ;;  %v7911_v49 = vld [vmem:[#allocation4 + $0x58] sm:$0xf0] }
 0x353   : > { %5491 = vmatmul.bf16.vlgmr.msra.gmra.mxu0 %v7450_v59 }
 0x354   : > { %5958 = vmatpush.bf16.msra.mxu0 %v8006_v58  ;;  %v4426_v26 = vpop.f32.mrf.mxu2  ;;  %v7218_v58 = vor.u32 %v7907_v27, %v7217_v25 }
 0x355   : > { %v4427_v57 = vadd.f32 %v4426_v26, %v4377_v45  ;;  %v4475_v52 = vpop.f32.mrf.mxu3  ;;  %v4379_v37 = vpop.f32.mrf.mxu1  ;;  %v7237_v45 = vld [vmem:[#allocation4 + $0x50] sm:$0xf] }
 0x357   : > { %v9421_v36 = vadd.f32 %v4475_v52, %v4427_v57  ;;  %v7238_v52 = vor.u32 %v7911_v49, %v7237_v45  ;;  %v3561_v45 = vld [vmem:[#allocation3 + $0x64] sm:$0xf]  ;;  %v3759_v49 = vshrl.u32 %v3560_v22, 16 }
 0x358   : > { %v9423_v34 = vpop.f32.mrf.mxu0  ;;  %5959 = vmatpush.bf16.msra.mxu0 %v9374_v0  ;;  %v7222_v0 = vor.u32 %v7906_v13, %v7219_v17  ;;  %v7241_v17 = vld [vmem:[#allocation4 + $0x60] sm:$0xf] }
 0x359   : > { %v7242_v46 = vor.u32 %v7913_v51, %v7241_v17  ;;  %v3870_v17 = vld [vmem:[#allocation3 + $0x60] sm:$0xe]  ;;  %v3872_v51 = vld [vmem:[#allocation3 + $0x68] sm:$0x1] }
 0x35c   : > { %5960 = vmatpush.bf16.msra.mxu0 %v9381_v10  ;;  %v4428_v50 = vpop.f32.mrf.mxu2  ;;  %v5661_v10 = vor.u32 %v5660_v4, %v5657_v33  ;;  %v7914_v33 = vld [vmem:[#allocation4 + $0x70] sm:$0xf0] }
 0x35d   : > { %v4429_v32 = vadd.f32 %v4428_v50, %v4379_v37  ;;  %v4477_v15 = vpop.f32.mrf.mxu3  ;;  %v4382_v60 = vpop.f32.mrf.mxu1  ;;  %v7246_v50 = vor.u32 %v7912_v29, %v7243_v6 }
 0x35e   : > { %v5662_v20 = vrot.slane %v5661_v10, 4 }
 0x35f   : > { %v9428_v54 = vadd.f32 %v4477_v15, %v4429_v32  ;;  %v7250_v32 = vor.u32 %v7914_v33, %v7249_v1  ;;  %v6961_v33 = vrot.slane %v3870_v17, 9  ;;  %v7923_v17 = vld [vmem:[#allocation4 + $0xb8] sm:$0xf0] }
 0x360   : > { %v9430_v61 = vpop.f32.mrf.mxu0  ;;  %5961 = vmatpush.bf16.msra.mxu0 %v9388_v43  ;;  %4898 = vmatmul.bf16.gmra.mxu1 %v7218_v58  ;;  %v5667_v43 = vsel %vm8339_vm5, %v5662_v20, %v5666_v62  ;;  %v7916_v20 = vld [vmem:[#allocation4 + $0x80] sm:$0xf0] }
 0x361   : > { %4947 = vmatmul.bf16.gmra.mxu2 %v7222_v0  ;;  %v5878_v3 = vunpack.c.l.b16 %v5667_v43  ;;  %v7254_v30 = vor.u32 %v7916_v20, %v7253_v42  ;;  %v7265_v42 = vld [vmem:[#allocation4 + $0x90] sm:$0xf]  ;;  %v7919_v20 = vld [vmem:[#allocation4 + $0x98] sm:$0xf0] }
 0x362   : > { %4996 = vmatmul.bf16.gmra.mxu3 %v7226_v63 }
 0x363   : > { %5540 = vmatmul.bf16.vlgmr.msrb.gmra.mxu0 %v7454_v48  ;;  %v5894_v37 = vpack.c.b16 %v5879_v18, %v5878_v3 }
 0x364   : > { %5962 = vmatpush.bf16.msra.mxu0 %v9395_v21  ;;  %v4431_v9 = vpop.f32.mrf.mxu2  ;;  %v7229_v21 = vld [vmem:[#allocation4 + $0x48] sm:$0xf] }
 0x365   : > { %v4432_v16 = vadd.f32 %v4431_v9, %v4382_v60  ;;  %v4480_v19 = vpop.f32.mrf.mxu3  ;;  %v4384_v23 = vpop.f32.mrf.mxu1  ;;  %v7261_v9 = vld [vmem:[#allocation4 + $0x80] sm:$0xf] }
 0x367   : > { %v9434_v41 = vadd.f32 %v4480_v19, %v4432_v16  ;;  %v7917_v16 = vld [vmem:[#allocation4 + $0x88] sm:$0xf0] }
 0x368   : > { %v9436_v7 = vpop.f32.mrf.mxu0  ;;  %5963 = vmatpush.bf16.msra.mxu0 %v9402_v38  ;;  %v7230_v38 = vor.u32 %v7910_v56, %v7229_v21  ;;  %v7258_v21 = vor.u32 %v7915_v14, %v7255_v31  ;;  %v7262_v53 = vor.u32 %v7917_v16, %v7261_v9  ;;  %v7918_v31 = vld [vmem:[#allocation4 + $0x94] sm:$0xf]  ;;  %v7267_v9 = vld [vmem:[#allocation4 + $0x9c] sm:$0xf0] }
 0x36c   : > { %5964 = vmatpush.bf16.msra.mxu0 %v9408_v2  ;;  %v4433_v59 = vpop.f32.mrf.mxu2 }
 0x36d   : > { %v4434_v35 = vadd.f32 %v4433_v59, %v4384_v23  ;;  %v4482_v26 = vpop.f32.mrf.mxu3  ;;  %v4387_v57 = vpop.f32.mrf.mxu1  ;;  %v3762_v59 = vshll.u32 %v3560_v22, 16 }
 0x36f   : > { %v9444_v11 = vadd.f32 %v4482_v26, %v4434_v35  ;;  %v3562_v35 = vld [vmem:[#allocation3 + $0x68] sm:$0x1]  ;;  %v3768_v26 = vshll.u32 %v3561_v45, 16 }
 0x370   : > { %v9446_v5 = vpop.f32.mrf.mxu0  ;;  %5965 = vmatpush.bf16.msra.mxu0 %v9414_v24  ;;  %4903 = vmatmul.bf16.gmra.mxu1 %v7230_v38  ;;  %v3772_v38 = vshrl.u32 %v3561_v45, 16 }
 0x371   : > { %4952 = vmatmul.bf16.gmra.mxu2 %v7234_v47  ;;  %v3871_v47 = vld [vmem:[#allocation3 + $0x64] sm:$0xf] }
 0x372   : > { %5001 = vmatmul.bf16.gmra.mxu3 %v7238_v52  ;;  %v3764_v52 = vrot.slane %v3762_v59, 5 }
 0x373   : > { %5966 = vmatmul.bf16.vlgmr.msra.gmra.mxu0 %v5894_v37  ;;  %v3778_v37 = vshll.u32 %v3562_v35, 16 }
 0x374   : > { %v4436_v2 = vpop.f32.mrf.mxu2 }
 0x375   : > { %v4437_v8 = vadd.f32 %v4436_v2, %v4387_v57  ;;  %v4485_v55 = vpop.f32.mrf.mxu3  ;;  %v4389_v25 = vpop.f32.mrf.mxu1  ;;  %v3761_v57 = vrot.slane %v3759_v49, 4  ;;  %v3964_v2 = vrot.slane %v3871_v47, 5 }
 0x377   : > { %v9449_v27 = vadd.f32 %v4485_v55, %v4437_v8  ;;  %v3770_v55 = vrot.slane %v3768_v26, 5  ;;  %v3765_v1 = vor.u32 %v3764_v52, %v3761_v57 }
 0x378   : > { %v9451_v13 = vpop.f32.mrf.mxu0 }
 0x37c   : > { %v4438_v4 = vpop.f32.mrf.mxu2 }
 0x37d   : > { %v4439_v24 = vadd.f32 %v4438_v4, %v4389_v25  ;;  %v4487_v62 = vpop.f32.mrf.mxu3  ;;  %v4392_v28 = vpop.f32.mrf.mxu1  ;;  %v3774_v25 = vrot.slane %v3772_v38, 4 }
 0x37f   : > { %v9453_v15 = vadd.f32 %v4487_v62, %v4439_v24  ;;  %v3775_v24 = vor.u32 %v3774_v25, %v3770_v55  ;;  %v3780_v62 = vrot.slane %v3778_v37, 5  ;;  %v7277_v37 = vld [vmem:[#allocation4 + $0xa8] sm:$0xf]  ;;  %v7285_v25 = vld [vmem:[#allocation4 + $0xb0] sm:$0xf] }
 0x380   : > { %v9455_v58 = vpop.f32.mrf.mxu0  ;;  %4908 = vmatmul.bf16.gmra.mxu1 %v7242_v46  ;;  %v3966_v46 = vrot.slane %v3964_v2, 4 }
 0x381   : > { %4957 = vmatmul.bf16.gmra.mxu2 %v7246_v50  ;;  %v3967_v50 = vrot.slane %v3872_v51, 5 }
 0x382   : > { %5006 = vmatmul.bf16.gmra.mxu3 %v7250_v32 }
 0x384   : > { %v4441_v0 = vpop.f32.mrf.mxu2 }
 0x385   : > { %v4442_v60 = vadd.f32 %v4441_v0, %v4392_v28  ;;  %v4490_v63 = vpop.f32.mrf.mxu3  ;;  %v4394_v48 = vpop.f32.mrf.mxu1  ;;  %v3766_v0 = vrot.slane %v3765_v1, 4 }
 0x387   : > { %v9457_v10 = vadd.f32 %v4490_v63, %v4442_v60  ;;  %v3965_v60 = vsel %vm8315_vm4, %v6961_v33, %v3964_v2  ;;  %v3776_v63 = vrot.slane %v3775_v24, 4  ;;  %v3771_v14 = vsel %vm8339_vm5, %v3766_v0, %v3770_v55  ;;  %v7922_v2 = vld [vmem:[#allocation4 + $0xb0] sm:$0xf0]  ;;  %v7279_v55 = vld [vmem:[#allocation4 + $0xb4] sm:$0xf0] }
 0x388   : > { %v9459_v40 = vpop.f32.mrf.mxu0  ;;  %4012 = vst [vmem:[#allocation4 + $0xc8] sm:$0xf] %v3965_v60  ;;  %v7278_v1 = vor.u32 %v7922_v2, %v7277_v37  ;;  %v7286_v24 = vor.u32 %v7923_v17, %v7285_v25  ;;  %v7639_v60 = vld [vmem:[%s8290_s7 + $0x28] sm:$0xf] }
 0x389   : > { %v3781_v16 = vsel %vm8339_vm5, %v3776_v63, %v3780_v62  ;;  %3842 = vst [vmem:[#allocation4 + $0xc4] sm:$0xf] %v3771_v14 }
 0x38a   : > { %3843 = vst [vmem:[#allocation4 + $0xd0] sm:$0xf] %v3781_v16  ;;  %v5688_v16 = vshll.u32 %v7639_v60, 16 }
 0x38c   : > { %v4443_v19 = vpop.f32.mrf.mxu2 }
 0x38d   : > { %v4444_v23 = vadd.f32 %v4443_v19, %v4394_v48  ;;  %v4492_v43 = vpop.f32.mrf.mxu3  ;;  %v4397_v56 = vpop.f32.mrf.mxu1  ;;  %v3968_v48 = vsel %vm8315_vm4, %v3966_v46, %v3967_v50  ;;  %v7273_v19 = vld [vmem:[#allocation4 + $0x98] sm:$0xf]  ;;  %v7638_v50 = vld [vmem:[%s8290_s7 + $0x24] sm:$0xf] }
 0x38e   : > { %4013 = vst [vmem:[#allocation4 + $0xd4] sm:$0xf] %v3968_v48 }
 0x38f   : > { %v9461_v3 = vadd.f32 %v4492_v43, %v4444_v23  ;;  %v7920_v23 = vld [vmem:[#allocation4 + $0xa0] sm:$0xf0] }
 0x390   : > { %v9463_v18 = vpop.f32.mrf.mxu0  ;;  %4913 = vmatmul.bf16.gmra.mxu1 %v7254_v30  ;;  %v7274_v45 = vor.u32 %v7920_v23, %v7273_v19  ;;  %v5692_v19 = vshrl.u32 %v7639_v60, 16  ;;  %v7289_v23 = vld [vmem:[#allocation4 + $0xc0] sm:$0xf] }
 0x391   : > { %4962 = vmatmul.bf16.gmra.mxu2 %v7258_v21 }
 0x392   : > { %5011 = vmatmul.bf16.gmra.mxu3 %v7262_v53  ;;  %v7270_v53 = vor.u32 %v7918_v31, %v7267_v9  ;;  %v5682_v9 = vshll.u32 %v7638_v50, 16 }
 0x394   : > { %v4446_v8 = vpop.f32.mrf.mxu2 }
 0x395   : > { %v4447_v29 = vadd.f32 %v4446_v8, %v4397_v56  ;;  %v4495_v6 = vpop.f32.mrf.mxu3  ;;  %v4399_v4 = vpop.f32.mrf.mxu1  ;;  %v7266_v56 = vor.u32 %v7919_v20, %v7265_v42  ;;  %v7921_v8 = vld [vmem:[#allocation4 + $0xac] sm:$0xf]  ;;  %v5679_v20 = vshrl.u32 %v7638_v50, 16 }
 0x396   : > { %v7282_v33 = vor.u32 %v7921_v8, %v7279_v55 }
 0x397   : > { %v9465_v28 = vadd.f32 %v4495_v6, %v4447_v29 }
 0x398   : > { %v9467_v32 = vpop.f32.mrf.mxu0 }
 0x39c   : > { %v4448_v43 = vpop.f32.mrf.mxu2 }
 0x39d   : > { %v4449_v30 = vadd.f32 %v4448_v43, %v4399_v4  ;;  %v4497_v21 = vpop.f32.mrf.mxu3  ;;  %v4402_v22 = vpop.f32.mrf.mxu1  ;;  %v7925_v43 = vld [vmem:[#allocation4 + $0xc8] sm:$0xf0] }
 0x39e   : > { %v7290_v8 = vor.u32 %v7925_v43, %v7289_v23 }
 0x39f   : > { %v9477_v49 = vadd.f32 %v4497_v21, %v4449_v30  ;;  %v7924_v30 = vld [vmem:[#allocation4 + $0xc4] sm:$0xf]  ;;  %v7291_v21 = vld [vmem:[#allocation4 + $0xcc] sm:$0xf0] }
 0x3a0   : > { %v9479_v59 = vpop.f32.mrf.mxu0  ;;  %4918 = vmatmul.bf16.gmra.mxu1 %v7266_v56  ;;  %v7297_v56 = vld [vmem:[#allocation4 + $0xc8] sm:$0xf]  ;;  %v7294_v55 = vor.u32 %v7924_v30, %v7291_v21 }
 0x3a1   : > { %4967 = vmatmul.bf16.gmra.mxu2 %v7270_v53  ;;  %v7926_v53 = vld [vmem:[#allocation4 + $0xd0] sm:$0xf0] }
 0x3a2   : > { %5016 = vmatmul.bf16.gmra.mxu3 %v7274_v45  ;;  %v5684_v45 = vrot.slane %v5682_v9, 5  ;;  %v7298_v17 = vor.u32 %v7926_v53, %v7297_v56  ;;  %v7954_v53 = vld [vmem:[#allocation4 + $0x4c] sm:$0xf] }
 0x3a4   : > { %v4451_v35 = vpop.f32.mrf.mxu2 }
 0x3a5   : > { %v4452_v26 = vadd.f32 %v4451_v35, %v4402_v22  ;;  %v4500_v38 = vpop.f32.mrf.mxu3  ;;  %v4404_v47 = vpop.f32.mrf.mxu1  ;;  %v5681_v22 = vrot.slane %v5679_v20, 4  ;;  %v5690_v35 = vrot.slane %v5688_v16, 5 }
 0x3a7   : > { %v9481_v57 = vadd.f32 %v4500_v38, %v4452_v26  ;;  %v5694_v26 = vrot.slane %v5692_v19, 4 }
 0x3a8   : > { %v9483_v52 = vpop.f32.mrf.mxu0 }
 0x3a9   : > { %9718 = vst [vmem:[#allocation7_spill] sm:$0xff] %v9483_v52 }
 0x3ac   : > { %v4453_v51 = vpop.f32.mrf.mxu2 }
 0x3ad   : > { %v4454_v29 = vadd.f32 %v4453_v51, %v4404_v47  ;;  %v4502_v6 = vpop.f32.mrf.mxu3  ;;  %v4407_v4 = vpop.f32.mrf.mxu1  ;;  %v7640_v47 = vld [vmem:[%s8290_s7 + $0x2c] sm:$0x1] }
 0x3af   : > { %v9485_v62 = vadd.f32 %v4502_v6, %v4454_v29  ;;  %v5685_v6 = vor.u32 %v5684_v45, %v5681_v22  ;;  %v7459_v22 = vld [vmem:[#allocation4 + $0x54] sm:$0xf0]  ;;  %v7465_v45 = vld [vmem:[#allocation4 + $0x50] sm:$0xf] }
 0x3b0   : > { %v9487_v46 = vpop.f32.mrf.mxu0  ;;  %4923 = vmatmul.bf16.gmra.mxu1 %v7278_v1  ;;  %v5695_v1 = vor.u32 %v5694_v26, %v5690_v35  ;;  %v7956_v26 = vld [vmem:[#allocation4 + $0x58] sm:$0xf0] }
 0x3b1   : > { %9719 = vst [vmem:[#allocation8_spill] sm:$0xff] %v9487_v46  ;;  %4972 = vmatmul.bf16.gmra.mxu2 %v7282_v33  ;;  %v5698_v33 = vshll.u32 %v7640_v47, 16  ;;  %v5686_v50 = vrot.slane %v5685_v6, 4  ;;  %v7462_v6 = vor.u32 %v7954_v53, %v7459_v22  ;;  %v7648_v46 = vld [vmem:[%s8290_s7 + $0x4c] sm:$0xf] }
 0x3b2   : > { %5021 = vmatmul.bf16.gmra.mxu3 %v7286_v24  ;;  %v7642_v24 = vld [vmem:[%s8290_s7 + $0x34] sm:$0xf] }
 0x3b3   : > { %v5700_v60 = vrot.slane %v5698_v33, 5  ;;  %v5712_v16 = vshll.u32 %v7642_v24, 16  ;;  %v5716_v19 = vshrl.u32 %v7642_v24, 16  ;;  %v5691_v21 = vsel %vm8339_vm5, %v5686_v50, %v5690_v35 }
 0x3b4   : > { %v4456_v0 = vpop.f32.mrf.mxu2 }
 0x3b5   : > { %v4457_v63 = vadd.f32 %v4456_v0, %v4407_v4  ;;  %v4505_v48 = vpop.f32.mrf.mxu3  ;;  %v4409_v42 = vpop.f32.mrf.mxu1  ;;  %v7641_v4 = vld [vmem:[%s8290_s7 + $0x30] sm:$0xf]  ;;  %v5696_v0 = vrot.slane %v5695_v1, 4  ;;  %v7466_v1 = vor.u32 %v7956_v26, %v7465_v45 }
 0x3b6   : > { %v5706_v9 = vshll.u32 %v7641_v4, 16 }
 0x3b7   : > { %v9491_v14 = vadd.f32 %v4505_v48, %v4457_v63  ;;  %v5703_v48 = vshrl.u32 %v7641_v4, 16  ;;  %v5701_v56 = vsel %vm8339_vm5, %v5696_v0, %v5700_v60 }
 0x3b8   : > { %v9493_v31 = vpop.f32.mrf.mxu0  ;;  %v5708_v47 = vrot.slane %v5706_v9, 5 }
 0x3b9   : > { %9720 = vst [vmem:[#allocation9_spill] sm:$0xff] %v9493_v31 }
 0x3bc   : > { %v4458_v38 = vpop.f32.mrf.mxu2 }
 0x3bd   : > { %v4459_v37 = vadd.f32 %v4458_v38, %v4409_v42  ;;  %v4507_v2 = vpop.f32.mrf.mxu3  ;;  %v4412_v25 = vpop.f32.mrf.mxu1  ;;  %v5705_v38 = vrot.slane %v5703_v48, 4 }
 0x3bf   : > { %v9496_v51 = vadd.f32 %v4507_v2, %v4459_v37  ;;  %v5714_v37 = vrot.slane %v5712_v16, 5  ;;  %v5718_v2 = vrot.slane %v5716_v19, 4  ;;  %v5709_v4 = vor.u32 %v5708_v47, %v5705_v38  ;;  %v7644_v16 = vld [vmem:[%s8290_s7 + $0x3c] sm:$0xf]  ;;  %v7645_v19 = vld [vmem:[%s8290_s7 + $0x40] sm:$0xf] }
 0x3c0   : > { %v9498_v29 = vpop.f32.mrf.mxu0  ;;  %4928 = vmatmul.bf16.gmra.mxu1 %v7290_v8  ;;  %v5880_v8 = vunpack.c.l.b16 %v5691_v21  ;;  %v5727_v45 = vshrl.u32 %v7644_v16, 16  ;;  %v5730_v26 = vshll.u32 %v7644_v16, 16  ;;  %v5736_v38 = vshll.u32 %v7645_v19, 16 }
 0x3c1   : > { %9721 = vst [vmem:[#allocation10_spill] sm:$0xff] %v9498_v29  ;;  %4977 = vmatmul.bf16.gmra.mxu2 %v7294_v55  ;;  %v5881_v55 = vunpack.c.l.b16 %v5701_v56  ;;  %v5719_v24 = vor.u32 %v5718_v2, %v5714_v37  ;;  %v5740_v47 = vshrl.u32 %v7645_v19, 16 }
 0x3c2   : > { %5026 = vmatmul.bf16.gmra.mxu3 %v7298_v17 }
 0x3c3   : > { %v5895_v60 = vpack.c.b16 %v5881_v55, %v5880_v8  ;;  %v7957_v8 = vld [vmem:[#allocation4 + $0x64] sm:$0xf]  ;;  %v7471_v55 = vld [vmem:[#allocation4 + $0x6c] sm:$0xf0] }
 0x3c4   : > { %v4461_v63 = vpop.f32.mrf.mxu2 }
 0x3c5   : > { %v4462_v42 = vadd.f32 %v4461_v63, %v4412_v25  ;;  %v4510_v20 = vpop.f32.mrf.mxu3  ;;  %v4414_v23 = vpop.f32.mrf.mxu1  ;;  %v7643_v25 = vld [vmem:[%s8290_s7 + $0x38] sm:$0x1] }
 0x3c6   : > { %v5722_v50 = vshll.u32 %v7643_v25, 16  ;;  %v7477_v25 = vld [vmem:[#allocation4 + $0x68] sm:$0xf] }
 0x3c7   : > { %v9502_v43 = vadd.f32 %v4510_v20, %v4462_v42  ;;  %v5710_v42 = vrot.slane %v5709_v4, 4  ;;  %v5720_v20 = vrot.slane %v5719_v24, 4  ;;  %v5742_v4 = vrot.slane %v5740_v47, 4  ;;  %v7646_v24 = vld [vmem:[%s8290_s7 + $0x44] sm:$0x1] }
 0x3c8   : > { %v9504_v30 = vpop.f32.mrf.mxu0  ;;  %v5724_v9 = vrot.slane %v5722_v50, 5  ;;  %v5746_v29 = vshll.u32 %v7646_v24, 16  ;;  %v7489_v24 = vld [vmem:[#allocation4 + $0x80] sm:$0xf] }
 0x3c9   : > { %9722 = vst [vmem:[#allocation11_spill] sm:$0xff] %v9504_v30  ;;  %v5715_v56 = vsel %vm8339_vm5, %v5710_v42, %v5714_v37  ;;  %v5732_v37 = vrot.slane %v5730_v26, 5  ;;  %v7474_v42 = vor.u32 %v7957_v8, %v7471_v55 }
 0x3ca   : > { %v5725_v53 = vsel %vm8339_vm5, %v5720_v20, %v5724_v9  ;;  %v5748_v26 = vrot.slane %v5746_v29, 5  ;;  %v5760_v29 = vshll.u32 %v7648_v46, 16 }
 0x3cc   : > { %v4463_v17 = vpop.f32.mrf.mxu2 }
 0x3cd   : > { %v4464_v33 = vadd.f32 %v4463_v17, %v4414_v23  ;;  %v4512_v35 = vpop.f32.mrf.mxu3  ;;  %v4894_v0 = vpop.f32.mrf.mxu1  ;;  %v5882_v17 = vunpack.c.l.b16 %v5715_v56 }
 0x3cf   : > { %v9511_v63 = vadd.f32 %v4512_v35, %v4464_v33  ;;  %v5729_v33 = vrot.slane %v5727_v45, 4  ;;  %v5738_v35 = vrot.slane %v5736_v38, 5  ;;  %v7647_v38 = vld [vmem:[%s8290_s7 + $0x48] sm:$0xf] }
 0x3d0   : > { %v5492_v48 = vpop.f32.mrf.mxu0  ;;  %5496 = vmatmul.bf16.vlgmr.msra.gmra.mxu1 %v7462_v6  ;;  %v5883_v6 = vunpack.c.l.b16 %v5725_v53 }
 0x3d1   : > { %5545 = vmatmul.bf16.vlgmr.msra.gmra.mxu2 %v7466_v1  ;;  %v7959_v1 = vld [vmem:[#allocation4 + $0x70] sm:$0xf0]  ;;  %v5733_v19 = vor.u32 %v5732_v37, %v5729_v33  ;;  %v5743_v30 = vor.u32 %v5742_v4, %v5738_v35  ;;  %v5493_v55 = vadd.f32 %v5492_v48, %v9416_v39  ;;  %v5764_v4 = vshrl.u32 %v7648_v46, 16  ;;  %v7483_v48 = vld [vmem:[#allocation4 + $0x84] sm:$0xf0] }
 0x3d2   : > { %5971 = vmatmul.bf16.vlgmr.msra.gmra.mxu3 %v5895_v60  ;;  %v7478_v20 = vor.u32 %v7959_v1, %v7477_v25  ;;  %v5896_v16 = vpack.c.b16 %v5883_v6, %v5882_v17  ;;  %v5751_v1 = vshrl.u32 %v7647_v38, 16 }
 0x3d3   : > { %v5734_v53 = vrot.slane %v5733_v19, 4  ;;  %v5744_v45 = vrot.slane %v5743_v30, 4  ;;  %v5754_v30 = vshll.u32 %v7647_v38, 16  ;;  %v5762_v19 = vrot.slane %v5760_v29, 5 }
 0x3d4   : > { %v4943_v21 = vpop.f32.mrf.mxu2 }
 0x3d5   : > { %v4992_v23 = vpop.f32.mrf.mxu3  ;;  %v9519_v22 = vpop.f32.mrf.mxu1  ;;  %v4944_v47 = vadd.f32 %v4943_v21, %v4894_v0  ;;  %v5739_v17 = vsel %vm8339_vm5, %v5734_v53, %v5738_v35  ;;  %v5749_v6 = vsel %vm8339_vm5, %v5744_v45, %v5748_v26  ;;  %v7960_v21 = vld [vmem:[#allocation4 + $0x7c] sm:$0xf]  ;;  %v7649_v45 = vld [vmem:[%s8290_s7 + $0x50] sm:$0x1] }
 0x3d6   : > { %v5884_v35 = vunpack.c.l.b16 %v5739_v17  ;;  %v7486_v38 = vor.u32 %v7960_v21, %v7483_v48  ;;  %v9544_v17 = vld [vmem:[%s9704_s5] ss:$0 sm:$0xff] }
 0x3d7   : > { %v4993_v0 = vadd.f32 %v4992_v23, %v4944_v47 }
 0x3d8   : > { %v9521_v2 = vpop.f32.mrf.mxu0 }
 0x3d9   : > { %v5048_v53 = vadd.f32 %v4993_v0, %v9421_v36  ;;  %v5495_v47 = vadd.f32 %v9521_v2, %v9423_v34  ;;  %v7651_v2 = vld [vmem:[%s8290_s7 + $0x58] sm:$0xf] }
 0x3dc   : > { %v4945_v50 = vpop.f32.mrf.mxu2 }
 0x3dd   : > { %v9524_v60 = vpop.f32.mrf.mxu3  ;;  %v4899_v9 = vpop.f32.mrf.mxu1  ;;  %v4946_v46 = vadd.f32 %v4945_v50, %v9519_v22 }
 0x3e0   : > { %v5541_v56 = vpop.f32.mrf.mxu0  ;;  %5501 = vmatmul.bf16.gmra.mxu1 %v7474_v42  ;;  %v7962_v42 = vld [vmem:[#allocation4 + $0x88] sm:$0xf0] }
 0x3e1   : > { %5550 = vmatmul.bf16.gmra.mxu2 %v7478_v20  ;;  %v5542_v39 = vadd.f32 %v5541_v56, %v5493_v55  ;;  %v5885_v20 = vunpack.c.l.b16 %v5749_v6  ;;  %v7490_v56 = vor.u32 %v7962_v42, %v7489_v24 }
 0x3e2   : > { %5976 = vmatmul.bf16.gmra.mxu3 %v5896_v16  ;;  %v5756_v16 = vrot.slane %v5754_v30, 5  ;;  %v4995_v30 = vadd.f32 %v9524_v60, %v4946_v46 }
 0x3e3   : > { %v5597_v55 = vadd.f32 %v5542_v39, %v5048_v53  ;;  %v5897_v36 = vpack.c.b16 %v5885_v20, %v5884_v35  ;;  %v5784_v20 = vshll.u32 %v7651_v2, 16 }
 0x3e4   : > { %v4948_v31 = vpop.f32.mrf.mxu2  ;;  %v5049_v35 = vadd.f32 %v4995_v30, %v9428_v54 }
 0x3e5   : > { %v4949_v52 = vadd.f32 %v4948_v31, %v4899_v9  ;;  %v4997_v8 = vpop.f32.mrf.mxu3  ;;  %v4901_v25 = vpop.f32.mrf.mxu1  ;;  %v5753_v9 = vrot.slane %v5751_v1, 4 }
 0x3e7   : > { %v4998_v33 = vadd.f32 %v4997_v8, %v4949_v52  ;;  %v5766_v52 = vrot.slane %v5764_v4, 4  ;;  %v5757_v6 = vor.u32 %v5756_v16, %v5753_v9 }
 0x3e8   : > { %v5543_v37 = vpop.f32.mrf.mxu0 }
 0x3e9   : > { %v9534_v31 = vadd.f32 %v4998_v33, %v9434_v41  ;;  %v5767_v1 = vor.u32 %v5766_v52, %v5762_v19  ;;  %v7650_v33 = vld [vmem:[%s8290_s7 + $0x54] sm:$0xf]  ;;  %v5544_v4 = vadd.f32 %v5543_v37, %v5495_v47  ;;  %v5758_v48 = vrot.slane %v5757_v6, 4  ;;  %v7965_v6 = vld [vmem:[#allocation4 + $0xa0] sm:$0xf0] }
 0x3ea   : > { %v5775_v21 = vshrl.u32 %v7650_v33, 16  ;;  %v5778_v39 = vshll.u32 %v7650_v33, 16 }
 0x3eb   : > { %v5768_v24 = vrot.slane %v5767_v1, 4  ;;  %v5598_v53 = vadd.f32 %v5544_v4, %v5049_v35 }
 0x3ec   : > { %v4950_v23 = vpop.f32.mrf.mxu2  ;;  %v5777_v37 = vrot.slane %v5775_v21, 4  ;;  %v5780_v46 = vrot.slane %v5778_v39, 5 }
 0x3ed   : > { %v4951_v41 = vadd.f32 %v4950_v23, %v4901_v25  ;;  %v4999_v26 = vpop.f32.mrf.mxu3  ;;  %v4904_v8 = vpop.f32.mrf.mxu1  ;;  %v5770_v25 = vshll.u32 %v7649_v45, 16 }
 0x3ef   : > { %v5000_v22 = vadd.f32 %v4999_v26, %v4951_v41  ;;  %v5772_v42 = vrot.slane %v5770_v25, 5  ;;  %v5763_v41 = vsel %vm8339_vm5, %v5758_v48, %v5762_v19  ;;  %v5781_v25 = vor.u32 %v5780_v46, %v5777_v37 }
 0x3f0   : > { %v5967_v50 = vpop.f32.mrf.mxu0  ;;  %5506 = vmatmul.bf16.gmra.mxu1 %v7486_v38  ;;  %v7652_v38 = vld [vmem:[%s8290_s7 + $0x5c] sm:$0x1]  ;;  %v5886_v1 = vunpack.c.l.b16 %v5763_v41 }
 0x3f1   : > { %v6007_v29 = vadd.f32 %v5967_v50, %v5597_v55  ;;  %v9549_v34 = vadd.f32 %v5000_v22, %v9444_v11  ;;  %5555 = vmatmul.bf16.gmra.mxu2 %v7490_v56  ;;  %v5788_v11 = vshrl.u32 %v7651_v2, 16  ;;  %v5773_v54 = vsel %vm8339_vm5, %v5768_v24, %v5772_v42  ;;  %v7963_v55 = vld [vmem:[#allocation4 + $0x94] sm:$0xf]  ;;  %v7495_v22 = vld [vmem:[#allocation4 + $0x9c] sm:$0xf0] }
 0x3f2   : > { %5981 = vmatmul.bf16.gmra.mxu3 %v5897_v36  ;;  %v9560_v56 = vrot.slane %v5784_v20, 5  ;;  %v7501_v50 = vld [vmem:[#allocation4 + $0x98] sm:$0xf]  ;;  %v5887_v19 = vunpack.c.l.b16 %v5773_v54  ;;  %v5794_v33 = vshll.u32 %v7652_v38, 16  ;;  %v5782_v48 = vrot.slane %v5781_v25, 4 }
 0x3f3   : > { %v6059_v0 = vadd.f32 %v9544_v17, %v6007_v29  ;;  %v5790_v47 = vrot.slane %v5788_v11, 4  ;;  %v3563_v24 = vld [vmem:[#allocation3 + $0x6c] sm:$0xf]  ;;  %v3564_v42 = vld [vmem:[#allocation3 + $0x70] sm:$0xf] }
 0x3f4   : > { %v4953_v60 = vpop.f32.mrf.mxu2  ;;  %v5898_v39 = vpack.c.b16 %v5887_v19, %v5886_v1  ;;  %v7653_v11 = vld [vmem:[%s8290_s7 + $0x60] sm:$0xf]  ;;  %v3796_v46 = vshrl.u32 %v3564_v42, 16  ;;  %v3873_v19 = vld [vmem:[#allocation3 + $0x6c] sm:$0xe] }
 0x3f5   : > { %6075 = vst [vmem:[%s8276_s15] sm:$0xff] %v6059_v0  ;;  %v4954_v9 = vadd.f32 %v4953_v60, %v4904_v8  ;;  %v5002_v16 = vpop.f32.mrf.mxu3  ;;  %v4906_v52 = vpop.f32.mrf.mxu1  ;;  %v5791_v29 = vor.u32 %v5790_v47, %v9560_v56  ;;  %v7498_v0 = vor.u32 %v7963_v55, %v7495_v22  ;;  %v5796_v60 = vrot.slane %v5794_v33, 5  ;;  %v3874_v22 = vld [vmem:[#allocation3 + $0x70] sm:$0xf]  ;;  %v3875_v25 = vld [vmem:[#allocation3 + $0x74] sm:$0x1] }
 0x3f6   : > { %v5799_v38 = vshrl.u32 %v7653_v11, 16  ;;  %v5802_v47 = vshll.u32 %v7653_v11, 16  ;;  %v3798_v55 = vrot.slane %v3796_v46, 4  ;;  %v3971_v33 = vrot.slane %v3874_v22, 5  ;;  %v7507_v11 = vld [vmem:[#allocation4 + $0xb4] sm:$0xf0] }
 0x3f7   : > { %v5003_v23 = vadd.f32 %v5002_v16, %v4954_v9  ;;  %v5792_v20 = vrot.slane %v5791_v29, 4  ;;  %v3783_v9 = vshrl.u32 %v3563_v24, 16  ;;  %v3786_v16 = vshll.u32 %v3563_v24, 16 }
 0x3f8   : > { %v5969_v45 = vpop.f32.mrf.mxu0  ;;  %v3974_v24 = vrot.slane %v3875_v25, 5 }
 0x3f9   : > { %v6008_v26 = vadd.f32 %v5969_v45, %v5598_v53  ;;  %v9563_v8 = vadd.f32 %v5003_v23, %v9449_v27  ;;  %v7502_v27 = vor.u32 %v7965_v6, %v7501_v50  ;;  %v3792_v53 = vshll.u32 %v3564_v42, 16  ;;  %v3565_v45 = vld [vmem:[#allocation3 + $0x74] sm:$0x1] }
 0x3fa   : > { %v5787_v23 = vsel %vm8339_vm5, %v5782_v48, %v9560_v56  ;;  %v3785_v41 = vrot.slane %v3783_v9, 4  ;;  %v3788_v54 = vrot.slane %v3786_v16, 5  ;;  %v5797_v50 = vsel %vm8339_vm5, %v5792_v20, %v5796_v60  ;;  %v7966_v20 = vld [vmem:[#allocation4 + $0xac] sm:$0xf] }
 0x3fb   : > { %v6060_v36 = vadd.f32 %v9544_v17, %v6008_v26  ;;  %v3794_v26 = vrot.slane %v3792_v53, 5  ;;  %v3973_v48 = vrot.slane %v3971_v33, 4  ;;  %v7513_v53 = vld [vmem:[#allocation4 + $0xb0] sm:$0xf]  ;;  %v5888_v46 = vunpack.c.l.b16 %v5787_v23 }
 0x3fc   : > { %v4955_v30 = vpop.f32.mrf.mxu2  ;;  %v3789_v1 = vor.u32 %v3788_v54, %v3785_v41  ;;  %v5801_v54 = vrot.slane %v5799_v38, 4 }
 0x3fd   : > { %6076 = vst [vmem:[%s8276_s15 + $0x8] sm:$0xff] %v6060_v36  ;;  %v4956_v2 = vadd.f32 %v4955_v30, %v4906_v52  ;;  %v5004_v4 = vpop.f32.mrf.mxu3  ;;  %v4909_v21 = vpop.f32.mrf.mxu1  ;;  %v7654_v52 = vld [vmem:[%s8290_s7 + $0x64] sm:$0xf]  ;;  %v3802_v36 = vshll.u32 %v3565_v45, 16  ;;  %v3799_v29 = vor.u32 %v3798_v55, %v3794_v26  ;;  %v3975_v9 = vsel %vm8315_vm4, %v3973_v48, %v3974_v24 }
 0x3fe   : > { %v5808_v6 = vshll.u32 %v7654_v52, 16  ;;  %v5889_v45 = vunpack.c.l.b16 %v5797_v50  ;;  %v5804_v55 = vrot.slane %v5802_v47, 5  ;;  %4015 = vst [vmem:[#allocation4 + $0xec] sm:$0xf] %v3975_v9  ;;  %v7969_v9 = vld [vmem:[#allocation4 + $0xc4] sm:$0xf] }
 0x3ff   : > { %v5005_v35 = vadd.f32 %v5004_v4, %v4956_v2  ;;  %v3804_v2 = vrot.slane %v3802_v36, 5  ;;  %v6962_v4 = vrot.slane %v3873_v19, 9 }
 0x400   : > { %5511 = vmatmul.bf16.gmra.mxu1 %v7498_v0  ;;  %v5810_v36 = vrot.slane %v5808_v6, 5  ;;  %v5899_v50 = vpack.c.b16 %v5889_v45, %v5888_v46  ;;  %v5805_v25 = vor.u32 %v5804_v55, %v5801_v54  ;;  %v7971_v46 = vld [vmem:[#allocation4 + $0xd0] sm:$0xf0] }
 0x401   : > { %v9570_v37 = vadd.f32 %v5005_v35, %v9453_v15  ;;  %5560 = vmatmul.bf16.gmra.mxu2 %v7502_v27  ;;  %v5812_v27 = vshrl.u32 %v7654_v52, 16  ;;  %v3800_v35 = vrot.slane %v3799_v29, 4  ;;  %v3972_v60 = vsel %vm8315_vm4, %v6962_v4, %v3971_v33  ;;  %v7968_v52 = vld [vmem:[#allocation4 + $0xb8] sm:$0xf0] }
 0x402   : > { %5986 = vmatmul.bf16.gmra.mxu3 %v5898_v39  ;;  %v3790_v39 = vrot.slane %v3789_v1, 4  ;;  %4014 = vst [vmem:[#allocation4 + $0xe0] sm:$0xf] %v3972_v60  ;;  %v7514_v19 = vor.u32 %v7968_v52, %v7513_v53  ;;  %v5806_v47 = vrot.slane %v5805_v25, 4  ;;  %v7519_v53 = vld [vmem:[#allocation4 + $0xcc] sm:$0xf0] }
 0x403   : > { %v3805_v41 = vsel %vm8339_vm5, %v3800_v35, %v3804_v2  ;;  %v5814_v22 = vrot.slane %v5812_v27, 4  ;;  %v7656_v2 = vld [vmem:[%s8290_s7 + $0x6c] sm:$0xf]  ;;  %v7525_v52 = vld [vmem:[#allocation4 + $0xc8] sm:$0xf] }
 0x404   : > { %v4958_v15 = vpop.f32.mrf.mxu2  ;;  %3845 = vst [vmem:[#allocation4 + $0xe8] sm:$0xf] %v3805_v41  ;;  %v5811_v24 = vsel %vm8339_vm5, %v5806_v47, %v5810_v36  ;;  %v5826_v60 = vshll.u32 %v7656_v2, 16 }
 0x405   : > { %v4959_v30 = vadd.f32 %v4958_v15, %v4909_v21  ;;  %v5007_v56 = vpop.f32.mrf.mxu3  ;;  %v4911_v0 = vpop.f32.mrf.mxu1  ;;  %v3795_v21 = vsel %vm8339_vm5, %v3790_v39, %v3794_v26  ;;  %v7655_v26 = vld [vmem:[%s8290_s7 + $0x68] sm:$0x1]  ;;  %v5815_v33 = vor.u32 %v5814_v22, %v5810_v36  ;;  %v5890_v45 = vunpack.c.l.b16 %v5811_v24 }
 0x406   : > { %3844 = vst [vmem:[#allocation4 + $0xdc] sm:$0xf] %v3795_v21  ;;  %v5828_v55 = vrot.slane %v5826_v60, 5  ;;  %v7974_v60 = vld [vmem:[#allocation4 + $0xe8] sm:$0xf0] }
 0x407   : > { %v5008_v42 = vadd.f32 %v5007_v56, %v4959_v30  ;;  %v5818_v30 = vshll.u32 %v7655_v26, 16  ;;  %v5816_v6 = vrot.slane %v5815_v33, 4 }
 0x409   : > { %v9585_v16 = vadd.f32 %v5008_v42, %v9457_v10  ;;  %v7510_v10 = vor.u32 %v7966_v20, %v7507_v11  ;;  %v5820_v29 = vrot.slane %v5818_v30, 5 }
 0x40b   : > { %v5821_v42 = vsel %vm8339_vm5, %v5816_v6, %v5820_v29 }
 0x40c   : > { %v4960_v44 = vpop.f32.mrf.mxu2  ;;  %v5891_v41 = vunpack.c.l.b16 %v5821_v42  ;;  %v7537_v42 = vld [vmem:[#allocation4 + $0xe0] sm:$0xf] }
 0x40d   : > { %v4961_v15 = vadd.f32 %v4960_v44, %v4911_v0  ;;  %v5009_v1 = vpop.f32.mrf.mxu3  ;;  %v4914_v23 = vpop.f32.mrf.mxu1  ;;  %v7657_v0 = vld [vmem:[%s8290_s7 + $0x70] sm:$0xf]  ;;  %v7658_v44 = vld [vmem:[%s8290_s7 + $0x74] sm:$0x1] }
 0x40e   : > { %v5832_v20 = vshll.u32 %v7657_v0, 16  ;;  %v5836_v11 = vshrl.u32 %v7657_v0, 16  ;;  %v5842_v30 = vshll.u32 %v7658_v44, 16 }
 0x40f   : > { %v5010_v56 = vadd.f32 %v5009_v1, %v4961_v15 }
 0x410   : > { %5516 = vmatmul.bf16.gmra.mxu1 %v7510_v10  ;;  %v5834_v36 = vrot.slane %v5832_v20, 5  ;;  %v5838_v22 = vrot.slane %v5836_v11, 4  ;;  %v7522_v10 = vor.u32 %v7969_v9, %v7519_v53  ;;  %v5844_v29 = vrot.slane %v5842_v30, 5 }
 0x411   : > { %v9591_v38 = vadd.f32 %v5010_v56, %v9461_v3  ;;  %5565 = vmatmul.bf16.gmra.mxu2 %v7514_v19  ;;  %v5823_v3 = vshrl.u32 %v7656_v2, 16  ;;  %v7526_v19 = vor.u32 %v7971_v46, %v7525_v52 }
 0x412   : > { %5991 = vmatmul.bf16.gmra.mxu3 %v5899_v50  ;;  %v5900_v50 = vpack.c.b16 %v5891_v41, %v5890_v45  ;;  %v5839_v33 = vor.u32 %v5838_v22, %v5834_v36  ;;  %v7538_v45 = vor.u32 %v7974_v60, %v7537_v42 }
 0x413   : > { %v5825_v54 = vrot.slane %v5823_v3, 4  ;;  %v7972_v3 = vld [vmem:[#allocation4 + $0xdc] sm:$0xf] }
 0x414   : > { %v4963_v4 = vpop.f32.mrf.mxu2  ;;  %v5840_v6 = vrot.slane %v5839_v33, 4 }
 0x415   : > { %v4964_v27 = vadd.f32 %v4963_v4, %v4914_v23  ;;  %v5012_v39 = vpop.f32.mrf.mxu3  ;;  %v4916_v48 = vpop.f32.mrf.mxu1  ;;  %v5829_v25 = vor.u32 %v5828_v55, %v5825_v54 }
 0x416   : > { %v5845_v24 = vsel %vm8339_vm5, %v5840_v6, %v5844_v29 }
 0x417   : > { %v5013_v35 = vadd.f32 %v5012_v39, %v4964_v27  ;;  %v5830_v47 = vrot.slane %v5829_v25, 4  ;;  %v5893_v11 = vunpack.c.l.b16 %v5845_v24 }
 0x419   : > { %v9600_v21 = vadd.f32 %v5013_v35, %v9465_v28  ;;  %v7531_v35 = vld [vmem:[#allocation4 + $0xe4] sm:$0xf0] }
 0x41a   : > { %v7534_v46 = vor.u32 %v7972_v3, %v7531_v35 }
 0x41c   : > { %v4965_v26 = vpop.f32.mrf.mxu2 }
 0x41d   : > { %v4966_v15 = vadd.f32 %v4965_v26, %v4916_v48  ;;  %v5014_v1 = vpop.f32.mrf.mxu3  ;;  %v4919_v23 = vpop.f32.mrf.mxu1  ;;  %v5835_v48 = vsel %vm8339_vm5, %v5830_v47, %v5834_v36 }
 0x41e   : > { %v5892_v20 = vunpack.c.l.b16 %v5835_v48 }
 0x41f   : > { %v5015_v28 = vadd.f32 %v5014_v1, %v4966_v15 }
 0x420   : > { %5521 = vmatmul.bf16.gmra.mxu1 %v7522_v10  ;;  %v5901_v54 = vpack.c.b16 %v5893_v11, %v5892_v20 }
 0x421   : > { %v9604_v56 = vadd.f32 %v5015_v28, %v9477_v49  ;;  %5570 = vmatmul.bf16.gmra.mxu2 %v7526_v19 }
 0x422   : > { %5996 = vmatmul.bf16.gmra.mxu3 %v5900_v50 }
 0x424   : > { %v4968_v2 = vpop.f32.mrf.mxu2 }
 0x425   : > { %v4969_v4 = vadd.f32 %v4968_v2, %v4919_v23  ;;  %v5017_v0 = vpop.f32.mrf.mxu3  ;;  %v4921_v27 = vpop.f32.mrf.mxu1 }
 0x427   : > { %v5018_v39 = vadd.f32 %v5017_v0, %v4969_v4 }
 0x429   : > { %v9611_v49 = vadd.f32 %v5018_v39, %v9481_v57 }
 0x42c   : > { %v4970_v9 = vpop.f32.mrf.mxu2 }
 0x42d   : > { %v4971_v53 = vadd.f32 %v4970_v9, %v4921_v27  ;;  %v5019_v52 = vpop.f32.mrf.mxu3  ;;  %v4924_v41 = vpop.f32.mrf.mxu1 }
 0x42f   : > { %v5020_v55 = vadd.f32 %v5019_v52, %v4971_v53 }
 0x430   : > { %5526 = vmatmul.bf16.gmra.mxu1 %v7534_v46 }
 0x431   : > { %v9614_v12 = vadd.f32 %v5020_v55, %v9485_v62  ;;  %5575 = vmatmul.bf16.gmra.mxu2 %v7538_v45 }
 0x432   : > { %6001 = vmatmul.bf16.gmra.mxu3 %v5901_v54 }
 0x434   : > { %v4973_v57 = vpop.f32.mrf.mxu2 }
 0x435   : > { %v4974_v36 = vadd.f32 %v4973_v57, %v4924_v41  ;;  %v5022_v22 = vpop.f32.mrf.mxu3  ;;  %v4926_v26 = vpop.f32.mrf.mxu1 }
 0x437   : > { %v5023_v44 = vadd.f32 %v5022_v22, %v4974_v36 }
 0x439   : > { %v9617_v15 = vadd.f32 %v5023_v44, %v9491_v14 }
 0x43c   : > { %v4975_v1 = vpop.f32.mrf.mxu2 }
 0x43d   : > { %v4976_v10 = vadd.f32 %v4975_v1, %v4926_v26  ;;  %v5024_v19 = vpop.f32.mrf.mxu3  ;;  %v4929_v23 = vpop.f32.mrf.mxu1 }
 0x43f   : > { %v5025_v50 = vadd.f32 %v5024_v19, %v4976_v10 }
 0x441   : > { %v9620_v28 = vadd.f32 %v5025_v50, %v9496_v51 }
 0x444   : > { %v4978_v62 = vpop.f32.mrf.mxu2 }
 0x445   : > { %v4979_v25 = vadd.f32 %v4978_v62, %v4929_v23  ;;  %v5027_v33 = vpop.f32.mrf.mxu3  ;;  %v4931_v30 = vpop.f32.mrf.mxu1 }
 0x447   : > { %v5028_v47 = vadd.f32 %v5027_v33, %v4979_v25 }
 0x449   : > { %v9623_v6 = vadd.f32 %v5028_v47, %v9502_v43 }
 0x44c   : > { %v4980_v29 = vpop.f32.mrf.mxu2 }
 0x44d   : > { %v4981_v14 = vadd.f32 %v4980_v29, %v4931_v30  ;;  %v5029_v2 = vpop.f32.mrf.mxu3  ;;  %v5497_v4 = vpop.f32.mrf.mxu1 }
 0x44e   : > { %v5498_v51 = vadd.f32 %v5497_v4, %v9430_v61 }
 0x44f   : > { %v5030_v0 = vadd.f32 %v5029_v2, %v4981_v14 }
 0x451   : > { %v9626_v27 = vadd.f32 %v5030_v0, %v9511_v63 }
 0x454   : > { %v5546_v39 = vpop.f32.mrf.mxu2 }
 0x455   : > { %v5547_v48 = vadd.f32 %v5546_v39, %v5498_v51  ;;  %v5972_v24 = vpop.f32.mrf.mxu3  ;;  %v5499_v42 = vpop.f32.mrf.mxu1 }
 0x456   : > { %v5500_v60 = vadd.f32 %v5499_v42, %v9436_v7 }
 0x457   : > { %v5599_v3 = vadd.f32 %v5547_v48, %v9534_v31 }
 0x459   : > { %v6009_v43 = vadd.f32 %v5972_v24, %v5599_v3 }
 0x45b   : > { %v6061_v35 = vadd.f32 %v9544_v17, %v6009_v43 }
 0x45c   : > { %v5548_v20 = vpop.f32.mrf.mxu2 }
 0x45d   : > { %6077 = vst [vmem:[%s8276_s15 + $0x10] sm:$0xff] %v6061_v35  ;;  %v5549_v11 = vadd.f32 %v5548_v20, %v5500_v60  ;;  %v5974_v9 = vpop.f32.mrf.mxu3  ;;  %v5502_v63 = vpop.f32.mrf.mxu1 }
 0x45e   : > { %v5503_v46 = vadd.f32 %v5502_v63, %v9446_v5 }
 0x45f   : > { %v5600_v61 = vadd.f32 %v5549_v11, %v9549_v34 }
 0x461   : > { %v6010_v53 = vadd.f32 %v5974_v9, %v5600_v61 }
 0x463   : > { %v6062_v52 = vadd.f32 %v9544_v17, %v6010_v53 }
 0x464   : > { %v5551_v45 = vpop.f32.mrf.mxu2 }
 0x465   : > { %6078 = vst [vmem:[%s8276_s15 + $0x18] sm:$0xff] %v6062_v52  ;;  %v5552_v31 = vadd.f32 %v5551_v45, %v5503_v46  ;;  %v5977_v41 = vpop.f32.mrf.mxu3  ;;  %v5504_v54 = vpop.f32.mrf.mxu1  ;;  %v9723_v45 = vld [vmem:[#allocation7_spill] sm:$0xff] }
 0x466   : > { %v5505_v36 = vadd.f32 %v5504_v54, %v9451_v13 }
 0x467   : > { %v5601_v7 = vadd.f32 %v5552_v31, %v9563_v8 }
 0x469   : > { %v6011_v55 = vadd.f32 %v5977_v41, %v5601_v7 }
 0x46b   : > { %v6063_v57 = vadd.f32 %v9544_v17, %v6011_v55 }
 0x46c   : > { %v5553_v22 = vpop.f32.mrf.mxu2 }
 0x46d   : > { %6079 = vst [vmem:[%s8276_s15 + $0x20] sm:$0xff] %v6063_v57  ;;  %v5554_v34 = vadd.f32 %v5553_v22, %v5505_v36  ;;  %v5979_v26 = vpop.f32.mrf.mxu3  ;;  %v5507_v44 = vpop.f32.mrf.mxu1  ;;  %v9724_v36 = vld [vmem:[#allocation8_spill] sm:$0xff] }
 0x46e   : > { %v5508_v19 = vadd.f32 %v5507_v44, %v9455_v58 }
 0x46f   : > { %v5602_v5 = vadd.f32 %v5554_v34, %v9570_v37 }
 0x471   : > { %v6012_v1 = vadd.f32 %v5979_v26, %v5602_v5 }
 0x473   : > { %v6064_v10 = vadd.f32 %v9544_v17, %v6012_v1 }
 0x474   : > { %v5556_v23 = vpop.f32.mrf.mxu2 }
 0x475   : > { %6080 = vst [vmem:[%s8276_s15 + $0x28] sm:$0xff] %v6064_v10  ;;  %v5557_v8 = vadd.f32 %v5556_v23, %v5508_v19  ;;  %v5982_v50 = vpop.f32.mrf.mxu3  ;;  %v5509_v62 = vpop.f32.mrf.mxu1  ;;  %v9725_v19 = vld [vmem:[#allocation9_spill] sm:$0xff] }
 0x476   : > { %v5510_v30 = vadd.f32 %v5509_v62, %v9459_v40 }
 0x477   : > { %v5603_v13 = vadd.f32 %v5557_v8, %v9585_v16 }
 0x479   : > { %v6013_v25 = vadd.f32 %v5982_v50, %v5603_v13 }
 0x47b   : > { %v6065_v33 = vadd.f32 %v9544_v17, %v6013_v25 }
 0x47c   : > { %v5558_v47 = vpop.f32.mrf.mxu2 }
 0x47d   : > { %6081 = vst [vmem:[%s8276_s15 + $0x30] sm:$0xff] %v6065_v33  ;;  %v5559_v37 = vadd.f32 %v5558_v47, %v5510_v30  ;;  %v5984_v29 = vpop.f32.mrf.mxu3  ;;  %v5512_v14 = vpop.f32.mrf.mxu1  ;;  %v9726_v30 = vld [vmem:[#allocation10_spill] sm:$0xff] }
 0x47e   : > { %v5513_v0 = vadd.f32 %v5512_v14, %v9463_v18 }
 0x47f   : > { %v5604_v58 = vadd.f32 %v5559_v37, %v9591_v38 }
 0x481   : > { %v6014_v2 = vadd.f32 %v5984_v29, %v5604_v58 }
 0x483   : > { %v6066_v4 = vadd.f32 %v9544_v17, %v6014_v2 }
 0x484   : > { %v5561_v51 = vpop.f32.mrf.mxu2 }
 0x485   : > { %6082 = vst [vmem:[%s8276_s15 + $0x38] sm:$0xff] %v6066_v4  ;;  %v5562_v16 = vadd.f32 %v5561_v51, %v5513_v0  ;;  %v5987_v39 = vpop.f32.mrf.mxu3  ;;  %v5514_v48 = vpop.f32.mrf.mxu1  ;;  %v9727_v0 = vld [vmem:[#allocation11_spill] sm:$0xff] }
 0x486   : > { %v5515_v3 = vadd.f32 %v5514_v48, %v9467_v32 }
 0x487   : > { %v5605_v40 = vadd.f32 %v5562_v16, %v9600_v21 }
 0x489   : > { %v6015_v24 = vadd.f32 %v5987_v39, %v5605_v40 }
 0x48b   : > { %v6067_v42 = vadd.f32 %v9544_v17, %v6015_v24 }
 0x48c   : > { %v5563_v43 = vpop.f32.mrf.mxu2 }
 0x48d   : > { %6083 = vst [vmem:[%s8276_s15 + $0x40] sm:$0xff] %v6067_v42  ;;  %v5564_v38 = vadd.f32 %v5563_v43, %v5515_v3  ;;  %v5989_v35 = vpop.f32.mrf.mxu3  ;;  %v5517_v60 = vpop.f32.mrf.mxu1 }
 0x48e   : > { %v5518_v9 = vadd.f32 %v5517_v60, %v9479_v59 }
 0x48f   : > { %v5606_v18 = vadd.f32 %v5564_v38, %v9604_v56 }
 0x491   : > { %v6016_v20 = vadd.f32 %v5989_v35, %v5606_v18 }
 0x493   : > { %v6068_v11 = vadd.f32 %v9544_v17, %v6016_v20 }
 0x494   : > { %v5566_v63 = vpop.f32.mrf.mxu2 }
 0x495   : > { %6084 = vst [vmem:[%s8276_s15 + $0x48] sm:$0xff] %v6068_v11  ;;  %v5567_v21 = vadd.f32 %v5566_v63, %v5518_v9  ;;  %v5992_v61 = vpop.f32.mrf.mxu3  ;;  %v5519_v53 = vpop.f32.mrf.mxu1 }
 0x496   : > { %v5520_v31 = vadd.f32 %v5519_v53, %v9723_v45 }
 0x497   : > { %v5607_v32 = vadd.f32 %v5567_v21, %v9611_v49 }
 0x499   : > { %v6017_v52 = vadd.f32 %v5992_v61, %v5607_v32 }
 0x49b   : > { %v6069_v46 = vadd.f32 %v9544_v17, %v6017_v52 }
 0x49c   : > { %v5568_v41 = vpop.f32.mrf.mxu2 }
 0x49d   : > { %6085 = vst [vmem:[%s8276_s15 + $0x50] sm:$0xff] %v6069_v46  ;;  %v5569_v56 = vadd.f32 %v5568_v41, %v5520_v31  ;;  %v5994_v54 = vpop.f32.mrf.mxu3  ;;  %v5522_v7 = vpop.f32.mrf.mxu1 }
 0x49e   : > { %v5523_v22 = vadd.f32 %v5522_v7, %v9724_v36 }
 0x49f   : > { %v5608_v59 = vadd.f32 %v5569_v56, %v9614_v12 }
 0x4a1   : > { %v6018_v55 = vadd.f32 %v5994_v54, %v5608_v59 }
 0x4a3   : > { %v6070_v57 = vadd.f32 %v9544_v17, %v6018_v55 }
 0x4a4   : > { %v5571_v34 = vpop.f32.mrf.mxu2 }
 0x4a5   : > { %6086 = vst [vmem:[%s8276_s15 + $0x58] sm:$0xff] %v6070_v57  ;;  %v5572_v49 = vadd.f32 %v5571_v34, %v5523_v22  ;;  %v5997_v26 = vpop.f32.mrf.mxu3  ;;  %v5524_v44 = vpop.f32.mrf.mxu1 }
 0x4a6   : > { %v5525_v23 = vadd.f32 %v5524_v44, %v9725_v19 }
 0x4a7   : > { %v5609_v5 = vadd.f32 %v5572_v49, %v9617_v15 }
 0x4a9   : > { %v6019_v1 = vadd.f32 %v5997_v26, %v5609_v5 }
 0x4ab   : > { %v6071_v10 = vadd.f32 %v9544_v17, %v6019_v1 }
 0x4ac   : > { %v5573_v8 = vpop.f32.mrf.mxu2 }
 0x4ad   : > { %6087 = vst [vmem:[%s8276_s15 + $0x60] sm:$0xff] %v6071_v10  ;;  %v5574_v12 = vadd.f32 %v5573_v8, %v5525_v23  ;;  %v5999_v50 = vpop.f32.mrf.mxu3  ;;  %v5527_v62 = vpop.f32.mrf.mxu1 }
 0x4ae   : > { %v5528_v47 = vadd.f32 %v5527_v62, %v9726_v30 }
 0x4af   : > { %v5610_v13 = vadd.f32 %v5574_v12, %v9620_v28 }
 0x4b1   : > { %v6020_v25 = vadd.f32 %v5999_v50, %v5610_v13 }
 0x4b3   : > { %v6072_v33 = vadd.f32 %v9544_v17, %v6020_v25 }
 0x4b4   : > { %v5576_v37 = vpop.f32.mrf.mxu2 }
 0x4b5   : > { %6088 = vst [vmem:[%s8276_s15 + $0x68] sm:$0xff] %v6072_v33  ;;  %v5577_v15 = vadd.f32 %v5576_v37, %v5528_v47  ;;  %v6002_v29 = vpop.f32.mrf.mxu3  ;;  %v5529_v58 = vpop.f32.mrf.mxu1 }
 0x4b6   : > { %v5530_v51 = vadd.f32 %v5529_v58, %v9727_v0 }
 0x4b7   : > { %v5611_v14 = vadd.f32 %v5577_v15, %v9623_v6 }
 0x4b9   : > { %v6021_v2 = vadd.f32 %v6002_v29, %v5611_v14 }
 0x4bb   : > { %v6073_v4 = vadd.f32 %v9544_v17, %v6021_v2 }
 0x4bc   : > { %v5578_v16 = vpop.f32.mrf.mxu2 }
 0x4bd   : > { %6089 = vst [vmem:[%s8276_s15 + $0x70] sm:$0xff] %v6073_v4  ;;  %v5579_v28 = vadd.f32 %v5578_v16, %v5530_v51  ;;  %v6004_v48 = vpop.f32.mrf.mxu3 }
 0x4bf   : > { %v5612_v39 = vadd.f32 %v5579_v28, %v9626_v27 }
 0x4c1   : > { %v6022_v40 = vadd.f32 %v6004_v48, %v5612_v39 }
 0x4c3   : > { %v6074_v24 = vadd.f32 %v9544_v17, %v6022_v40 }
 0x4c5   : > { %6090 = vst [vmem:[%s8276_s15 + $0x78] sm:$0xff] %v6074_v24 }
 0x4c6 PF: > { %s16_s25 = sadd.s32 1, %s8173_s25   ;;  %s9728_s21 = smov %s8165_s23 }
 0x4c7   : > { %p13_p9 = scmp.ge.s32.totalorder %s16_s25, 6   ;;  %s9729_s22 = smov %s8169_s24 }
 0x4c8   : > { %s9730_s23 = smov %s9733_s26  ;;  %s9731_s24 = smov %s9737_s27 }
 0x4c9   :  { %15 = sbr.rel (!%p13_p9) target bundleno = 3 (0x3), region = 92 }

</bundles_post_ra>
